<compile_context>
chip_gen: v6e
topology: v6e:2x2x1
jax: 0.10.0
libtpu: 0.0.40
codegen_flags: <defaults>
</compile_context>

<pallas_src>
import math
import functools

import jax
import jax.numpy as jnp
from jax.experimental import pallas as pl
from jax.experimental.pallas import tpu as pltpu


def _round_up(x, m):
    return (x + m - 1) // m * m


# ----------------------------------------------------------------------------
# Per-generation matmul tiling.  get_tpu_info failure falls back to the
# *conservative* (v7x, 64 MiB VMEM) configuration.
# ----------------------------------------------------------------------------
def _mm_config():
    vmem = 0
    try:
        vmem = int(pltpu.get_tpu_info().vmem_capacity_bytes)
    except Exception:
        vmem = 0
    if vmem > 64 * 1024 * 1024:          # v5e / v6e: 128 MiB physical VMEM
        return 512, 512, 1024, 96 * 1024 * 1024
    return 512, 512, 512, 48 * 1024 * 1024   # v7x (64 MiB) or unknown


_MM_TM, _MM_TN, _MM_TK, _MM_VMEM_LIMIT = _mm_config()


# ----------------------------------------------------------------------------
# Kernel 1: tiled bf16 matmul with f32 accumulation (all linear projections)
# ----------------------------------------------------------------------------
def _matmul_kernel(x_ref, w_ref, o_ref, acc_ref):
    @pl.when(pl.program_id(2) == 0)
    def _():
        acc_ref[...] = jnp.zeros_like(acc_ref)

    acc_ref[...] += jnp.dot(x_ref[...], w_ref[...],
                            preferred_element_type=jnp.float32)

    @pl.when(pl.program_id(2) == pl.num_programs(2) - 1)
    def _():
        o_ref[...] = acc_ref[...].astype(o_ref.dtype)


def pallas_matmul(x, w, *, out_dtype=jnp.float32):
    """x:[M,K] @ w:[K,N] -> [M,N].  bf16 MXU inputs, f32 accumulation."""
    M, K = x.shape
    Kw, N = w.shape
    assert K == Kw

    def _tile(dim, cap):
        # Full-extent block when the dim fits one tile (allowed by the
        # (8,128)-or-full-dim rule) -> no padding; otherwise tile and pad.
        if dim <= cap:
            return dim, dim
        return cap, _round_up(dim, cap)

    tm, Mp = _tile(M, _MM_TM)
    tn, Np = _tile(N, _MM_TN)
    tk, Kp = _tile(K, _MM_TK)

    xp = x.astype(jnp.bfloat16)
    wp = w.astype(jnp.bfloat16)
    if (Mp, Kp) != (M, K):
        xp = jnp.pad(xp, ((0, Mp - M), (0, Kp - K)))
    if (Kp, Np) != (K, N):
        wp = jnp.pad(wp, ((0, Kp - K), (0, Np - N)))

    out = pl.pallas_call(
        _matmul_kernel,
        out_shape=jax.ShapeDtypeStruct((Mp, Np), out_dtype),
        grid=(Mp // tm, Np // tn, Kp // tk),
        in_specs=[pl.BlockSpec((tm, tk), lambda i, j, k: (i, k)),
                  pl.BlockSpec((tk, tn), lambda i, j, k: (k, j))],
        out_specs=pl.BlockSpec((tm, tn), lambda i, j, k: (i, j)),
        scratch_shapes=[pltpu.VMEM((tm, tn), jnp.float32)],
        compiler_params=pltpu.CompilerParams(
            dimension_semantics=("parallel", "parallel", "arbitrary"),
            vmem_limit_bytes=_MM_VMEM_LIMIT),
    )(xp, wp)
    if (Mp, Np) != (M, N):
        out = out[:M, :N]
    return out


# ----------------------------------------------------------------------------
# Kernel 2: fused [short-conv + SiLU] -> [Comba fused recurrence] -> [gated
# per-head RMSNorm].  grid = (B,); heads handled by a static in-kernel loop with
# a per-head [Dk, Dv] state (no block-diagonal redundancy).
#
# TODO(synk): write-key choice follows the closed-loop interpretation (read
#             correction with p, write with k); verify against fla's
#             fused_recurrent_comba reference kernel.
# TODO(synk): assumes FusedRMSNormGated('sigmoid') == norm -> weight -> *sigmoid(g).
# TODO(synk): for v7x dual-TensorCore occupancy at B==1, a (B, H) grid with
#             per-head BlockSpecs would help once Dk/Dv >= 128 (lane alignment);
#             at these small head dims heads stay inside one kernel invocation.
# ----------------------------------------------------------------------------
def _comba_fused_kernel(y_ref, convw_ref, normw_ref, scal_ref, o_ref, *,
                        num_heads, head_k_dim, head_v_dim, conv_taps,
                        scale, beta_scale, l2_eps, norm_eps):
    H, Dk, Dv, KT = num_heads, head_k_dim, head_v_dim, conv_taps
    HDk, HDv = H * Dk, H * Dv
    Cqkv = 2 * HDk + HDv
    T = y_ref.shape[1]

    y = y_ref[0].astype(jnp.float32)                     # [T, Ntot]

    # ---- causal depthwise short-conv + SiLU on the q|k|v channels ----------
    # (roll + row mask: no [T+K-1, C] padded intermediate in VMEM)
    x = y[:, :Cqkv]                                      # [T, Cqkv]
    w = convw_ref[...].astype(jnp.float32)               # [KT, Cqkv]
    row = jax.lax.broadcasted_iota(jnp.int32, (T, 1), 0)
    acc = x * w[KT - 1:KT, :]                            # tap aligned with row t
    for j in range(KT - 1):                              # static unroll over taps
        shift = KT - 1 - j
        xs = pltpu.roll(x, shift=shift, axis=0)          # row t <- x[t-shift] (wrap)
        xs = jnp.where(row >= shift, xs, 0.0)            # causal left boundary
        acc = acc + xs * w[j:j + 1, :]
    qkv = acc * jax.nn.sigmoid(acc)                      # SiLU

    gate = y[:, Cqkv:Cqkv + HDv]                         # g_proj (not conv'd)
    a_all = y[:, Cqkv + HDv:Cqkv + HDv + H]              # a_proj  [T, H]
    b_all = y[:, Cqkv + HDv + H:Cqkv + HDv + 2 * H]      # b_proj  [T, H]
    normw = normw_ref[...].astype(jnp.float32)           # [1, Dv]

    o_heads = []
    for h in range(H):                                   # static loop, heads independent
        sig_decay = scal_ref[0, h]                       # scalars from SMEM
        d_coef = scal_ref[1, h]
        neg_a = scal_ref[2, h]
        dt_b = scal_ref[3, h]

        q_h = qkv[:, h * Dk:(h + 1) * Dk]                # [T, Dk]
        k_h = qkv[:, HDk + h * Dk:HDk + (h + 1) * Dk]    # [T, Dk]
        v_h = qkv[:, 2 * HDk + h * Dv:2 * HDk + (h + 1) * Dv]   # [T, Dv]
        g_h = gate[:, h * Dv:(h + 1) * Dv]               # [T, Dv]

        # elementwise glue; p / q-correction use PRE-norm q,k exactly as the
        # PyTorch wrapper does (l2-norm happens inside the recurrence kernel,
        # matching use_qk_l2norm_in_kernel=True).  Gates are upcast to f32.
        p_h = k_h * sig_decay
        q_h = q_h - d_coef * p_h
        beta_h = beta_scale * jax.nn.sigmoid(b_all[:, h:h + 1])              # [T,1]
        eg_h = jnp.exp(neg_a * jax.nn.softplus(a_all[:, h:h + 1] + dt_b))    # [T,1]

        q_h = q_h * (scale / (jnp.sqrt(jnp.sum(q_h * q_h, axis=1,
                                               keepdims=True)) + l2_eps))
        k_h = k_h / (jnp.sqrt(jnp.sum(k_h * k_h, axis=1, keepdims=True)) + l2_eps)

        kcol = jnp.transpose(k_h)                        # [Dk, T] (one transpose / head)

        # ---- serial recurrence over time (T <= 64 on fused_recurrent path) --
        S = jnp.zeros((Dk, Dv), jnp.float32)             # per-head state
        rows = []
        for t in range(T):                               # static unroll
            S = S * eg_h[t:t + 1, :]                                         # decay
            corr = jnp.dot(p_h[t:t + 1, :], S,
                           preferred_element_type=jnp.float32)               # MXU [1,Dv]
            u = beta_h[t:t + 1, :] * (v_h[t:t + 1, :] - corr)
            S = S + kcol[:, t:t + 1] * u                                      # rank-1 update
            rows.append(jnp.dot(q_h[t:t + 1, :], S,
                                preferred_element_type=jnp.float32))          # MXU readout
        o_h = jnp.concatenate(rows, axis=0)              # [T, Dv]

        # ---- fused gated per-head RMSNorm epilogue --------------------------
        var = jnp.mean(o_h * o_h, axis=1, keepdims=True)
        o_h = o_h * jax.lax.rsqrt(var + norm_eps) * normw * jax.nn.sigmoid(g_h)
        o_heads.append(o_h)

    # single lane-dense [T, H*Dv] store per batch (no per-row masked stores)
    o_ref[0] = jnp.concatenate(o_heads, axis=1).astype(o_ref.dtype)


def comba_fused(y3, conv_w, norm_w, scal, *, num_heads, head_k_dim, head_v_dim,
                conv_taps, scale, beta_scale, l2_eps=1e-6, norm_eps=1e-5,
                out_dtype=jnp.bfloat16):
    B, T, Ntot = y3.shape
    HDk = num_heads * head_k_dim
    HDv = num_heads * head_v_dim
    Cqkv = 2 * HDk + HDv
    assert Ntot == Cqkv + HDv + 2 * num_heads
    kernel = functools.partial(
        _comba_fused_kernel, num_heads=num_heads, head_k_dim=head_k_dim,
        head_v_dim=head_v_dim, conv_taps=conv_taps, scale=scale,
        beta_scale=beta_scale, l2_eps=l2_eps, norm_eps=norm_eps)
    return pl.pallas_call(
        kernel,
        out_shape=jax.ShapeDtypeStruct((B, T, HDv), out_dtype),
        grid=(B,),
        in_specs=[
            pl.BlockSpec((1, T, Ntot), lambda b: (b, 0, 0)),     # fused proj output
            pl.BlockSpec((conv_taps, Cqkv), lambda b: (0, 0)),   # conv filters
            pl.BlockSpec((1, head_v_dim), lambda b: (0, 0)),     # RMSNorm weight
            pl.BlockSpec(memory_space=pltpu.MemorySpace.SMEM),   # per-head scalars [4,H]
        ],
        out_specs=pl.BlockSpec((1, T, HDv), lambda b: (b, 0, 0)),
        compiler_params=pltpu.CompilerParams(
            dimension_semantics=("parallel",)),
    )(y3, conv_w, norm_w, scal)


# ----------------------------------------------------------------------------
# Parameter init (deterministic, synthetic; mirrors Comba.__init__ shapes)
# ----------------------------------------------------------------------------
def init_params(key, *, hidden_size, num_heads, head_k_dim, head_v_dim, conv_size):
    key_dim = num_heads * head_k_dim
    value_dim = num_heads * head_v_dim
    ks = jax.random.split(key, 12)

    def lin(k, fi, fo):
        b = 1.0 / math.sqrt(fi)
        return jax.random.uniform(k, (fi, fo), jnp.float32, -b, b)

    def convw(k, C):
        b = 1.0 / math.sqrt(conv_size)
        return jax.random.uniform(k, (conv_size, C), jnp.float32, -b, b)

    dt = jnp.exp(jax.random.uniform(ks[9], (num_heads,), jnp.float32)
                 * (math.log(0.1) - math.log(0.001)) + math.log(0.001))
    dt = jnp.maximum(dt, 1e-4)
    dt_bias = dt + jnp.log(-jnp.expm1(-dt))

    return dict(
        Wq=lin(ks[0], hidden_size, key_dim),
        Wk=lin(ks[1], hidden_size, key_dim),
        Wv=lin(ks[2], hidden_size, value_dim),
        Wa=lin(ks[3], hidden_size, num_heads),
        Wb=lin(ks[4], hidden_size, num_heads),
        Wg=lin(ks[5], hidden_size, value_dim),
        Wo=lin(ks[6], value_dim, hidden_size),
        conv_q=convw(ks[7], key_dim),
        conv_k=convw(ks[8], key_dim),
        conv_v=convw(ks[10], value_dim),
        A_log=jnp.log(jax.random.uniform(ks[11], (num_heads,), jnp.float32,
                                         0.0, 16.0) + 1e-6),
        decay=jnp.ones((num_heads,), jnp.float32),
        D=jnp.ones((num_heads,), jnp.float32) * 0.01,
        dt_bias=dt_bias.astype(jnp.float32),
        norm_w=jnp.ones((head_v_dim,), jnp.float32),
    )


def prepare_params(P):
    """One-time (outside jit) fusion/cast of parameters: no per-call HBM passes
    over weights inside the jitted forward."""
    W_all = jnp.concatenate(
        [P["Wq"], P["Wk"], P["Wv"], P["Wg"], P["Wa"], P["Wb"]],
        axis=1).astype(jnp.bfloat16)
    conv_w = jnp.concatenate([P["conv_q"], P["conv_k"], P["conv_v"]],
                             axis=1).astype(jnp.float32)
    scal = jnp.stack([jax.nn.sigmoid(P["decay"]), P["D"],
                      -jnp.exp(P["A_log"]), P["dt_bias"]],
                     axis=0).astype(jnp.float32)          # [4, H]
    return dict(
        W_all=W_all,
        conv_w=conv_w,
        scal=scal,
        norm_w=P["norm_w"][None, :].astype(jnp.float32),   # [1, Dv]
        Wo=P["Wo"].astype(jnp.bfloat16),
    )


# ----------------------------------------------------------------------------
# Full Comba forward (no cache, no attention mask, A_type='iplr', use_gate=True,
# fused_recurrent path i.e. T <= 64).
# ----------------------------------------------------------------------------
def comba_forward(x, PP, *, num_heads, head_k_dim, head_v_dim, conv_size,
                  a_type="iplr", norm_eps=1e-5):
    B, T, hidden = x.shape
    H = num_heads
    HDv = H * head_v_dim

    # ---- one fused projection matmul:  x @ [Wq | Wk | Wv | Wg | Wa | Wb] ----
    x2 = x.reshape(B * T, hidden).astype(jnp.bfloat16)
    y = pallas_matmul(x2, PP["W_all"], out_dtype=jnp.bfloat16)
    y3 = y.reshape(B, T, y.shape[1])                     # free reshape, no slicing

    # ---- fused conv+SiLU -> recurrence -> gated RMSNorm (one kernel) --------
    o = comba_fused(
        y3, PP["conv_w"], PP["norm_w"], PP["scal"],
        num_heads=H, head_k_dim=head_k_dim, head_v_dim=head_v_dim,
        conv_taps=conv_size, scale=head_k_dim ** -0.5,
        beta_scale=2.0 if a_type == "iplr" else 1.0,
        norm_eps=norm_eps)                               # [B, T, H*Dv] bf16

    # ---- output projection ---------------------------------------------------
    out = pallas_matmul(o.reshape(B * T, HDv), PP["Wo"], out_dtype=jnp.float32)
    return out.reshape(B, T, hidden)


if __name__ == "__main__":
    # small shapes consistent with the module:
    # hidden_size=32, num_heads=2, head_dim=16, expand_v=2 -> head_v_dim=32,
    # key_dim=32, value_dim=64; conv_size=4; B=2, T=8 (T<=64 => fused_recurrent)
    cfg = dict(hidden_size=32, num_heads=2, head_k_dim=16, head_v_dim=32,
               conv_size=4)
    B, T = 2, 8

    root = jax.random.PRNGKey(0)
    k_param, k_in = jax.random.split(root)
    params = init_params(k_param, **cfg)
    prepared = prepare_params(params)        # pre-fused weights, outside jit
    hidden_states = jax.random.normal(k_in, (B, T, cfg["hidden_size"]),
                                      jnp.float32)

    fwd = jax.jit(functools.partial(
        comba_forward,
        num_heads=cfg["num_heads"], head_k_dim=cfg["head_k_dim"],
        head_v_dim=cfg["head_v_dim"], conv_size=cfg["conv_size"],
        a_type="iplr"))

    out = fwd(hidden_states, prepared)
    jax.block_until_ready(out)
    assert out.shape == (B, T, cfg["hidden_size"])
    assert bool(jnp.all(jnp.isfinite(out)))
    print("KERNEL_OK")
</pallas_src>

<mosaic_0001>
module attributes {stable_mosaic.version = 11 : i64} {
  func.func @_comba_fused_kernel(%arg0: i32, %arg1: memref<1x8x196xbf16, #tpu.memory_space<vmem>>, %arg2: memref<4x128xf32, #tpu.memory_space<vmem>>, %arg3: memref<1x32xf32, #tpu.memory_space<vmem>>, %arg4: memref<4x2xf32, #tpu.memory_space<smem>>, %arg5: memref<1x8x64xbf16, #tpu.memory_space<vmem>>) attributes {dimension_semantics = [#tpu.dimension_semantics<parallel>], iteration_bounds = array<i64: 2>, scalar_prefetch = 0 : i64, scratch_operands = 0 : i64, tpu.core_type = #tpu.core_type<tc>, window_params = [{transform_indices = @transform_0, window_bounds = array<i64: 1, 8, 196>}, {pipeline_mode = #tpu.pipeline_mode<synchronous>, transform_indices = @transform_1, window_bounds = array<i64: 4, 128>}, {pipeline_mode = #tpu.pipeline_mode<synchronous>, transform_indices = @transform_2, window_bounds = array<i64: 1, 32>}, {transform_indices = @transform_3, window_bounds = array<i64: 4, 2>}, {transform_indices = @transform_4, window_bounds = array<i64: 1, 8, 64>}]} {
    %c0 = arith.constant 0 : index
    %c0_0 = arith.constant 0 : index
    %c0_1 = arith.constant 0 : index
    %0 = vector.load %arg1[%c0, %c0_0, %c0_1] : memref<1x8x196xbf16, #tpu.memory_space<vmem>>, vector<1x8x196xbf16>
    %1 = vector.shape_cast %0 : vector<1x8x196xbf16> to vector<8x196xbf16>
    %2 = arith.extf %1 : vector<8x196xbf16> to vector<8x196xf32>
    %3 = vector.extract_strided_slice %2 {offsets = [0, 0], sizes = [8, 128], strides = [1, 1]} : vector<8x196xf32> to vector<8x128xf32>
    %c0_2 = arith.constant 0 : index
    %c0_3 = arith.constant 0 : index
    %4 = vector.load %arg2[%c0_2, %c0_3] : memref<4x128xf32, #tpu.memory_space<vmem>>, vector<4x128xf32>
    %5 = tpu.iota {dimensions = array<i32: 0>} : vector<8x1xi32>
    %6 = vector.extract_strided_slice %4 {offsets = [3, 0], sizes = [1, 128], strides = [1, 1]} : vector<4x128xf32> to vector<1x128xf32>
    %7 = vector.broadcast %6 : vector<1x128xf32> to vector<8x128xf32>
    %8 = arith.mulf %3, %7 : vector<8x128xf32>
    %c3_i32 = arith.constant 3 : i32
    %9 = tpu.dynamic_rotate %3 by %c3_i32 dim 0 : vector<8x128xf32>, i32 -> vector<8x128xf32>
    %c3_i32_4 = arith.constant 3 : i32
    %10 = vector.broadcast %c3_i32_4 : i32 to vector<8x1xi32>
    %11 = arith.cmpi sge, %5, %10 : vector<8x1xi32>
    %cst = arith.constant 0.000000e+00 : f32
    %12 = vector.shape_cast %11 : vector<8x1xi1> to vector<8x1xi1>
    %13 = vector.broadcast %12 : vector<8x1xi1> to vector<8x128xi1>
    %14 = vector.broadcast %cst : f32 to vector<8x128xf32>
    %15 = arith.select %13, %9, %14 : vector<8x128xi1>, vector<8x128xf32>
    %16 = vector.extract_strided_slice %4 {offsets = [0, 0], sizes = [1, 128], strides = [1, 1]} : vector<4x128xf32> to vector<1x128xf32>
    %17 = vector.broadcast %16 : vector<1x128xf32> to vector<8x128xf32>
    %18 = arith.mulf %15, %17 : vector<8x128xf32>
    %19 = arith.addf %8, %18 : vector<8x128xf32>
    %c2_i32 = arith.constant 2 : i32
    %20 = tpu.dynamic_rotate %3 by %c2_i32 dim 0 : vector<8x128xf32>, i32 -> vector<8x128xf32>
    %c2_i32_5 = arith.constant 2 : i32
    %21 = vector.broadcast %c2_i32_5 : i32 to vector<8x1xi32>
    %22 = arith.cmpi sge, %5, %21 : vector<8x1xi32>
    %cst_6 = arith.constant 0.000000e+00 : f32
    %23 = vector.shape_cast %22 : vector<8x1xi1> to vector<8x1xi1>
    %24 = vector.broadcast %23 : vector<8x1xi1> to vector<8x128xi1>
    %25 = vector.broadcast %cst_6 : f32 to vector<8x128xf32>
    %26 = arith.select %24, %20, %25 : vector<8x128xi1>, vector<8x128xf32>
    %27 = vector.extract_strided_slice %4 {offsets = [1, 0], sizes = [1, 128], strides = [1, 1]} : vector<4x128xf32> to vector<1x128xf32>
    %28 = vector.broadcast %27 : vector<1x128xf32> to vector<8x128xf32>
    %29 = arith.mulf %26, %28 : vector<8x128xf32>
    %30 = arith.addf %19, %29 : vector<8x128xf32>
    %c1_i32 = arith.constant 1 : i32
    %31 = tpu.dynamic_rotate %3 by %c1_i32 dim 0 : vector<8x128xf32>, i32 -> vector<8x128xf32>
    %c1_i32_7 = arith.constant 1 : i32
    %32 = vector.broadcast %c1_i32_7 : i32 to vector<8x1xi32>
    %33 = arith.cmpi sge, %5, %32 : vector<8x1xi32>
    %cst_8 = arith.constant 0.000000e+00 : f32
    %34 = vector.shape_cast %33 : vector<8x1xi1> to vector<8x1xi1>
    %35 = vector.broadcast %34 : vector<8x1xi1> to vector<8x128xi1>
    %36 = vector.broadcast %cst_8 : f32 to vector<8x128xf32>
    %37 = arith.select %35, %31, %36 : vector<8x128xi1>, vector<8x128xf32>
    %38 = vector.extract_strided_slice %4 {offsets = [2, 0], sizes = [1, 128], strides = [1, 1]} : vector<4x128xf32> to vector<1x128xf32>
    %39 = vector.broadcast %38 : vector<1x128xf32> to vector<8x128xf32>
    %40 = arith.mulf %37, %39 : vector<8x128xf32>
    %41 = arith.addf %30, %40 : vector<8x128xf32>
    %42 = arith.negf %41 : vector<8x128xf32>
    %43 = math.exp %42 : vector<8x128xf32>
    %cst_9 = arith.constant 1.000000e+00 : f32
    %44 = vector.broadcast %cst_9 : f32 to vector<8x128xf32>
    %45 = arith.addf %44, %43 : vector<8x128xf32>
    %46 = arith.divf %44, %45 : vector<8x128xf32>
    %47 = arith.mulf %41, %46 : vector<8x128xf32>
    %48 = vector.extract_strided_slice %2 {offsets = [0, 128], sizes = [8, 64], strides = [1, 1]} : vector<8x196xf32> to vector<8x64xf32>
    %49 = vector.extract_strided_slice %2 {offsets = [0, 192], sizes = [8, 2], strides = [1, 1]} : vector<8x196xf32> to vector<8x2xf32>
    %50 = vector.extract_strided_slice %2 {offsets = [0, 194], sizes = [8, 2], strides = [1, 1]} : vector<8x196xf32> to vector<8x2xf32>
    %c0_10 = arith.constant 0 : index
    %c0_11 = arith.constant 0 : index
    %51 = vector.load %arg3[%c0_10, %c0_11] : memref<1x32xf32, #tpu.memory_space<vmem>>, vector<1x32xf32>
    %c0_12 = arith.constant 0 : index
    %c0_13 = arith.constant 0 : index
    %52 = memref.load %arg4[%c0_12, %c0_13] : memref<4x2xf32, #tpu.memory_space<smem>>
    %c1 = arith.constant 1 : index
    %c0_14 = arith.constant 0 : index
    %53 = memref.load %arg4[%c1, %c0_14] : memref<4x2xf32, #tpu.memory_space<smem>>
    %c2 = arith.constant 2 : index
    %c0_15 = arith.constant 0 : index
    %54 = memref.load %arg4[%c2, %c0_15] : memref<4x2xf32, #tpu.memory_space<smem>>
    %c3 = arith.constant 3 : index
    %c0_16 = arith.constant 0 : index
    %55 = memref.load %arg4[%c3, %c0_16] : memref<4x2xf32, #tpu.memory_space<smem>>
    %56 = vector.extract_strided_slice %47 {offsets = [0, 0], sizes = [8, 16], strides = [1, 1]} : vector<8x128xf32> to vector<8x16xf32>
    %57 = vector.extract_strided_slice %47 {offsets = [0, 32], sizes = [8, 16], strides = [1, 1]} : vector<8x128xf32> to vector<8x16xf32>
    %58 = vector.extract_strided_slice %47 {offsets = [0, 64], sizes = [8, 32], strides = [1, 1]} : vector<8x128xf32> to vector<8x32xf32>
    %59 = vector.extract_strided_slice %48 {offsets = [0, 0], sizes = [8, 32], strides = [1, 1]} : vector<8x64xf32> to vector<8x32xf32>
    %60 = vector.broadcast %52 : f32 to vector<8x16xf32>
    %61 = arith.mulf %57, %60 : vector<8x16xf32>
    %62 = vector.broadcast %53 : f32 to vector<8x16xf32>
    %63 = arith.mulf %62, %61 : vector<8x16xf32>
    %64 = arith.subf %56, %63 : vector<8x16xf32>
    %65 = vector.extract_strided_slice %50 {offsets = [0, 0], sizes = [8, 1], strides = [1, 1]} : vector<8x2xf32> to vector<8x1xf32>
    %66 = arith.negf %65 : vector<8x1xf32>
    %67 = math.exp %66 : vector<8x1xf32>
    %cst_17 = arith.constant 1.000000e+00 : f32
    %68 = vector.broadcast %cst_17 : f32 to vector<8x1xf32>
    %69 = arith.addf %68, %67 : vector<8x1xf32>
    %70 = arith.divf %68, %69 : vector<8x1xf32>
    %cst_18 = arith.constant 2.000000e+00 : f32
    %71 = vector.broadcast %cst_18 : f32 to vector<8x1xf32>
    %72 = arith.mulf %71, %70 : vector<8x1xf32>
    %73 = vector.extract_strided_slice %49 {offsets = [0, 0], sizes = [8, 1], strides = [1, 1]} : vector<8x2xf32> to vector<8x1xf32>
    %74 = vector.broadcast %55 : f32 to vector<8x1xf32>
    %75 = arith.addf %73, %74 : vector<8x1xf32>
    %cst_19 = arith.constant 0.000000e+00 : f32
    %76 = vector.broadcast %cst_19 : f32 to vector<8x1xf32>
    %77 = arith.maximumf %75, %76 : vector<8x1xf32>
    %78 = vector.broadcast %cst_19 : f32 to vector<8x1xf32>
    %79 = arith.subf %75, %78 : vector<8x1xf32>
    %80 = arith.cmpf one, %79, %79 : vector<8x1xf32>
    %81 = vector.broadcast %cst_19 : f32 to vector<8x1xf32>
    %82 = arith.addf %75, %81 : vector<8x1xf32>
    %83 = math.absf %79 : vector<8x1xf32>
    %cst_20 = arith.constant 0.000000e+00 : f32
    %84 = vector.broadcast %cst_20 : f32 to vector<8x1xf32>
    %85 = arith.subf %84, %83 : vector<8x1xf32>
    %86 = math.exp %85 : vector<8x1xf32>
    %87 = math.log1p %86 : vector<8x1xf32>
    %88 = arith.addf %77, %87 : vector<8x1xf32>
    %89 = arith.select %80, %82, %88 : vector<8x1xi1>, vector<8x1xf32>
    %90 = vector.broadcast %54 : f32 to vector<8x1xf32>
    %91 = arith.mulf %90, %89 : vector<8x1xf32>
    %92 = math.exp %91 : vector<8x1xf32>
    %93 = arith.mulf %64, %64 : vector<8x16xf32>
    %cst_21 = arith.constant dense<0.000000e+00> : vector<8xf32>
    %94 = vector.multi_reduction <add>, %93, %cst_21 [1] : vector<8x16xf32> to vector<8xf32>
    %95 = vector.shape_cast %94 : vector<8xf32> to vector<8x1xf32>
    %96 = math.sqrt %95 : vector<8x1xf32>
    %cst_22 = arith.constant 9.99999997E-7 : f32
    %97 = vector.broadcast %cst_22 : f32 to vector<8x1xf32>
    %98 = arith.addf %96, %97 : vector<8x1xf32>
    %cst_23 = arith.constant 2.500000e-01 : f32
    %99 = vector.broadcast %cst_23 : f32 to vector<8x1xf32>
    %100 = arith.divf %99, %98 : vector<8x1xf32>
    %101 = vector.broadcast %100 : vector<8x1xf32> to vector<8x16xf32>
    %102 = arith.mulf %64, %101 : vector<8x16xf32>
    %103 = arith.mulf %57, %57 : vector<8x16xf32>
    %cst_24 = arith.constant dense<0.000000e+00> : vector<8xf32>
    %104 = vector.multi_reduction <add>, %103, %cst_24 [1] : vector<8x16xf32> to vector<8xf32>
    %105 = vector.shape_cast %104 : vector<8xf32> to vector<8x1xf32>
    %106 = math.sqrt %105 : vector<8x1xf32>
    %cst_25 = arith.constant 9.99999997E-7 : f32
    %107 = vector.broadcast %cst_25 : f32 to vector<8x1xf32>
    %108 = arith.addf %106, %107 : vector<8x1xf32>
    %109 = vector.broadcast %108 : vector<8x1xf32> to vector<8x16xf32>
    %110 = arith.divf %57, %109 : vector<8x16xf32>
    %111 = tpu.transpose %110, [1, 0] : vector<8x16xf32> -> vector<16x8xf32>
    %cst_26 = arith.constant 0.000000e+00 : f32
    %112 = vector.broadcast %cst_26 : f32 to vector<16x32xf32>
    %113 = vector.extract_strided_slice %92 {offsets = [0, 0], sizes = [1, 1], strides = [1, 1]} : vector<8x1xf32> to vector<1x1xf32>
    %114 = vector.broadcast %113 : vector<1x1xf32> to vector<16x32xf32>
    %115 = arith.mulf %112, %114 : vector<16x32xf32>
    %116 = vector.extract_strided_slice %61 {offsets = [0, 0], sizes = [1, 16], strides = [1, 1]} : vector<8x16xf32> to vector<1x16xf32>
    %cst_27 = arith.constant dense<0.000000e+00> : vector<1x32xf32>
    %117 = tpu.matmul %116, %115, %cst_27 {dimension_numbers = #tpu.dot_dimension_numbers<[1], [0], [0], [1], [0, 0, 1, 1], [], []>} : vector<1x16xf32>, vector<16x32xf32>, vector<1x32xf32> -> vector<1x32xf32>
    %118 = vector.extract_strided_slice %72 {offsets = [0, 0], sizes = [1, 1], strides = [1, 1]} : vector<8x1xf32> to vector<1x1xf32>
    %119 = vector.extract_strided_slice %58 {offsets = [0, 0], sizes = [1, 32], strides = [1, 1]} : vector<8x32xf32> to vector<1x32xf32>
    %120 = arith.subf %119, %117 : vector<1x32xf32>
    %121 = vector.broadcast %118 : vector<1x1xf32> to vector<1x32xf32>
    %122 = arith.mulf %121, %120 : vector<1x32xf32>
    %123 = vector.extract_strided_slice %111 {offsets = [0, 0], sizes = [16, 1], strides = [1, 1]} : vector<16x8xf32> to vector<16x1xf32>
    %124 = vector.broadcast %123 : vector<16x1xf32> to vector<16x32xf32>
    %125 = vector.broadcast %122 : vector<1x32xf32> to vector<16x32xf32>
    %126 = arith.mulf %124, %125 : vector<16x32xf32>
    %127 = arith.addf %115, %126 : vector<16x32xf32>
    %128 = vector.extract_strided_slice %102 {offsets = [0, 0], sizes = [1, 16], strides = [1, 1]} : vector<8x16xf32> to vector<1x16xf32>
    %cst_28 = arith.constant dense<0.000000e+00> : vector<1x32xf32>
    %129 = tpu.matmul %128, %127, %cst_28 {dimension_numbers = #tpu.dot_dimension_numbers<[1], [0], [0], [1], [0, 0, 1, 1], [], []>} : vector<1x16xf32>, vector<16x32xf32>, vector<1x32xf32> -> vector<1x32xf32>
    %130 = vector.extract_strided_slice %92 {offsets = [1, 0], sizes = [1, 1], strides = [1, 1]} : vector<8x1xf32> to vector<1x1xf32>
    %131 = vector.broadcast %130 : vector<1x1xf32> to vector<16x32xf32>
    %132 = arith.mulf %127, %131 : vector<16x32xf32>
    %133 = vector.extract_strided_slice %61 {offsets = [1, 0], sizes = [1, 16], strides = [1, 1]} : vector<8x16xf32> to vector<1x16xf32>
    %cst_29 = arith.constant dense<0.000000e+00> : vector<1x32xf32>
    %134 = tpu.matmul %133, %132, %cst_29 {dimension_numbers = #tpu.dot_dimension_numbers<[1], [0], [0], [1], [0, 0, 1, 1], [], []>} : vector<1x16xf32>, vector<16x32xf32>, vector<1x32xf32> -> vector<1x32xf32>
    %135 = vector.extract_strided_slice %72 {offsets = [1, 0], sizes = [1, 1], strides = [1, 1]} : vector<8x1xf32> to vector<1x1xf32>
    %136 = vector.extract_strided_slice %58 {offsets = [1, 0], sizes = [1, 32], strides = [1, 1]} : vector<8x32xf32> to vector<1x32xf32>
    %137 = arith.subf %136, %134 : vector<1x32xf32>
    %138 = vector.broadcast %135 : vector<1x1xf32> to vector<1x32xf32>
    %139 = arith.mulf %138, %137 : vector<1x32xf32>
    %140 = vector.extract_strided_slice %111 {offsets = [0, 1], sizes = [16, 1], strides = [1, 1]} : vector<16x8xf32> to vector<16x1xf32>
    %141 = vector.broadcast %140 : vector<16x1xf32> to vector<16x32xf32>
    %142 = vector.broadcast %139 : vector<1x32xf32> to vector<16x32xf32>
    %143 = arith.mulf %141, %142 : vector<16x32xf32>
    %144 = arith.addf %132, %143 : vector<16x32xf32>
    %145 = vector.extract_strided_slice %102 {offsets = [1, 0], sizes = [1, 16], strides = [1, 1]} : vector<8x16xf32> to vector<1x16xf32>
    %cst_30 = arith.constant dense<0.000000e+00> : vector<1x32xf32>
    %146 = tpu.matmul %145, %144, %cst_30 {dimension_numbers = #tpu.dot_dimension_numbers<[1], [0], [0], [1], [0, 0, 1, 1], [], []>} : vector<1x16xf32>, vector<16x32xf32>, vector<1x32xf32> -> vector<1x32xf32>
    %147 = vector.extract_strided_slice %92 {offsets = [2, 0], sizes = [1, 1], strides = [1, 1]} : vector<8x1xf32> to vector<1x1xf32>
    %148 = vector.broadcast %147 : vector<1x1xf32> to vector<16x32xf32>
    %149 = arith.mulf %144, %148 : vector<16x32xf32>
    %150 = vector.extract_strided_slice %61 {offsets = [2, 0], sizes = [1, 16], strides = [1, 1]} : vector<8x16xf32> to vector<1x16xf32>
    %cst_31 = arith.constant dense<0.000000e+00> : vector<1x32xf32>
    %151 = tpu.matmul %150, %149, %cst_31 {dimension_numbers = #tpu.dot_dimension_numbers<[1], [0], [0], [1], [0, 0, 1, 1], [], []>} : vector<1x16xf32>, vector<16x32xf32>, vector<1x32xf32> -> vector<1x32xf32>
    %152 = vector.extract_strided_slice %72 {offsets = [2, 0], sizes = [1, 1], strides = [1, 1]} : vector<8x1xf32> to vector<1x1xf32>
    %153 = vector.extract_strided_slice %58 {offsets = [2, 0], sizes = [1, 32], strides = [1, 1]} : vector<8x32xf32> to vector<1x32xf32>
    %154 = arith.subf %153, %151 : vector<1x32xf32>
    %155 = vector.broadcast %152 : vector<1x1xf32> to vector<1x32xf32>
    %156 = arith.mulf %155, %154 : vector<1x32xf32>
    %157 = vector.extract_strided_slice %111 {offsets = [0, 2], sizes = [16, 1], strides = [1, 1]} : vector<16x8xf32> to vector<16x1xf32>
    %158 = vector.broadcast %157 : vector<16x1xf32> to vector<16x32xf32>
    %159 = vector.broadcast %156 : vector<1x32xf32> to vector<16x32xf32>
    %160 = arith.mulf %158, %159 : vector<16x32xf32>
    %161 = arith.addf %149, %160 : vector<16x32xf32>
    %162 = vector.extract_strided_slice %102 {offsets = [2, 0], sizes = [1, 16], strides = [1, 1]} : vector<8x16xf32> to vector<1x16xf32>
    %cst_32 = arith.constant dense<0.000000e+00> : vector<1x32xf32>
    %163 = tpu.matmul %162, %161, %cst_32 {dimension_numbers = #tpu.dot_dimension_numbers<[1], [0], [0], [1], [0, 0, 1, 1], [], []>} : vector<1x16xf32>, vector<16x32xf32>, vector<1x32xf32> -> vector<1x32xf32>
    %164 = vector.extract_strided_slice %92 {offsets = [3, 0], sizes = [1, 1], strides = [1, 1]} : vector<8x1xf32> to vector<1x1xf32>
    %165 = vector.broadcast %164 : vector<1x1xf32> to vector<16x32xf32>
    %166 = arith.mulf %161, %165 : vector<16x32xf32>
    %167 = vector.extract_strided_slice %61 {offsets = [3, 0], sizes = [1, 16], strides = [1, 1]} : vector<8x16xf32> to vector<1x16xf32>
    %cst_33 = arith.constant dense<0.000000e+00> : vector<1x32xf32>
    %168 = tpu.matmul %167, %166, %cst_33 {dimension_numbers = #tpu.dot_dimension_numbers<[1], [0], [0], [1], [0, 0, 1, 1], [], []>} : vector<1x16xf32>, vector<16x32xf32>, vector<1x32xf32> -> vector<1x32xf32>
    %169 = vector.extract_strided_slice %72 {offsets = [3, 0], sizes = [1, 1], strides = [1, 1]} : vector<8x1xf32> to vector<1x1xf32>
    %170 = vector.extract_strided_slice %58 {offsets = [3, 0], sizes = [1, 32], strides = [1, 1]} : vector<8x32xf32> to vector<1x32xf32>
    %171 = arith.subf %170, %168 : vector<1x32xf32>
    %172 = vector.broadcast %169 : vector<1x1xf32> to vector<1x32xf32>
    %173 = arith.mulf %172, %171 : vector<1x32xf32>
    %174 = vector.extract_strided_slice %111 {offsets = [0, 3], sizes = [16, 1], strides = [1, 1]} : vector<16x8xf32> to vector<16x1xf32>
    %175 = vector.broadcast %174 : vector<16x1xf32> to vector<16x32xf32>
    %176 = vector.broadcast %173 : vector<1x32xf32> to vector<16x32xf32>
    %177 = arith.mulf %175, %176 : vector<16x32xf32>
    %178 = arith.addf %166, %177 : vector<16x32xf32>
    %179 = vector.extract_strided_slice %102 {offsets = [3, 0], sizes = [1, 16], strides = [1, 1]} : vector<8x16xf32> to vector<1x16xf32>
    %cst_34 = arith.constant dense<0.000000e+00> : vector<1x32xf32>
    %180 = tpu.matmul %179, %178, %cst_34 {dimension_numbers = #tpu.dot_dimension_numbers<[1], [0], [0], [1], [0, 0, 1, 1], [], []>} : vector<1x16xf32>, vector<16x32xf32>, vector<1x32xf32> -> vector<1x32xf32>
    %181 = vector.extract_strided_slice %92 {offsets = [4, 0], sizes = [1, 1], strides = [1, 1]} : vector<8x1xf32> to vector<1x1xf32>
    %182 = vector.broadcast %181 : vector<1x1xf32> to vector<16x32xf32>
    %183 = arith.mulf %178, %182 : vector<16x32xf32>
    %184 = vector.extract_strided_slice %61 {offsets = [4, 0], sizes = [1, 16], strides = [1, 1]} : vector<8x16xf32> to vector<1x16xf32>
    %cst_35 = arith.constant dense<0.000000e+00> : vector<1x32xf32>
    %185 = tpu.matmul %184, %183, %cst_35 {dimension_numbers = #tpu.dot_dimension_numbers<[1], [0], [0], [1], [0, 0, 1, 1], [], []>} : vector<1x16xf32>, vector<16x32xf32>, vector<1x32xf32> -> vector<1x32xf32>
    %186 = vector.extract_strided_slice %72 {offsets = [4, 0], sizes = [1, 1], strides = [1, 1]} : vector<8x1xf32> to vector<1x1xf32>
    %187 = vector.extract_strided_slice %58 {offsets = [4, 0], sizes = [1, 32], strides = [1, 1]} : vector<8x32xf32> to vector<1x32xf32>
    %188 = arith.subf %187, %185 : vector<1x32xf32>
    %189 = vector.broadcast %186 : vector<1x1xf32> to vector<1x32xf32>
    %190 = arith.mulf %189, %188 : vector<1x32xf32>
    %191 = vector.extract_strided_slice %111 {offsets = [0, 4], sizes = [16, 1], strides = [1, 1]} : vector<16x8xf32> to vector<16x1xf32>
    %192 = vector.broadcast %191 : vector<16x1xf32> to vector<16x32xf32>
    %193 = vector.broadcast %190 : vector<1x32xf32> to vector<16x32xf32>
    %194 = arith.mulf %192, %193 : vector<16x32xf32>
    %195 = arith.addf %183, %194 : vector<16x32xf32>
    %196 = vector.extract_strided_slice %102 {offsets = [4, 0], sizes = [1, 16], strides = [1, 1]} : vector<8x16xf32> to vector<1x16xf32>
    %cst_36 = arith.constant dense<0.000000e+00> : vector<1x32xf32>
    %197 = tpu.matmul %196, %195, %cst_36 {dimension_numbers = #tpu.dot_dimension_numbers<[1], [0], [0], [1], [0, 0, 1, 1], [], []>} : vector<1x16xf32>, vector<16x32xf32>, vector<1x32xf32> -> vector<1x32xf32>
    %198 = vector.extract_strided_slice %92 {offsets = [5, 0], sizes = [1, 1], strides = [1, 1]} : vector<8x1xf32> to vector<1x1xf32>
    %199 = vector.broadcast %198 : vector<1x1xf32> to vector<16x32xf32>
    %200 = arith.mulf %195, %199 : vector<16x32xf32>
    %201 = vector.extract_strided_slice %61 {offsets = [5, 0], sizes = [1, 16], strides = [1, 1]} : vector<8x16xf32> to vector<1x16xf32>
    %cst_37 = arith.constant dense<0.000000e+00> : vector<1x32xf32>
    %202 = tpu.matmul %201, %200, %cst_37 {dimension_numbers = #tpu.dot_dimension_numbers<[1], [0], [0], [1], [0, 0, 1, 1], [], []>} : vector<1x16xf32>, vector<16x32xf32>, vector<1x32xf32> -> vector<1x32xf32>
    %203 = vector.extract_strided_slice %72 {offsets = [5, 0], sizes = [1, 1], strides = [1, 1]} : vector<8x1xf32> to vector<1x1xf32>
    %204 = vector.extract_strided_slice %58 {offsets = [5, 0], sizes = [1, 32], strides = [1, 1]} : vector<8x32xf32> to vector<1x32xf32>
    %205 = arith.subf %204, %202 : vector<1x32xf32>
    %206 = vector.broadcast %203 : vector<1x1xf32> to vector<1x32xf32>
    %207 = arith.mulf %206, %205 : vector<1x32xf32>
    %208 = vector.extract_strided_slice %111 {offsets = [0, 5], sizes = [16, 1], strides = [1, 1]} : vector<16x8xf32> to vector<16x1xf32>
    %209 = vector.broadcast %208 : vector<16x1xf32> to vector<16x32xf32>
    %210 = vector.broadcast %207 : vector<1x32xf32> to vector<16x32xf32>
    %211 = arith.mulf %209, %210 : vector<16x32xf32>
    %212 = arith.addf %200, %211 : vector<16x32xf32>
    %213 = vector.extract_strided_slice %102 {offsets = [5, 0], sizes = [1, 16], strides = [1, 1]} : vector<8x16xf32> to vector<1x16xf32>
    %cst_38 = arith.constant dense<0.000000e+00> : vector<1x32xf32>
    %214 = tpu.matmul %213, %212, %cst_38 {dimension_numbers = #tpu.dot_dimension_numbers<[1], [0], [0], [1], [0, 0, 1, 1], [], []>} : vector<1x16xf32>, vector<16x32xf32>, vector<1x32xf32> -> vector<1x32xf32>
    %215 = vector.extract_strided_slice %92 {offsets = [6, 0], sizes = [1, 1], strides = [1, 1]} : vector<8x1xf32> to vector<1x1xf32>
    %216 = vector.broadcast %215 : vector<1x1xf32> to vector<16x32xf32>
    %217 = arith.mulf %212, %216 : vector<16x32xf32>
    %218 = vector.extract_strided_slice %61 {offsets = [6, 0], sizes = [1, 16], strides = [1, 1]} : vector<8x16xf32> to vector<1x16xf32>
    %cst_39 = arith.constant dense<0.000000e+00> : vector<1x32xf32>
    %219 = tpu.matmul %218, %217, %cst_39 {dimension_numbers = #tpu.dot_dimension_numbers<[1], [0], [0], [1], [0, 0, 1, 1], [], []>} : vector<1x16xf32>, vector<16x32xf32>, vector<1x32xf32> -> vector<1x32xf32>
    %220 = vector.extract_strided_slice %72 {offsets = [6, 0], sizes = [1, 1], strides = [1, 1]} : vector<8x1xf32> to vector<1x1xf32>
    %221 = vector.extract_strided_slice %58 {offsets = [6, 0], sizes = [1, 32], strides = [1, 1]} : vector<8x32xf32> to vector<1x32xf32>
    %222 = arith.subf %221, %219 : vector<1x32xf32>
    %223 = vector.broadcast %220 : vector<1x1xf32> to vector<1x32xf32>
    %224 = arith.mulf %223, %222 : vector<1x32xf32>
    %225 = vector.extract_strided_slice %111 {offsets = [0, 6], sizes = [16, 1], strides = [1, 1]} : vector<16x8xf32> to vector<16x1xf32>
    %226 = vector.broadcast %225 : vector<16x1xf32> to vector<16x32xf32>
    %227 = vector.broadcast %224 : vector<1x32xf32> to vector<16x32xf32>
    %228 = arith.mulf %226, %227 : vector<16x32xf32>
    %229 = arith.addf %217, %228 : vector<16x32xf32>
    %230 = vector.extract_strided_slice %102 {offsets = [6, 0], sizes = [1, 16], strides = [1, 1]} : vector<8x16xf32> to vector<1x16xf32>
    %cst_40 = arith.constant dense<0.000000e+00> : vector<1x32xf32>
    %231 = tpu.matmul %230, %229, %cst_40 {dimension_numbers = #tpu.dot_dimension_numbers<[1], [0], [0], [1], [0, 0, 1, 1], [], []>} : vector<1x16xf32>, vector<16x32xf32>, vector<1x32xf32> -> vector<1x32xf32>
    %232 = vector.extract_strided_slice %92 {offsets = [7, 0], sizes = [1, 1], strides = [1, 1]} : vector<8x1xf32> to vector<1x1xf32>
    %233 = vector.broadcast %232 : vector<1x1xf32> to vector<16x32xf32>
    %234 = arith.mulf %229, %233 : vector<16x32xf32>
    %235 = vector.extract_strided_slice %61 {offsets = [7, 0], sizes = [1, 16], strides = [1, 1]} : vector<8x16xf32> to vector<1x16xf32>
    %cst_41 = arith.constant dense<0.000000e+00> : vector<1x32xf32>
    %236 = tpu.matmul %235, %234, %cst_41 {dimension_numbers = #tpu.dot_dimension_numbers<[1], [0], [0], [1], [0, 0, 1, 1], [], []>} : vector<1x16xf32>, vector<16x32xf32>, vector<1x32xf32> -> vector<1x32xf32>
    %237 = vector.extract_strided_slice %72 {offsets = [7, 0], sizes = [1, 1], strides = [1, 1]} : vector<8x1xf32> to vector<1x1xf32>
    %238 = vector.extract_strided_slice %58 {offsets = [7, 0], sizes = [1, 32], strides = [1, 1]} : vector<8x32xf32> to vector<1x32xf32>
    %239 = arith.subf %238, %236 : vector<1x32xf32>
    %240 = vector.broadcast %237 : vector<1x1xf32> to vector<1x32xf32>
    %241 = arith.mulf %240, %239 : vector<1x32xf32>
    %242 = vector.extract_strided_slice %111 {offsets = [0, 7], sizes = [16, 1], strides = [1, 1]} : vector<16x8xf32> to vector<16x1xf32>
    %243 = vector.broadcast %242 : vector<16x1xf32> to vector<16x32xf32>
    %244 = vector.broadcast %241 : vector<1x32xf32> to vector<16x32xf32>
    %245 = arith.mulf %243, %244 : vector<16x32xf32>
    %246 = arith.addf %234, %245 : vector<16x32xf32>
    %247 = vector.extract_strided_slice %102 {offsets = [7, 0], sizes = [1, 16], strides = [1, 1]} : vector<8x16xf32> to vector<1x16xf32>
    %cst_42 = arith.constant dense<0.000000e+00> : vector<1x32xf32>
    %248 = tpu.matmul %247, %246, %cst_42 {dimension_numbers = #tpu.dot_dimension_numbers<[1], [0], [0], [1], [0, 0, 1, 1], [], []>} : vector<1x16xf32>, vector<16x32xf32>, vector<1x32xf32> -> vector<1x32xf32>
    %249 = tpu.concatenate %129, %146, %163, %180, %197, %214, %231, %248 in 0 : vector<1x32xf32>, vector<1x32xf32>, vector<1x32xf32>, vector<1x32xf32>, vector<1x32xf32>, vector<1x32xf32>, vector<1x32xf32>, vector<1x32xf32> -> vector<8x32xf32>
    %250 = arith.mulf %249, %249 : vector<8x32xf32>
    %cst_43 = arith.constant dense<0.000000e+00> : vector<8xf32>
    %251 = vector.multi_reduction <add>, %250, %cst_43 [1] : vector<8x32xf32> to vector<8xf32>
    %252 = vector.shape_cast %251 : vector<8xf32> to vector<8x1xf32>
    %cst_44 = arith.constant 3.200000e+01 : f32
    %253 = vector.broadcast %cst_44 : f32 to vector<8x1xf32>
    %254 = arith.divf %252, %253 : vector<8x1xf32>
    %cst_45 = arith.constant 9.99999974E-6 : f32
    %255 = vector.broadcast %cst_45 : f32 to vector<8x1xf32>
    %256 = arith.addf %254, %255 : vector<8x1xf32>
    %257 = math.rsqrt %256 : vector<8x1xf32>
    %258 = vector.broadcast %257 : vector<8x1xf32> to vector<8x32xf32>
    %259 = arith.mulf %249, %258 : vector<8x32xf32>
    %260 = vector.broadcast %51 : vector<1x32xf32> to vector<8x32xf32>
    %261 = arith.mulf %259, %260 : vector<8x32xf32>
    %262 = arith.negf %59 : vector<8x32xf32>
    %263 = math.exp %262 : vector<8x32xf32>
    %cst_46 = arith.constant 1.000000e+00 : f32
    %264 = vector.broadcast %cst_46 : f32 to vector<8x32xf32>
    %265 = arith.addf %264, %263 : vector<8x32xf32>
    %266 = arith.divf %264, %265 : vector<8x32xf32>
    %267 = arith.mulf %261, %266 : vector<8x32xf32>
    %c0_47 = arith.constant 0 : index
    %c1_48 = arith.constant 1 : index
    %268 = memref.load %arg4[%c0_47, %c1_48] : memref<4x2xf32, #tpu.memory_space<smem>>
    %c1_49 = arith.constant 1 : index
    %c1_50 = arith.constant 1 : index
    %269 = memref.load %arg4[%c1_49, %c1_50] : memref<4x2xf32, #tpu.memory_space<smem>>
    %c2_51 = arith.constant 2 : index
    %c1_52 = arith.constant 1 : index
    %270 = memref.load %arg4[%c2_51, %c1_52] : memref<4x2xf32, #tpu.memory_space<smem>>
    %c3_53 = arith.constant 3 : index
    %c1_54 = arith.constant 1 : index
    %271 = memref.load %arg4[%c3_53, %c1_54] : memref<4x2xf32, #tpu.memory_space<smem>>
    %272 = vector.extract_strided_slice %47 {offsets = [0, 16], sizes = [8, 16], strides = [1, 1]} : vector<8x128xf32> to vector<8x16xf32>
    %273 = vector.extract_strided_slice %47 {offsets = [0, 48], sizes = [8, 16], strides = [1, 1]} : vector<8x128xf32> to vector<8x16xf32>
    %274 = vector.extract_strided_slice %47 {offsets = [0, 96], sizes = [8, 32], strides = [1, 1]} : vector<8x128xf32> to vector<8x32xf32>
    %275 = vector.extract_strided_slice %48 {offsets = [0, 32], sizes = [8, 32], strides = [1, 1]} : vector<8x64xf32> to vector<8x32xf32>
    %276 = vector.broadcast %268 : f32 to vector<8x16xf32>
    %277 = arith.mulf %273, %276 : vector<8x16xf32>
    %278 = vector.broadcast %269 : f32 to vector<8x16xf32>
    %279 = arith.mulf %278, %277 : vector<8x16xf32>
    %280 = arith.subf %272, %279 : vector<8x16xf32>
    %281 = vector.extract_strided_slice %50 {offsets = [0, 1], sizes = [8, 1], strides = [1, 1]} : vector<8x2xf32> to vector<8x1xf32>
    %282 = arith.negf %281 : vector<8x1xf32>
    %283 = math.exp %282 : vector<8x1xf32>
    %cst_55 = arith.constant 1.000000e+00 : f32
    %284 = vector.broadcast %cst_55 : f32 to vector<8x1xf32>
    %285 = arith.addf %284, %283 : vector<8x1xf32>
    %286 = arith.divf %284, %285 : vector<8x1xf32>
    %cst_56 = arith.constant 2.000000e+00 : f32
    %287 = vector.broadcast %cst_56 : f32 to vector<8x1xf32>
    %288 = arith.mulf %287, %286 : vector<8x1xf32>
    %289 = vector.extract_strided_slice %49 {offsets = [0, 1], sizes = [8, 1], strides = [1, 1]} : vector<8x2xf32> to vector<8x1xf32>
    %290 = vector.broadcast %271 : f32 to vector<8x1xf32>
    %291 = arith.addf %289, %290 : vector<8x1xf32>
    %cst_57 = arith.constant 0.000000e+00 : f32
    %292 = vector.broadcast %cst_57 : f32 to vector<8x1xf32>
    %293 = arith.maximumf %291, %292 : vector<8x1xf32>
    %294 = vector.broadcast %cst_57 : f32 to vector<8x1xf32>
    %295 = arith.subf %291, %294 : vector<8x1xf32>
    %296 = arith.cmpf one, %295, %295 : vector<8x1xf32>
    %297 = vector.broadcast %cst_57 : f32 to vector<8x1xf32>
    %298 = arith.addf %291, %297 : vector<8x1xf32>
    %299 = math.absf %295 : vector<8x1xf32>
    %cst_58 = arith.constant 0.000000e+00 : f32
    %300 = vector.broadcast %cst_58 : f32 to vector<8x1xf32>
    %301 = arith.subf %300, %299 : vector<8x1xf32>
    %302 = math.exp %301 : vector<8x1xf32>
    %303 = math.log1p %302 : vector<8x1xf32>
    %304 = arith.addf %293, %303 : vector<8x1xf32>
    %305 = arith.select %296, %298, %304 : vector<8x1xi1>, vector<8x1xf32>
    %306 = vector.broadcast %270 : f32 to vector<8x1xf32>
    %307 = arith.mulf %306, %305 : vector<8x1xf32>
    %308 = math.exp %307 : vector<8x1xf32>
    %309 = arith.mulf %280, %280 : vector<8x16xf32>
    %cst_59 = arith.constant dense<0.000000e+00> : vector<8xf32>
    %310 = vector.multi_reduction <add>, %309, %cst_59 [1] : vector<8x16xf32> to vector<8xf32>
    %311 = vector.shape_cast %310 : vector<8xf32> to vector<8x1xf32>
    %312 = math.sqrt %311 : vector<8x1xf32>
    %cst_60 = arith.constant 9.99999997E-7 : f32
    %313 = vector.broadcast %cst_60 : f32 to vector<8x1xf32>
    %314 = arith.addf %312, %313 : vector<8x1xf32>
    %cst_61 = arith.constant 2.500000e-01 : f32
    %315 = vector.broadcast %cst_61 : f32 to vector<8x1xf32>
    %316 = arith.divf %315, %314 : vector<8x1xf32>
    %317 = vector.broadcast %316 : vector<8x1xf32> to vector<8x16xf32>
    %318 = arith.mulf %280, %317 : vector<8x16xf32>
    %319 = arith.mulf %273, %273 : vector<8x16xf32>
    %cst_62 = arith.constant dense<0.000000e+00> : vector<8xf32>
    %320 = vector.multi_reduction <add>, %319, %cst_62 [1] : vector<8x16xf32> to vector<8xf32>
    %321 = vector.shape_cast %320 : vector<8xf32> to vector<8x1xf32>
    %322 = math.sqrt %321 : vector<8x1xf32>
    %cst_63 = arith.constant 9.99999997E-7 : f32
    %323 = vector.broadcast %cst_63 : f32 to vector<8x1xf32>
    %324 = arith.addf %322, %323 : vector<8x1xf32>
    %325 = vector.broadcast %324 : vector<8x1xf32> to vector<8x16xf32>
    %326 = arith.divf %273, %325 : vector<8x16xf32>
    %327 = tpu.transpose %326, [1, 0] : vector<8x16xf32> -> vector<16x8xf32>
    %cst_64 = arith.constant 0.000000e+00 : f32
    %328 = vector.broadcast %cst_64 : f32 to vector<16x32xf32>
    %329 = vector.extract_strided_slice %308 {offsets = [0, 0], sizes = [1, 1], strides = [1, 1]} : vector<8x1xf32> to vector<1x1xf32>
    %330 = vector.broadcast %329 : vector<1x1xf32> to vector<16x32xf32>
    %331 = arith.mulf %328, %330 : vector<16x32xf32>
    %332 = vector.extract_strided_slice %277 {offsets = [0, 0], sizes = [1, 16], strides = [1, 1]} : vector<8x16xf32> to vector<1x16xf32>
    %cst_65 = arith.constant dense<0.000000e+00> : vector<1x32xf32>
    %333 = tpu.matmul %332, %331, %cst_65 {dimension_numbers = #tpu.dot_dimension_numbers<[1], [0], [0], [1], [0, 0, 1, 1], [], []>} : vector<1x16xf32>, vector<16x32xf32>, vector<1x32xf32> -> vector<1x32xf32>
    %334 = vector.extract_strided_slice %288 {offsets = [0, 0], sizes = [1, 1], strides = [1, 1]} : vector<8x1xf32> to vector<1x1xf32>
    %335 = vector.extract_strided_slice %274 {offsets = [0, 0], sizes = [1, 32], strides = [1, 1]} : vector<8x32xf32> to vector<1x32xf32>
    %336 = arith.subf %335, %333 : vector<1x32xf32>
    %337 = vector.broadcast %334 : vector<1x1xf32> to vector<1x32xf32>
    %338 = arith.mulf %337, %336 : vector<1x32xf32>
    %339 = vector.extract_strided_slice %327 {offsets = [0, 0], sizes = [16, 1], strides = [1, 1]} : vector<16x8xf32> to vector<16x1xf32>
    %340 = vector.broadcast %339 : vector<16x1xf32> to vector<16x32xf32>
    %341 = vector.broadcast %338 : vector<1x32xf32> to vector<16x32xf32>
    %342 = arith.mulf %340, %341 : vector<16x32xf32>
    %343 = arith.addf %331, %342 : vector<16x32xf32>
    %344 = vector.extract_strided_slice %318 {offsets = [0, 0], sizes = [1, 16], strides = [1, 1]} : vector<8x16xf32> to vector<1x16xf32>
    %cst_66 = arith.constant dense<0.000000e+00> : vector<1x32xf32>
    %345 = tpu.matmul %344, %343, %cst_66 {dimension_numbers = #tpu.dot_dimension_numbers<[1], [0], [0], [1], [0, 0, 1, 1], [], []>} : vector<1x16xf32>, vector<16x32xf32>, vector<1x32xf32> -> vector<1x32xf32>
    %346 = vector.extract_strided_slice %308 {offsets = [1, 0], sizes = [1, 1], strides = [1, 1]} : vector<8x1xf32> to vector<1x1xf32>
    %347 = vector.broadcast %346 : vector<1x1xf32> to vector<16x32xf32>
    %348 = arith.mulf %343, %347 : vector<16x32xf32>
    %349 = vector.extract_strided_slice %277 {offsets = [1, 0], sizes = [1, 16], strides = [1, 1]} : vector<8x16xf32> to vector<1x16xf32>
    %cst_67 = arith.constant dense<0.000000e+00> : vector<1x32xf32>
    %350 = tpu.matmul %349, %348, %cst_67 {dimension_numbers = #tpu.dot_dimension_numbers<[1], [0], [0], [1], [0, 0, 1, 1], [], []>} : vector<1x16xf32>, vector<16x32xf32>, vector<1x32xf32> -> vector<1x32xf32>
    %351 = vector.extract_strided_slice %288 {offsets = [1, 0], sizes = [1, 1], strides = [1, 1]} : vector<8x1xf32> to vector<1x1xf32>
    %352 = vector.extract_strided_slice %274 {offsets = [1, 0], sizes = [1, 32], strides = [1, 1]} : vector<8x32xf32> to vector<1x32xf32>
    %353 = arith.subf %352, %350 : vector<1x32xf32>
    %354 = vector.broadcast %351 : vector<1x1xf32> to vector<1x32xf32>
    %355 = arith.mulf %354, %353 : vector<1x32xf32>
    %356 = vector.extract_strided_slice %327 {offsets = [0, 1], sizes = [16, 1], strides = [1, 1]} : vector<16x8xf32> to vector<16x1xf32>
    %357 = vector.broadcast %356 : vector<16x1xf32> to vector<16x32xf32>
    %358 = vector.broadcast %355 : vector<1x32xf32> to vector<16x32xf32>
    %359 = arith.mulf %357, %358 : vector<16x32xf32>
    %360 = arith.addf %348, %359 : vector<16x32xf32>
    %361 = vector.extract_strided_slice %318 {offsets = [1, 0], sizes = [1, 16], strides = [1, 1]} : vector<8x16xf32> to vector<1x16xf32>
    %cst_68 = arith.constant dense<0.000000e+00> : vector<1x32xf32>
    %362 = tpu.matmul %361, %360, %cst_68 {dimension_numbers = #tpu.dot_dimension_numbers<[1], [0], [0], [1], [0, 0, 1, 1], [], []>} : vector<1x16xf32>, vector<16x32xf32>, vector<1x32xf32> -> vector<1x32xf32>
    %363 = vector.extract_strided_slice %308 {offsets = [2, 0], sizes = [1, 1], strides = [1, 1]} : vector<8x1xf32> to vector<1x1xf32>
    %364 = vector.broadcast %363 : vector<1x1xf32> to vector<16x32xf32>
    %365 = arith.mulf %360, %364 : vector<16x32xf32>
    %366 = vector.extract_strided_slice %277 {offsets = [2, 0], sizes = [1, 16], strides = [1, 1]} : vector<8x16xf32> to vector<1x16xf32>
    %cst_69 = arith.constant dense<0.000000e+00> : vector<1x32xf32>
    %367 = tpu.matmul %366, %365, %cst_69 {dimension_numbers = #tpu.dot_dimension_numbers<[1], [0], [0], [1], [0, 0, 1, 1], [], []>} : vector<1x16xf32>, vector<16x32xf32>, vector<1x32xf32> -> vector<1x32xf32>
    %368 = vector.extract_strided_slice %288 {offsets = [2, 0], sizes = [1, 1], strides = [1, 1]} : vector<8x1xf32> to vector<1x1xf32>
    %369 = vector.extract_strided_slice %274 {offsets = [2, 0], sizes = [1, 32], strides = [1, 1]} : vector<8x32xf32> to vector<1x32xf32>
    %370 = arith.subf %369, %367 : vector<1x32xf32>
    %371 = vector.broadcast %368 : vector<1x1xf32> to vector<1x32xf32>
    %372 = arith.mulf %371, %370 : vector<1x32xf32>
    %373 = vector.extract_strided_slice %327 {offsets = [0, 2], sizes = [16, 1], strides = [1, 1]} : vector<16x8xf32> to vector<16x1xf32>
    %374 = vector.broadcast %373 : vector<16x1xf32> to vector<16x32xf32>
    %375 = vector.broadcast %372 : vector<1x32xf32> to vector<16x32xf32>
    %376 = arith.mulf %374, %375 : vector<16x32xf32>
    %377 = arith.addf %365, %376 : vector<16x32xf32>
    %378 = vector.extract_strided_slice %318 {offsets = [2, 0], sizes = [1, 16], strides = [1, 1]} : vector<8x16xf32> to vector<1x16xf32>
    %cst_70 = arith.constant dense<0.000000e+00> : vector<1x32xf32>
    %379 = tpu.matmul %378, %377, %cst_70 {dimension_numbers = #tpu.dot_dimension_numbers<[1], [0], [0], [1], [0, 0, 1, 1], [], []>} : vector<1x16xf32>, vector<16x32xf32>, vector<1x32xf32> -> vector<1x32xf32>
    %380 = vector.extract_strided_slice %308 {offsets = [3, 0], sizes = [1, 1], strides = [1, 1]} : vector<8x1xf32> to vector<1x1xf32>
    %381 = vector.broadcast %380 : vector<1x1xf32> to vector<16x32xf32>
    %382 = arith.mulf %377, %381 : vector<16x32xf32>
    %383 = vector.extract_strided_slice %277 {offsets = [3, 0], sizes = [1, 16], strides = [1, 1]} : vector<8x16xf32> to vector<1x16xf32>
    %cst_71 = arith.constant dense<0.000000e+00> : vector<1x32xf32>
    %384 = tpu.matmul %383, %382, %cst_71 {dimension_numbers = #tpu.dot_dimension_numbers<[1], [0], [0], [1], [0, 0, 1, 1], [], []>} : vector<1x16xf32>, vector<16x32xf32>, vector<1x32xf32> -> vector<1x32xf32>
    %385 = vector.extract_strided_slice %288 {offsets = [3, 0], sizes = [1, 1], strides = [1, 1]} : vector<8x1xf32> to vector<1x1xf32>
    %386 = vector.extract_strided_slice %274 {offsets = [3, 0], sizes = [1, 32], strides = [1, 1]} : vector<8x32xf32> to vector<1x32xf32>
    %387 = arith.subf %386, %384 : vector<1x32xf32>
    %388 = vector.broadcast %385 : vector<1x1xf32> to vector<1x32xf32>
    %389 = arith.mulf %388, %387 : vector<1x32xf32>
    %390 = vector.extract_strided_slice %327 {offsets = [0, 3], sizes = [16, 1], strides = [1, 1]} : vector<16x8xf32> to vector<16x1xf32>
    %391 = vector.broadcast %390 : vector<16x1xf32> to vector<16x32xf32>
    %392 = vector.broadcast %389 : vector<1x32xf32> to vector<16x32xf32>
    %393 = arith.mulf %391, %392 : vector<16x32xf32>
    %394 = arith.addf %382, %393 : vector<16x32xf32>
    %395 = vector.extract_strided_slice %318 {offsets = [3, 0], sizes = [1, 16], strides = [1, 1]} : vector<8x16xf32> to vector<1x16xf32>
    %cst_72 = arith.constant dense<0.000000e+00> : vector<1x32xf32>
    %396 = tpu.matmul %395, %394, %cst_72 {dimension_numbers = #tpu.dot_dimension_numbers<[1], [0], [0], [1], [0, 0, 1, 1], [], []>} : vector<1x16xf32>, vector<16x32xf32>, vector<1x32xf32> -> vector<1x32xf32>
    %397 = vector.extract_strided_slice %308 {offsets = [4, 0], sizes = [1, 1], strides = [1, 1]} : vector<8x1xf32> to vector<1x1xf32>
    %398 = vector.broadcast %397 : vector<1x1xf32> to vector<16x32xf32>
    %399 = arith.mulf %394, %398 : vector<16x32xf32>
    %400 = vector.extract_strided_slice %277 {offsets = [4, 0], sizes = [1, 16], strides = [1, 1]} : vector<8x16xf32> to vector<1x16xf32>
    %cst_73 = arith.constant dense<0.000000e+00> : vector<1x32xf32>
    %401 = tpu.matmul %400, %399, %cst_73 {dimension_numbers = #tpu.dot_dimension_numbers<[1], [0], [0], [1], [0, 0, 1, 1], [], []>} : vector<1x16xf32>, vector<16x32xf32>, vector<1x32xf32> -> vector<1x32xf32>
    %402 = vector.extract_strided_slice %288 {offsets = [4, 0], sizes = [1, 1], strides = [1, 1]} : vector<8x1xf32> to vector<1x1xf32>
    %403 = vector.extract_strided_slice %274 {offsets = [4, 0], sizes = [1, 32], strides = [1, 1]} : vector<8x32xf32> to vector<1x32xf32>
    %404 = arith.subf %403, %401 : vector<1x32xf32>
    %405 = vector.broadcast %402 : vector<1x1xf32> to vector<1x32xf32>
    %406 = arith.mulf %405, %404 : vector<1x32xf32>
    %407 = vector.extract_strided_slice %327 {offsets = [0, 4], sizes = [16, 1], strides = [1, 1]} : vector<16x8xf32> to vector<16x1xf32>
    %408 = vector.broadcast %407 : vector<16x1xf32> to vector<16x32xf32>
    %409 = vector.broadcast %406 : vector<1x32xf32> to vector<16x32xf32>
    %410 = arith.mulf %408, %409 : vector<16x32xf32>
    %411 = arith.addf %399, %410 : vector<16x32xf32>
    %412 = vector.extract_strided_slice %318 {offsets = [4, 0], sizes = [1, 16], strides = [1, 1]} : vector<8x16xf32> to vector<1x16xf32>
    %cst_74 = arith.constant dense<0.000000e+00> : vector<1x32xf32>
    %413 = tpu.matmul %412, %411, %cst_74 {dimension_numbers = #tpu.dot_dimension_numbers<[1], [0], [0], [1], [0, 0, 1, 1], [], []>} : vector<1x16xf32>, vector<16x32xf32>, vector<1x32xf32> -> vector<1x32xf32>
    %414 = vector.extract_strided_slice %308 {offsets = [5, 0], sizes = [1, 1], strides = [1, 1]} : vector<8x1xf32> to vector<1x1xf32>
    %415 = vector.broadcast %414 : vector<1x1xf32> to vector<16x32xf32>
    %416 = arith.mulf %411, %415 : vector<16x32xf32>
    %417 = vector.extract_strided_slice %277 {offsets = [5, 0], sizes = [1, 16], strides = [1, 1]} : vector<8x16xf32> to vector<1x16xf32>
    %cst_75 = arith.constant dense<0.000000e+00> : vector<1x32xf32>
    %418 = tpu.matmul %417, %416, %cst_75 {dimension_numbers = #tpu.dot_dimension_numbers<[1], [0], [0], [1], [0, 0, 1, 1], [], []>} : vector<1x16xf32>, vector<16x32xf32>, vector<1x32xf32> -> vector<1x32xf32>
    %419 = vector.extract_strided_slice %288 {offsets = [5, 0], sizes = [1, 1], strides = [1, 1]} : vector<8x1xf32> to vector<1x1xf32>
    %420 = vector.extract_strided_slice %274 {offsets = [5, 0], sizes = [1, 32], strides = [1, 1]} : vector<8x32xf32> to vector<1x32xf32>
    %421 = arith.subf %420, %418 : vector<1x32xf32>
    %422 = vector.broadcast %419 : vector<1x1xf32> to vector<1x32xf32>
    %423 = arith.mulf %422, %421 : vector<1x32xf32>
    %424 = vector.extract_strided_slice %327 {offsets = [0, 5], sizes = [16, 1], strides = [1, 1]} : vector<16x8xf32> to vector<16x1xf32>
    %425 = vector.broadcast %424 : vector<16x1xf32> to vector<16x32xf32>
    %426 = vector.broadcast %423 : vector<1x32xf32> to vector<16x32xf32>
    %427 = arith.mulf %425, %426 : vector<16x32xf32>
    %428 = arith.addf %416, %427 : vector<16x32xf32>
    %429 = vector.extract_strided_slice %318 {offsets = [5, 0], sizes = [1, 16], strides = [1, 1]} : vector<8x16xf32> to vector<1x16xf32>
    %cst_76 = arith.constant dense<0.000000e+00> : vector<1x32xf32>
    %430 = tpu.matmul %429, %428, %cst_76 {dimension_numbers = #tpu.dot_dimension_numbers<[1], [0], [0], [1], [0, 0, 1, 1], [], []>} : vector<1x16xf32>, vector<16x32xf32>, vector<1x32xf32> -> vector<1x32xf32>
    %431 = vector.extract_strided_slice %308 {offsets = [6, 0], sizes = [1, 1], strides = [1, 1]} : vector<8x1xf32> to vector<1x1xf32>
    %432 = vector.broadcast %431 : vector<1x1xf32> to vector<16x32xf32>
    %433 = arith.mulf %428, %432 : vector<16x32xf32>
    %434 = vector.extract_strided_slice %277 {offsets = [6, 0], sizes = [1, 16], strides = [1, 1]} : vector<8x16xf32> to vector<1x16xf32>
    %cst_77 = arith.constant dense<0.000000e+00> : vector<1x32xf32>
    %435 = tpu.matmul %434, %433, %cst_77 {dimension_numbers = #tpu.dot_dimension_numbers<[1], [0], [0], [1], [0, 0, 1, 1], [], []>} : vector<1x16xf32>, vector<16x32xf32>, vector<1x32xf32> -> vector<1x32xf32>
    %436 = vector.extract_strided_slice %288 {offsets = [6, 0], sizes = [1, 1], strides = [1, 1]} : vector<8x1xf32> to vector<1x1xf32>
    %437 = vector.extract_strided_slice %274 {offsets = [6, 0], sizes = [1, 32], strides = [1, 1]} : vector<8x32xf32> to vector<1x32xf32>
    %438 = arith.subf %437, %435 : vector<1x32xf32>
    %439 = vector.broadcast %436 : vector<1x1xf32> to vector<1x32xf32>
    %440 = arith.mulf %439, %438 : vector<1x32xf32>
    %441 = vector.extract_strided_slice %327 {offsets = [0, 6], sizes = [16, 1], strides = [1, 1]} : vector<16x8xf32> to vector<16x1xf32>
    %442 = vector.broadcast %441 : vector<16x1xf32> to vector<16x32xf32>
    %443 = vector.broadcast %440 : vector<1x32xf32> to vector<16x32xf32>
    %444 = arith.mulf %442, %443 : vector<16x32xf32>
    %445 = arith.addf %433, %444 : vector<16x32xf32>
    %446 = vector.extract_strided_slice %318 {offsets = [6, 0], sizes = [1, 16], strides = [1, 1]} : vector<8x16xf32> to vector<1x16xf32>
    %cst_78 = arith.constant dense<0.000000e+00> : vector<1x32xf32>
    %447 = tpu.matmul %446, %445, %cst_78 {dimension_numbers = #tpu.dot_dimension_numbers<[1], [0], [0], [1], [0, 0, 1, 1], [], []>} : vector<1x16xf32>, vector<16x32xf32>, vector<1x32xf32> -> vector<1x32xf32>
    %448 = vector.extract_strided_slice %308 {offsets = [7, 0], sizes = [1, 1], strides = [1, 1]} : vector<8x1xf32> to vector<1x1xf32>
    %449 = vector.broadcast %448 : vector<1x1xf32> to vector<16x32xf32>
    %450 = arith.mulf %445, %449 : vector<16x32xf32>
    %451 = vector.extract_strided_slice %277 {offsets = [7, 0], sizes = [1, 16], strides = [1, 1]} : vector<8x16xf32> to vector<1x16xf32>
    %cst_79 = arith.constant dense<0.000000e+00> : vector<1x32xf32>
    %452 = tpu.matmul %451, %450, %cst_79 {dimension_numbers = #tpu.dot_dimension_numbers<[1], [0], [0], [1], [0, 0, 1, 1], [], []>} : vector<1x16xf32>, vector<16x32xf32>, vector<1x32xf32> -> vector<1x32xf32>
    %453 = vector.extract_strided_slice %288 {offsets = [7, 0], sizes = [1, 1], strides = [1, 1]} : vector<8x1xf32> to vector<1x1xf32>
    %454 = vector.extract_strided_slice %274 {offsets = [7, 0], sizes = [1, 32], strides = [1, 1]} : vector<8x32xf32> to vector<1x32xf32>
    %455 = arith.subf %454, %452 : vector<1x32xf32>
    %456 = vector.broadcast %453 : vector<1x1xf32> to vector<1x32xf32>
    %457 = arith.mulf %456, %455 : vector<1x32xf32>
    %458 = vector.extract_strided_slice %327 {offsets = [0, 7], sizes = [16, 1], strides = [1, 1]} : vector<16x8xf32> to vector<16x1xf32>
    %459 = vector.broadcast %458 : vector<16x1xf32> to vector<16x32xf32>
    %460 = vector.broadcast %457 : vector<1x32xf32> to vector<16x32xf32>
    %461 = arith.mulf %459, %460 : vector<16x32xf32>
    %462 = arith.addf %450, %461 : vector<16x32xf32>
    %463 = vector.extract_strided_slice %318 {offsets = [7, 0], sizes = [1, 16], strides = [1, 1]} : vector<8x16xf32> to vector<1x16xf32>
    %cst_80 = arith.constant dense<0.000000e+00> : vector<1x32xf32>
    %464 = tpu.matmul %463, %462, %cst_80 {dimension_numbers = #tpu.dot_dimension_numbers<[1], [0], [0], [1], [0, 0, 1, 1], [], []>} : vector<1x16xf32>, vector<16x32xf32>, vector<1x32xf32> -> vector<1x32xf32>
    %465 = tpu.concatenate %345, %362, %379, %396, %413, %430, %447, %464 in 0 : vector<1x32xf32>, vector<1x32xf32>, vector<1x32xf32>, vector<1x32xf32>, vector<1x32xf32>, vector<1x32xf32>, vector<1x32xf32>, vector<1x32xf32> -> vector<8x32xf32>
    %466 = arith.mulf %465, %465 : vector<8x32xf32>
    %cst_81 = arith.constant dense<0.000000e+00> : vector<8xf32>
    %467 = vector.multi_reduction <add>, %466, %cst_81 [1] : vector<8x32xf32> to vector<8xf32>
    %468 = vector.shape_cast %467 : vector<8xf32> to vector<8x1xf32>
    %cst_82 = arith.constant 3.200000e+01 : f32
    %469 = vector.broadcast %cst_82 : f32 to vector<8x1xf32>
    %470 = arith.divf %468, %469 : vector<8x1xf32>
    %cst_83 = arith.constant 9.99999974E-6 : f32
    %471 = vector.broadcast %cst_83 : f32 to vector<8x1xf32>
    %472 = arith.addf %470, %471 : vector<8x1xf32>
    %473 = math.rsqrt %472 : vector<8x1xf32>
    %474 = vector.broadcast %473 : vector<8x1xf32> to vector<8x32xf32>
    %475 = arith.mulf %465, %474 : vector<8x32xf32>
    %476 = vector.broadcast %51 : vector<1x32xf32> to vector<8x32xf32>
    %477 = arith.mulf %475, %476 : vector<8x32xf32>
    %478 = arith.negf %275 : vector<8x32xf32>
    %479 = math.exp %478 : vector<8x32xf32>
    %cst_84 = arith.constant 1.000000e+00 : f32
    %480 = vector.broadcast %cst_84 : f32 to vector<8x32xf32>
    %481 = arith.addf %480, %479 : vector<8x32xf32>
    %482 = arith.divf %480, %481 : vector<8x32xf32>
    %483 = arith.mulf %477, %482 : vector<8x32xf32>
    %484 = tpu.concatenate %267, %483 in 1 : vector<8x32xf32>, vector<8x32xf32> -> vector<8x64xf32>
    %485 = arith.truncf %484 : vector<8x64xf32> to vector<8x64xbf16>
    %c0_85 = arith.constant 0 : index
    %c0_86 = arith.constant 0 : index
    %c0_87 = arith.constant 0 : index
    %486 = vector.load %arg5[%c0_85, %c0_86, %c0_87] : memref<1x8x64xbf16, #tpu.memory_space<vmem>>, vector<1x8x64xbf16>
    %487 = vector.shape_cast %486 : vector<1x8x64xbf16> to vector<8x64xbf16>
    %488 = vector.shape_cast %485 : vector<8x64xbf16> to vector<1x8x64xbf16>
    tpu.vector_store %arg5[%c0_85, %c0_86, %c0_87], %488 {strides = array<i32>} : memref<1x8x64xbf16, #tpu.memory_space<vmem>>, vector<1x8x64xbf16>,
    return
  }
  func.func @transform_0(%arg0: i32) -> (i32, i32, i32) {
    %c0_i32 = arith.constant 0 : i32
    %c0_i32_0 = arith.constant 0 : i32
    %c0_i32_1 = arith.constant 0 : i32
    return %arg0, %c0_i32, %c0_i32_0 : i32, i32, i32
  }
  func.func @transform_1(%arg0: i32) -> (i32, i32) {
    %c0_i32 = arith.constant 0 : i32
    %c0_i32_0 = arith.constant 0 : i32
    %c0_i32_1 = arith.constant 0 : i32
    return %c0_i32, %c0_i32_0 : i32, i32
  }
  func.func @transform_2(%arg0: i32) -> (i32, i32) {
    %c0_i32 = arith.constant 0 : i32
    %c0_i32_0 = arith.constant 0 : i32
    %c0_i32_1 = arith.constant 0 : i32
    return %c0_i32, %c0_i32_0 : i32, i32
  }
  func.func @transform_3(%arg0: i32) -> (i32, i32) {
    %c0_i32 = arith.constant 0 : i32
    %c0_i32_0 = arith.constant 0 : i32
    %c0_i32_1 = arith.constant 0 : i32
    return %c0_i32, %c0_i32_0 : i32, i32
  }
  func.func @transform_4(%arg0: i32) -> (i32, i32, i32) {
    %c0_i32 = arith.constant 0 : i32
    %c0_i32_0 = arith.constant 0 : i32
    %c0_i32_1 = arith.constant 0 : i32
    return %arg0, %c0_i32, %c0_i32_0 : i32, i32, i32
  }
}

module attributes {stable_mosaic.version = 11 : i64} {
  func.func @_matmul_kernel(%arg0: i32, %arg1: i32, %arg2: i32, %arg3: memref<16x32xbf16, #tpu.memory_space<vmem>>, %arg4: memref<32x196xbf16, #tpu.memory_space<vmem>>, %arg5: memref<16x196xbf16, #tpu.memory_space<vmem>>, %arg6: memref<16x196xf32, #tpu.memory_space<vmem>>) attributes {dimension_semantics = [#tpu.dimension_semantics<parallel>, #tpu.dimension_semantics<parallel>, #tpu.dimension_semantics<arbitrary>], iteration_bounds = array<i64: 1, 1, 1>, scalar_prefetch = 0 : i64, scratch_operands = 1 : i64, tpu.core_type = #tpu.core_type<tc>, window_params = [{transform_indices = @transform_0, window_bounds = array<i64: 16, 32>}, {transform_indices = @transform_1, window_bounds = array<i64: 32, 196>}, {transform_indices = @transform_2, window_bounds = array<i64: 16, 196>}]} {
    %c0_i32 = arith.constant 0 : i32
    %0 = arith.cmpi eq, %arg2, %c0_i32 : i32
    %1 = arith.extui %0 : i1 to i32
    %c0_i32_0 = arith.constant 0 : i32
    %2 = arith.cmpi ne, %1, %c0_i32_0 : i32
    scf.if %2 {
      %cst_10 = arith.constant 0.000000e+00 : f32
      %12 = vector.broadcast %cst_10 : f32 to vector<16x196xf32>
      %c0_11 = arith.constant 0 : index
      %c0_12 = arith.constant 0 : index
      %13 = vector.load %arg6[%c0_11, %c0_12] : memref<16x196xf32, #tpu.memory_space<vmem>>, vector<16x196xf32>
      tpu.vector_store %arg6[%c0_11, %c0_12], %12 {strides = array<i32>} : memref<16x196xf32, #tpu.memory_space<vmem>>, vector<16x196xf32>,
    } else {
    }
    %c0 = arith.constant 0 : index
    %c0_1 = arith.constant 0 : index
    %3 = vector.load %arg6[%c0, %c0_1] : memref<16x196xf32, #tpu.memory_space<vmem>>, vector<16x196xf32>
    %c0_2 = arith.constant 0 : index
    %c0_3 = arith.constant 0 : index
    %4 = vector.load %arg3[%c0_2, %c0_3] : memref<16x32xbf16, #tpu.memory_space<vmem>>, vector<16x32xbf16>
    %c0_4 = arith.constant 0 : index
    %c0_5 = arith.constant 0 : index
    %5 = vector.load %arg4[%c0_4, %c0_5] : memref<32x196xbf16, #tpu.memory_space<vmem>>, vector<32x196xbf16>
    %cst = arith.constant dense<0.000000e+00> : vector<16x196xf32>
    %6 = tpu.matmul %4, %5, %cst {dimension_numbers = #tpu.dot_dimension_numbers<[1], [0], [0], [1], [0, 0, 1, 1], [], []>} : vector<16x32xbf16>, vector<32x196xbf16>, vector<16x196xf32> -> vector<16x196xf32>
    %7 = arith.addf %3, %6 : vector<16x196xf32>
    %c0_6 = arith.constant 0 : index
    %c0_7 = arith.constant 0 : index
    %8 = vector.load %arg6[%c0_6, %c0_7] : memref<16x196xf32, #tpu.memory_space<vmem>>, vector<16x196xf32>
    tpu.vector_store %arg6[%c0_6, %c0_7], %7 {strides = array<i32>} : memref<16x196xf32, #tpu.memory_space<vmem>>, vector<16x196xf32>,
    %c0_i32_8 = arith.constant 0 : i32
    %9 = arith.cmpi eq, %arg2, %c0_i32_8 : i32
    %10 = arith.extui %9 : i1 to i32
    %c0_i32_9 = arith.constant 0 : i32
    %11 = arith.cmpi ne, %10, %c0_i32_9 : i32
    scf.if %11 {
      %c0_10 = arith.constant 0 : index
      %c0_11 = arith.constant 0 : index
      %12 = vector.load %arg6[%c0_10, %c0_11] : memref<16x196xf32, #tpu.memory_space<vmem>>, vector<16x196xf32>
      %13 = arith.truncf %12 : vector<16x196xf32> to vector<16x196xbf16>
      %c0_12 = arith.constant 0 : index
      %c0_13 = arith.constant 0 : index
      %14 = vector.load %arg5[%c0_12, %c0_13] : memref<16x196xbf16, #tpu.memory_space<vmem>>, vector<16x196xbf16>
      tpu.vector_store %arg5[%c0_12, %c0_13], %13 {strides = array<i32>} : memref<16x196xbf16, #tpu.memory_space<vmem>>, vector<16x196xbf16>,
    } else {
    }
    return
  }
  func.func @transform_0(%arg0: i32, %arg1: i32, %arg2: i32) -> (i32, i32) {
    %c0_i32 = arith.constant 0 : i32
    return %arg0, %arg2 : i32, i32
  }
  func.func @transform_1(%arg0: i32, %arg1: i32, %arg2: i32) -> (i32, i32) {
    %c0_i32 = arith.constant 0 : i32
    return %arg2, %arg1 : i32, i32
  }
  func.func @transform_2(%arg0: i32, %arg1: i32, %arg2: i32) -> (i32, i32) {
    %c0_i32 = arith.constant 0 : i32
    return %arg0, %arg1 : i32, i32
  }
}

module attributes {stable_mosaic.version = 11 : i64} {
  func.func @_matmul_kernel(%arg0: i32, %arg1: i32, %arg2: i32, %arg3: memref<16x64xbf16, #tpu.memory_space<vmem>>, %arg4: memref<64x32xbf16, #tpu.memory_space<vmem>>, %arg5: memref<16x32xf32, #tpu.memory_space<vmem>>, %arg6: memref<16x32xf32, #tpu.memory_space<vmem>>) attributes {dimension_semantics = [#tpu.dimension_semantics<parallel>, #tpu.dimension_semantics<parallel>, #tpu.dimension_semantics<arbitrary>], iteration_bounds = array<i64: 1, 1, 1>, scalar_prefetch = 0 : i64, scratch_operands = 1 : i64, tpu.core_type = #tpu.core_type<tc>, window_params = [{transform_indices = @transform_0, window_bounds = array<i64: 16, 64>}, {transform_indices = @transform_1, window_bounds = array<i64: 64, 32>}, {transform_indices = @transform_2, window_bounds = array<i64: 16, 32>}]} {
    %c0_i32 = arith.constant 0 : i32
    %0 = arith.cmpi eq, %arg2, %c0_i32 : i32
    %1 = arith.extui %0 : i1 to i32
    %c0_i32_0 = arith.constant 0 : i32
    %2 = arith.cmpi ne, %1, %c0_i32_0 : i32
    scf.if %2 {
      %cst_10 = arith.constant 0.000000e+00 : f32
      %12 = vector.broadcast %cst_10 : f32 to vector<16x32xf32>
      %c0_11 = arith.constant 0 : index
      %c0_12 = arith.constant 0 : index
      %13 = vector.load %arg6[%c0_11, %c0_12] : memref<16x32xf32, #tpu.memory_space<vmem>>, vector<16x32xf32>
      tpu.vector_store %arg6[%c0_11, %c0_12], %12 {strides = array<i32>} : memref<16x32xf32, #tpu.memory_space<vmem>>, vector<16x32xf32>,
    } else {
    }
    %c0 = arith.constant 0 : index
    %c0_1 = arith.constant 0 : index
    %3 = vector.load %arg6[%c0, %c0_1] : memref<16x32xf32, #tpu.memory_space<vmem>>, vector<16x32xf32>
    %c0_2 = arith.constant 0 : index
    %c0_3 = arith.constant 0 : index
    %4 = vector.load %arg3[%c0_2, %c0_3] : memref<16x64xbf16, #tpu.memory_space<vmem>>, vector<16x64xbf16>
    %c0_4 = arith.constant 0 : index
    %c0_5 = arith.constant 0 : index
    %5 = vector.load %arg4[%c0_4, %c0_5] : memref<64x32xbf16, #tpu.memory_space<vmem>>, vector<64x32xbf16>
    %cst = arith.constant dense<0.000000e+00> : vector<16x32xf32>
    %6 = tpu.matmul %4, %5, %cst {dimension_numbers = #tpu.dot_dimension_numbers<[1], [0], [0], [1], [0, 0, 1, 1], [], []>} : vector<16x64xbf16>, vector<64x32xbf16>, vector<16x32xf32> -> vector<16x32xf32>
    %7 = arith.addf %3, %6 : vector<16x32xf32>
    %c0_6 = arith.constant 0 : index
    %c0_7 = arith.constant 0 : index
    %8 = vector.load %arg6[%c0_6, %c0_7] : memref<16x32xf32, #tpu.memory_space<vmem>>, vector<16x32xf32>
    tpu.vector_store %arg6[%c0_6, %c0_7], %7 {strides = array<i32>} : memref<16x32xf32, #tpu.memory_space<vmem>>, vector<16x32xf32>,
    %c0_i32_8 = arith.constant 0 : i32
    %9 = arith.cmpi eq, %arg2, %c0_i32_8 : i32
    %10 = arith.extui %9 : i1 to i32
    %c0_i32_9 = arith.constant 0 : i32
    %11 = arith.cmpi ne, %10, %c0_i32_9 : i32
    scf.if %11 {
      %c0_10 = arith.constant 0 : index
      %c0_11 = arith.constant 0 : index
      %12 = vector.load %arg6[%c0_10, %c0_11] : memref<16x32xf32, #tpu.memory_space<vmem>>, vector<16x32xf32>
      %c0_12 = arith.constant 0 : index
      %c0_13 = arith.constant 0 : index
      %13 = vector.load %arg5[%c0_12, %c0_13] : memref<16x32xf32, #tpu.memory_space<vmem>>, vector<16x32xf32>
      tpu.vector_store %arg5[%c0_12, %c0_13], %12 {strides = array<i32>} : memref<16x32xf32, #tpu.memory_space<vmem>>, vector<16x32xf32>,
    } else {
    }
    return
  }
  func.func @transform_0(%arg0: i32, %arg1: i32, %arg2: i32) -> (i32, i32) {
    %c0_i32 = arith.constant 0 : i32
    return %arg0, %arg2 : i32, i32
  }
  func.func @transform_1(%arg0: i32, %arg1: i32, %arg2: i32) -> (i32, i32) {
    %c0_i32 = arith.constant 0 : i32
    return %arg2, %arg1 : i32, i32
  }
  func.func @transform_2(%arg0: i32, %arg1: i32, %arg2: i32) -> (i32, i32) {
    %c0_i32 = arith.constant 0 : i32
    return %arg0, %arg1 : i32, i32
  }
}

</mosaic_0001>

<bundles_post_ra>
// kernel: comba_forward.3
= control target key start
LH: loop header
LB: loop body
LE: loop exit
PB: predicated region body
PF: predicated region fallthrough
CT: control target
= control target key end

     0   :  { %7 = vsyncpa [#allocation4], 0  ;;  %s199_s9 = smov [#allocation3]   ;;  %s231_s0 = inlined_call_operand.vmem [shape: bf16[16,32], index: 0, kind: input, shape index: {}]   ;;  %s232_s1 = inlined_call_operand.hbm [shape: bf16[32,196], index: 1, kind: input, shape index: {}]   ;;  %s233_s2 = inlined_call_operand.vmem [shape: bf16[16,196], index: 2, kind: output, shape index: {}]  }
   0x1   :  { %s15_s10 = sshll.u32 %s199_s9, 4  ;;  %s16_s10 = int_to_ptr.vmem [resolvable:$true] %s15_s10 }
   0x2   :  { %s185_s11 = scalar_lea.vmem %s16_s10, 512  ;;  %p190_p1 = scmp.lt.s32.totalorder %s16_s10, %s16_s10 }
   0x3   :  { %p186_p0 = scmp.ne.s32.totalorder %s16_s10, %s185_s11  ;;  %p191_p2 = scmp.lt.s32.totalorder %s185_s11, %s185_s11 }
   0x5   :  { %p192_p3 = por %p191_p2, %p190_p1 }
   0x7   :  { %p193_p4 = pnand %p192_p3, %p186_p0 }
   0x9   :  { %196 = shalt.err (!%p193_p4)
}
   0xa   :  { %s200_s12 = smov 128   ;;  %s201_s13 = smov 8  }
   0xb   :  { %21 = dma.hbm_to_vmem [thread:$0]  %s232_s1, 512, %s16_s10, [#allocation4], %s200_s12, %s200_s12, %s201_s13  }
   0xc   :  { %197 = dma.done.wait [#allocation4], 512  }
   0xd   :  { %198 = vsyncadd [#allocation4], 4294966784  ;;  %v202_v0 = vmov 0   ;;  %v170_v1 = vld [vmem:[#allocation3 + $0x14] ss:$8 sps:$4 sm:$0xff]   ;;  %v176_v5 = vld [vmem:[%s231_s0] sm:$0xff]  }
   0xe   :  { %106 = vmatprep.mubr.bf16.mxu0 %v202_v0  ;;  %v172_v2 = vld [vmem:[#allocation3 + $0x10] ss:$8 sps:$4 sm:$0xff]   ;;  %86 = vmatprep.subr.bf16.mxu0 %v170_v1  ;;  %v173_v3 = vld [vmem:[#allocation3 + $0x4] ss:$8 sps:$4 sm:$0xff]   ;;  %v175_v4 = vld [vmem:[#allocation3] ss:$8 sps:$4 sm:$0xff]  }
   0xf   :  { %87 = vmatpush1.bf16.msra.mxu0 %v172_v2  ;;  %vm70_vm0 = vcmask 261120   ;;  %vm31_vm1 = vcmask 556032   ;;  %v203_v6 = vmov 0.0   ;;  %vm145_vm2 = vcmask 1043456  }
  0x10   :  { %88 = vmatprep.subr.bf16.mxu0 %v173_v3  ;;  %32 = vst.msk [vmem:[#allocation2 + $0x8] sm:$0xff] %vm31_vm1, %v203_v6  ;;  %34 = vst.msk [vmem:[#allocation2 + $0x18] sm:$0xff] %vm31_vm1, %v203_v6  ;;  %vm146_vm3 = vcmask 556036  }
  0x11   :  { %vm147_vm4 = vmor %vm146_vm3, %vm145_vm2 }
  0x13   :  { %89 = vmatpush1.bf16.msra.mxu0 %v175_v4 }
  0x16   :  { %160 = vmatmul.mubr.msk.bf16.vlgmr.msra.gmra.mxu0 %vm70_vm0, %v176_v5 }
  0x17   :  { %v36_v8 = vld [vmem:[#allocation2 + $0x8] sm:$0xff]  ;;  %v38_v12 = vld [vmem:[#allocation2 + $0x18] sm:$0xff] }
  0xd6   :  { %v108_v7 = vpop.f32.mrf.mxu0 }
  0xd8   :  { %v110_v9 = vpop.f32.mrf.mxu0 }
  0xd9   :  { %v118_v10 = vadd.f32 %v110_v9, %v36_v8 }
  0xda   :  { %v112_v11 = vpop.f32.mrf.mxu0 }
  0xdb   :  { %123 = vst.msk [vmem:[#allocation2 + $0x8] sm:$0xff] %vm31_vm1, %v118_v10 }
  0xdc   :  { %v114_v13 = vpop.f32.mrf.mxu0 }
  0xdd   :  { %v120_v14 = vadd.f32 %v114_v13, %v38_v12 }
  0xdf   :  { %125 = vst.msk [vmem:[#allocation2 + $0x18] sm:$0xff] %vm31_vm1, %v120_v14 }
  0xe2   :  { %v130_v15 = vld [vmem:[#allocation2 + $0x8] sm:$0xff] }
  0xe3   :  { %v163_v16 = vpack.c.bf16 %v130_v15, %v108_v7 }
  0xe5   :  { %148 = vst.msk [vmem:[%s233_s2] sm:$0xff] %vm147_vm4, %v163_v16 }
  0xe6   :  { %v132_v17 = vld [vmem:[#allocation2 + $0x18] sm:$0xff] }
  0xe7   :  { %v164_v18 = vpack.c.bf16 %v132_v17, %v112_v11 }
  0xe9   :  { %149 = vst.msk [vmem:[%s233_s2 + $0x8] sm:$0xff] %vm147_vm4, %v164_v18 }
  0xea   :  { %154 = vsyncpa [#allocation4], 1 }

// kernel: comba_forward.5
= control target key start
LH: loop header
LB: loop body
LE: loop exit
PB: predicated region body
PF: predicated region fallthrough
CT: control target
= control target key end

     0   :  { %v189_v1 = vmov 0.0   ;;  %vm190_vm0 = vmmov 0   ;;  %vm17_vm1 = vcmask 261120   ;;  %s233_s0 = inlined_call_operand.vmem [shape: bf16[16,64], index: 0, kind: input, shape index: {}]   ;;  %s234_s1 = inlined_call_operand.vmem [shape: bf16[64,32], index: 1, kind: input, shape index: {}]   ;;  %s235_s2 = inlined_call_operand.hbm [shape: f32[16,32], index: 2, kind: output, shape index: {}]  }
   0x1   :  { %v162_v0 = vld [vmem:[%s234_s1 + $0x18] sm:$0xff]   ;;  %145 = vmatprep.subr.bf16.mxu0 %v189_v1  ;;  %v163_v2 = vld [vmem:[%s234_s1 + $0x10] sm:$0xff]   ;;  %153 = vmatprep.mubr.msk.bf16.mxu0 %vm190_vm0, %v189_v1  ;;  %18 = vst.msk [vmem:[#allocation2] sm:$0xff] %vm17_vm1, %v189_v1  ;;  %19 = vst.msk [vmem:[#allocation2 + $0x8] sm:$0xff] %vm17_vm1, %v189_v1 }
   0x2   :  { %146 = vmatpush3.bf16.msra.mxu0 %v162_v0 }
   0x3   :  { %147 = vmatprep.subr.bf16.mxu0 %v189_v1 }
   0x4   :  { %7 = vsyncpa [#allocation4], 0  ;;  %v164_v3 = vld [vmem:[%s234_s1 + $0x8] sm:$0xff]   ;;  %v165_v4 = vld [vmem:[%s234_s1] sm:$0xff]   ;;  %vm61_vm2 = vcmask 523264   ;;  %s191_s1 = smov [#allocation3]  }
   0x5   :  { %v166_v5 = vld [vmem:[%s233_s0] sm:$0xff]   ;;  %s123_s19 = sshll.u32 %s191_s1, 4  ;;  %s124_s19 = int_to_ptr.vmem [resolvable:$true] %s123_s19 }
   0x6   :  { %148 = vmatpush3.bf16.msra.mxu0 %v163_v2  ;;  %s167_s0 = scalar_lea.vmem %s124_s19, 256  ;;  %p172_p1 = scmp.lt.s32.totalorder %s124_s19, %s124_s19 }
   0x7   :  { %149 = vmatprep.subr.bf16.mxu0 %v189_v1  ;;  %p168_p0 = scmp.ne.s32.totalorder %s124_s19, %s167_s0  ;;  %p173_p2 = scmp.lt.s32.totalorder %s167_s0, %s167_s0 }
   0x8   :  { %v20_v6 = vld [vmem:[#allocation2] sm:$0xff]  ;;  %v21_v10 = vld [vmem:[#allocation2 + $0x8] sm:$0xff] }
   0x9   :  { %p174_p3 = por %p173_p2, %p172_p1 }
   0xa   :  { %150 = vmatpush3.bf16.msra.mxu0 %v164_v3 }
   0xb   :  { %151 = vmatprep.subr.bf16.mxu0 %v189_v1  ;;  %p175_p4 = pnand %p174_p3, %p168_p0 }
   0xe   :  { %152 = vmatpush3.bf16.msra.mxu0 %v165_v4 }
  0x11   :  { %154 = vmatmul.mubr.msk.bf16.vlgmr.msra.gmra.mxu0 %vm61_vm2, %v166_v5 }
  0xd1   :  { %v99_v7 = vpop.f32.mrf.mxu0 }
  0xd2   :  { %v106_v8 = vadd.f32 %v99_v7, %v20_v6 }
  0xd3   :  { %v155_v9 = vpop.f32.mrf.mxu0 }
  0xd4   :  { %109 = vst.msk [vmem:[#allocation2] sm:$0xff] %vm17_vm1, %v106_v8 }
  0xd5   :  { %v102_v11 = vpop.f32.mrf.mxu0 }
  0xd6   :  { %v107_v12 = vadd.f32 %v102_v11, %v21_v10 }
  0xd7   :  { %v156_v13 = vpop.f32.mrf.mxu0 }
  0xd8   :  { %110 = vst.msk [vmem:[#allocation2 + $0x8] sm:$0xff] %vm17_vm1, %v107_v12 }
  0xdb   :  { %v114_v14 = vld [vmem:[#allocation2] sm:$0xff] }
  0xdc   :  { %116 = vst.msk [vmem:[#allocation3] sm:$0xff] %vm17_vm1, %v114_v14 }
  0xdf   :  { %v115_v15 = vld [vmem:[#allocation2 + $0x8] sm:$0xff] }
  0xe0   :  { %117 = vst.msk [vmem:[#allocation3 + $0x8] sm:$0xff] %vm17_vm1, %v115_v15 }
  0xe1   :  { %178 = shalt.err (!%p175_p4)
}
  0xe2   :  { %s192_s20 = smov 128   ;;  %s193_s21 = smov 8  }
  0xe3   :  { %129 = dma.vmem_to_hbm [thread:$0]  %s124_s19, 256, %s235_s2, [#allocation4], %s192_s20, %s192_s20, %s193_s21  }
  0xe4   :  { %187 = dma.done.wait [#allocation4], 256  }
  0xe5   :  { %188 = vsyncadd [#allocation4], 4294967040 }
  0xe6   :  { %133 = vsyncpa [#allocation4], 1 }

// kernel: comba_forward.4
= control target key start
LH: loop header
LB: loop body
LE: loop exit
PB: predicated region body
PF: predicated region fallthrough
CT: control target
= control target key end

     0   :  { %9 = vsyncpa [#allocation3], 0  ;;  %s4365_s15 = smov 0   ;;  %s5107_s0 = inlined_call_operand.vmem [shape: bf16[2,8,196], index: 0, kind: input, shape index: {}]   ;;  %s5108_s1 = inlined_call_operand.vmem [shape: f32[4,128], index: 1, kind: input, shape index: {}]   ;;  %s5109_s2 = inlined_call_operand.vmem [shape: f32[1,32], index: 2, kind: input, shape index: {}]   ;;  %s5110_s3 = inlined_call_operand.vmem [shape: f32[4,2], index: 3, kind: input, shape index: {}]   ;;  %s5111_s4 = inlined_call_operand.vmem [shape: bf16[2,8,64], index: 4, kind: output, shape index: {}]  }
   0x1 LB: > { %s3781_s16 = sadd.s32 4294967295, %s4319_s15   ;;  %p3783_p0 = scmp.ge.s32.totalorder %s4319_s15, 1  ;;  %s4319_s15 = sphi %s4365_s15, %s15_s15  }
   0x2   : > { %p135_p1 = scmp.lt.s32.totalorder %s4319_s15, 3  ;;  %s154_s19 = sshll.u32 %s5110_s3, 4  ;;  %s155_s19 = int_to_ptr.vmem [resolvable:$true] %s154_s19 }
   0x3   : > { %p4196_p3 = scmp.eq.s32.totalorder %s3781_s16, 0  ;;  %s4294_s21 = scalar_lea.vmem %s155_s19, 64 }
   0x4   : > { %p4376_p2 = pnand %p3783_p0, %p135_p1  ;;  %p4295_p6 = scmp.ne.s32.totalorder %s155_s19, %s4294_s21 }
   0x5   : > { %p4302_p10 = scmp.lt.s32.totalorder %s155_s19, %s155_s19  ;;  %p4303_p11 = scmp.lt.s32.totalorder %s4294_s21, %s4294_s21 }
   0x6   : > { %p4192_p4 = pneg %p4376_p2 }
   0x7   : > { %p4304_p12 = por %p4303_p11, %p4302_p10 }
   0x8   : > { %p4193_p5 = pnand %p4196_p3, %p4192_p4 }
   0xa   : > { %p4296_p7 = pneg %p4193_p5 }
   0xc   : > { %p4297_p8 = pnand %p4296_p7, %p4295_p6 }
   0xe   : > { %p4298_p9 = pneg %p4297_p8 }
  0x10   : > { %p4305_p13 = pnand %p4304_p12, %p4298_p9 }
  0x12   : > { %4308 = shalt.err (!%p4305_p13)
}
  0x13   : > { %s4321_s22 = smov [#allocation2]   ;;  %175 = sbr.rel (%p4376_p2) target bundleno = 7718 (0x1e26), region = 36 }
  0x14   : > { %4195 = dma.vmem_to_smem (!%p4193_p5), %s155_s19, 64, %s4321_s22, [#allocation3]  }
  0x18   : > { %4314 = dma.done.wait (%p4196_p3), [#allocation3], 64  }
  0x19   : > { %4316 = vsyncadd (%p4196_p3), [#allocation3], 4294967232 }
  0x1a   : > { %181 = sfence }
  0x1b   : > { %p201_p0 = scmp.lt.s32.totalorder %s3781_s16, 1  ;;  %v214_v0 = vlaneseq  ;;  %s3794_s23 = sld [smem:[#allocation2 + $0x180]]  ;;  %v213_v2 = vld [vmem:[%s5108_s1] sm:$0xf]  ;;  %v4324_v56 = vmov 0.0   ;;  %vm4325_vm5 = vmmov 0  }
  0x1c   : > { %s3793_s30 = sld [smem:[#allocation2 + $0x100]]  ;;  %s4322_s6 = smov 96   ;;  %3932 = vmatprep.subr.mxu0 %v4324_v56  ;;  %3939 = vmatprep.subr.mxu1 %v4324_v56  ;;  %vm307_vm6 = vcmask 130048  }
  0x1d   : > { %s5114_s16 = smov (!%p201_p0, %s3781_s16), 1  ;;  %v4389_v1 = vshrl.u32 %v214_v0, 7  ;;  %s262_s5 = sld [smem:[#allocation2]]  ;;  %3936 = vmatprep.mubr.msk.f32.mxu0 %vm4325_vm5, %v4324_v56  ;;  %3943 = vmatprep.mubr.msk.f32.mxu1 %vm4325_vm5, %v4324_v56 }
  0x1e   : > { %s3835_s24 = sshll.u32 %s5114_s16, 3  ;;  %s4323_s7 = smov 64  }
  0x1f   : > { %v4396_v3 = vsub.s32 3, %v4389_v1  ;;  %s205_s29 = scalar_lea.vmem %s5107_s0, %s3835_s24  ;;  %v4402_v4 = vsub.s32 0, %v4389_v1  ;;  %v4405_v5 = vsub.s32 1, %v4389_v1  ;;  %v4411_v9 = vsub.s32 2, %v4389_v1  ;;  %s3816_s17 = sld [smem:[#allocation2 + $0x181]] }
  0x20   : > { %v210_v6 = vld [vmem:[%s205_s29] sm:$0xff]  ;;  %vm222_vm0 = vcmp.ge.s32.totalorder %v4389_v1, 3  ;;  %vm233_vm1 = vcmp.ge.s32.totalorder %v4389_v1, 2  ;;  %vm244_vm2 = vcmp.ge.s32.totalorder %v4389_v1, 1  ;;  %s3815_s18 = sld [smem:[#allocation2 + $0x101]]  ;;  %s4334_s19 = smov 63  }
  0x21   : > { %v4407_v7 = vunpack.c.h.bf16 %v210_v6  ;;  %v219_v8 = vrot.slane %v213_v2, %v4396_v3  ;;  %v282_v10 = vstv %s3794_s23  ;;  %v211_v11 = vunpack.c.l.bf16 %v210_v6  ;;  %s4335_s20 = smov 80   ;;  %s3813_s22 = sld [smem:[#allocation2 + $0x1]] }
  0x22   : > { %v229_v12 = vrot.slane %v213_v2, %v4402_v4  ;;  %v240_v13 = vrot.slane %v213_v2, %v4405_v5  ;;  %v251_v18 = vrot.slane %v213_v2, %v4411_v9  ;;  %v302_v46 = vstv %s3793_s30  ;;  %s4337_s25 = smov 32  }
  0x23   : > { %v283_v14 = vadd.f32 %v282_v10, %v4407_v7  ;;  %v221_v15 = vrot.slane %v211_v11, 5  ;;  %v232_v16 = vrot.slane %v211_v11, 6  ;;  %v243_v17 = vrot.slane %v211_v11, 7 }
  0x24   : > { %v220_v20 = vmul.f32 %v219_v8, %v211_v11  ;;  %v266_v49 = vstv %s262_s5 }
  0x25   : > { %v287_v19 = vand.u32 2147483647, %v283_v14  ;;  %v225_v21 = vsel %vm222_vm0, %v221_v15, 0.0  ;;  %v236_v22 = vsel %vm233_vm1, %v232_v16, 0.0  ;;  %v247_v23 = vsel %vm244_vm2, %v243_v17, 0.0 }
  0x26   : > { %v230_v25 = vmul.f32 %v229_v12, %v225_v21  ;;  %v241_v26 = vmul.f32 %v240_v13, %v236_v22  ;;  %v252_v29 = vmul.f32 %v251_v18, %v247_v23  ;;  %v284_v42 = vmax.f32 %v283_v14, 0.0 }
  0x27   : > { %v288_v24 = vsub.f32 0.0, %v287_v19  ;;  %vm285_vm4 = vcmp.ne.f32.partialorder %v283_v14, %v283_v14  ;;  %v3795_v12 = vmul.f32 -1.442695, %v4407_v7  ;;  %v4326_v13 = vmov 66  }
  0x28   : > { %v231_v28 = vadd.f32 %v230_v25, %v220_v20  ;;  %4225 = vset.pattern.permute.xlu1 %v4326_v13  ;;  %v4327_v23 = vmov 0   ;;  %vm1954_vm1 = vcmask 1040384   ;;  %vm1956_vm2 = vcmask 1041408  }
  0x29   : > { %v289_v27 = vmul.f32 1.442695, %v288_v24 }
  0x2a   : > { %v242_v30 = vadd.f32 %v241_v26, %v231_v28  ;;  %v4328_v28 = vmov 1  }
  0x2b   : > { %4254 = vpow2.f32 %v289_v27 }
  0x2c   : > { %v253_v31 = vadd.f32 %v252_v29, %v242_v30 }
  0x2e   : > { %v3791_v32 = vmul.f32 -1.442695, %v253_v31 }
  0x30   : > { %4256 = vpow2.f32 %v3791_v32 }
  0x38   : > { %v4255_v33 = vpop.eup %4254 }
  0x39   : > { %v291_v34 = vadd.f32 1.0, %v4255_v33  ;;  %v294_v36 = vmul.f32 -0.5, %v4255_v33  ;;  %v297_v39 = vand.u32 2147483647, %v4255_v33 }
  0x3b   : > { %4258 = vlog2.f32 %v291_v34  ;;  %v295_v38 = vadd.f32 1.0, %v294_v36  ;;  %vm298_vm3 = vcmp.lt.f32.partialorder %v297_v39, 0.0004427343 }
  0x3d   : > { %v4257_v35 = vpop.eup %4256  ;;  %v296_v40 = vmul.f32 %v4255_v33, %v295_v38 }
  0x3e   : > { %v257_v37 = vadd.f32 1.0, %v4257_v35 }
  0x40   : > { %4260 = vrcp.f32 %v257_v37 }
  0x48   : > { %v4259_v41 = vpop.eup %4258 }
  0x49   : > { %v293_v43 = vmul.f32 0.6931472, %v4259_v41 }
  0x4b   : > { %v299_v44 = vsel %vm298_vm3, %v296_v40, %v293_v43  ;;  %vm1958_vm3 = vcmask 1042432  }
  0x4c   : > { %v300_v45 = vadd.f32 %v299_v44, %v284_v42 }
  0x4d   : > { %v4261_v47 = vpop.eup %4260 }
  0x4e   : > { %v301_v48 = vsel %vm285_vm4, %v283_v14, %v300_v45  ;;  %v4420_v51 = vmul.f32 %v4261_v47, %v253_v31  ;;  %vm1960_vm4 = vcmask 1043456  }
  0x4f   : > { %v303_v50 = vmul.f32 %v302_v46, %v301_v48 }
  0x50   : > { %v4423_v53 = vmul.f32 %v266_v49, %v4420_v51  ;;  %v4433_v55 = vmul.f32 %v4420_v51, %v4420_v51 }
  0x51   : > { %v304_v52 = vmul.f32 1.442695, %v303_v50 }
  0x52   : > { %384 = vrot.lane.b32.xlu1 %v4423_v53, %s4322_s6  ;;  %v576_v43 = vrot.slane %v4423_v53, 1 }
  0x53   : > { %4262 = vpow2.f32 %v304_v52 }
  0x60   : > { %v4427_v54 = vpop.eup %4262 }
  0x61   : > { %377 = vrot.lane.b32.xlu0 %v4427_v54, %s4323_s7  ;;  %v568_v16 = vrot.slane %v4427_v54, 1  ;;  %v763_v44 = vrot.slane %v4427_v54, 2 }
  0x65   : > { %324 = vrot.lane.b32.xlu0 %v4433_v55, %s4322_s6 }
  0xc4   : > { %v385_v62 = vpop.permute.xlu1 %384 }
  0xd3   : > { %v378_v57 = vpop.permute.xlu0 %377 }
  0xd4   : > { %4156 = vpush %v378_v57  ;;  %v4329_v57 = vmov 2  }
  0xd7   : > { %v325_v58 = vpop.permute.xlu0 %324 }
  0xd8   : > { %v327_v59 = vsel %vm307_vm6, %v325_v58, 0.0 }
  0xd9   : > { %328 = vadd.xlane.f32.xlu1 %v327_v59 }
 0x105   : > { %s4157_s8 = spop %4156 }
 0x106   : > { %v380_v60 = vstv %s4157_s8  ;;  %s3814_s8 = sld [smem:[#allocation2 + $0x81]] }
 0x107   : > { %v382_v61 = vmul.f32 0.0, %v380_v60 }
 0x109   : > { %3933 = vmatpush3.msra.mxu0 %v382_v61 }
 0x10a   : > { %3934 = vmatprep.subr.mxu0 %v4324_v56 }
 0x10b   : > { %3935 = vmatpush3.msra.mxu0 %v382_v61 }
 0x10c   : > { %3937 = vmatmul.mubr.msk.f32.vlgmr.msra.gmra.mxu0 %vm307_vm6, %v385_v62  ;;  %3946 = vmatprep.subr.mxu0 %v4324_v56 }
 0x10d   : > { %3950 = vmatprep.mubr.msk.f32.mxu0 %vm4325_vm5, %v4324_v56 }
 0x162   : > { %v329_v63 = vpop.xlane.xlu1 %328 }
 0x163   : > { %4264 = vrsqrt.f32 %v329_v63  ;;  %vm332_vm7 = vcmp.eq.f32.partialorder %v329_v63, inf  ;;  %v335_v6 = vand.u32 2147483648, %v329_v63  ;;  %vm334_vm8 = vcmp.eq.f32.partialorder %v329_v63, 0.0 }
 0x170   : > { %v4265_v0 = vpop.eup %4264 }
 0x171   : > { %v331_v2 = vmul.f32 %v4265_v0, %v329_v63 }
 0x173   : > { %v333_v8 = vsel %vm332_vm7, %v329_v63, %v331_v2  ;;  %vm1966_vm7 = vcmask 1046528  }
 0x174   : > { %v336_v10 = vsel %vm334_vm8, %v335_v6, %v333_v8  ;;  %vm1969_vm8 = vcmask 261120  }
 0x175   : > { %v337_v11 = vadd.f32 1e-06, %v336_v10  ;;  %v771_v10 = vrot.slane %v4423_v53, 2 }
 0x177   : > { %4266 = vrcp.f32 %v337_v11 }
 0x178   : > { %4268 = vpow2.f32 %v3795_v12 }
 0x184   : > { %v4267_v14 = vpop.eup %4266 }
 0x185   : > { %v339_v15 = vmul.f32 %v4267_v14, %v4420_v51  ;;  %v4269_v17 = vpop.eup %4268  ;;  %v958_v14 = vrot.slane %v4427_v54, 3 }
 0x186   : > { %v278_v18 = vadd.f32 1.0, %v4269_v17 }
 0x187   : > { %341 = vrot.lane.b32.xlu0 %v339_v15, %s4322_s6 }
 0x188   : > { %4270 = vrcp.f32 %v278_v18 }
 0x18b   : > { %569 = vrot.lane.b32.xlu0 %v568_v16, %s4323_s7 }
 0x195   : > { %v4454_v19 = vpop.eup %4270 }
 0x196   : > { %v4457_v20 = vmul.f32 2.0, %v4454_v19 }
 0x198   : > { %465 = vperm.xlu1 %4225, %v4457_v20  }
 0x19c   : > { %4226 = vset.pattern.permute.xlu1 %v4327_v23 }
 0x1cc   : > { %v454_v21 = vpop.f32.mrf.mxu0 }
 0x1ce   : > { %v3938_v22 = vpop.f32.mrf.mxu0 }
 0x1f9   : > { %v342_v24 = vpop.permute.xlu0 %341 }
 0x1fa   : > { %344 = vxpose.xlu0.b32.start.end [1/1] (short) (narrow) %v342_v24, 16 }
 0x1fd   : > { %v570_v25 = vpop.permute.xlu0 %569 }
 0x1fe   : > { %4158 = vpush %v570_v25  ;;  %v966_v25 = vrot.slane %v4423_v53, 3 }
 0x213   : > { %v4470_v31 = vpop.permute.xlu1 %465 }
 0x223   : > { %4229 = vset.pattern.permute.xlu0 %v4329_v57 }
 0x227   : > { %459 = vrot.lane.b32.xlu0 %v454_v21, %s4323_s7 }
 0x22f   : > { %s4159_s9 = spop %4158 }
 0x230   : > { %v572_v39 = vstv %s4159_s9  ;;  %s3792_s9 = sld [smem:[#allocation2 + $0x80]] }
 0x276   : > { %v4462_v26 = vpop.trf.xlu0 }
 0x27a   : > { %v4464_v27 = vpop.trf.xlu0 }
 0x27b   : > { %476 = vperm.xlu1 %4226, %v4464_v27  }
 0x27f   : > { %471 = vperm.xlu1 %4226, %v4462_v26  }
 0x283   : > { %4227 = vset.pattern.permute.xlu1 %v4328_v28 }
 0x299   : > { %v460_v29 = vpop.permute.xlu0 %459 }
 0x29a   : > { %v462_v30 = vsub.f32 %v4420_v51, %v460_v29  ;;  %v4330_v29 = vmov 3  }
 0x29c   : > { %v468_v32 = vmul.f32 %v4470_v31, %v462_v30 }
 0x29e   : > { %v482_v34 = vrot.slane %v468_v32, %v4402_v4 }
 0x2f6   : > { %v477_v33 = vpop.permute.xlu1 %476 }
 0x2f7   : > { %v484_v36 = vmul.f32 %v482_v34, %v477_v33 }
 0x2f9   : > { %v4476_v40 = vadd.f32 %v484_v36, %v382_v61 }
 0x2fa   : > { %v472_v35 = vpop.permute.xlu1 %471 }
 0x2fb   : > { %v483_v37 = vmul.f32 %v482_v34, %v472_v35  ;;  %v575_v42 = vmul.f32 %v572_v39, %v4476_v40 }
 0x2fd   : > { %v4474_v38 = vadd.f32 %v483_v37, %v382_v61 }
 0x2ff   : > { %v574_v41 = vmul.f32 %v572_v39, %v4474_v38 }
 0x301   : > { %581 = vrot.lane.b32.xlu1 %v574_v41, %s4323_s7 }
 0x305   : > { %583 = vrot.lane.b32.xlu1 %v575_v42, %s4323_s7 }
 0x309   : > { %577 = vrot.lane.b32.xlu1 %v576_v43, %s4322_s6 }
 0x30d   : > { %764 = vrot.lane.b32.xlu1 %v763_v44, %s4323_s7 }
 0x311   : > { %671 = vperm.xlu1 %4227, %v4464_v27  }
 0x373   : > { %v582_v45 = vpop.permute.xlu1 %581 }
 0x377   : > { %v584_v46 = vpop.permute.xlu1 %583 }
 0x378   : > { %3947 = vmatpush3.msra.mxu0 %v584_v46  ;;  %v1153_v46 = vrot.slane %v4427_v54, 4 }
 0x379   : > { %3948 = vmatprep.subr.mxu0 %v4324_v56 }
 0x37a   : > { %3949 = vmatpush3.msra.mxu0 %v582_v45 }
 0x37b   : > { %v578_v47 = vpop.permute.xlu1 %577  ;;  %3960 = vmatprep.subr.mxu0 %v4324_v56 }
 0x37c   : > { %3951 = vmatmul.mubr.msk.f32.vlgmr.msra.gmra.mxu0 %vm307_vm6, %v578_v47 }
 0x37d   : > { %3964 = vmatprep.mubr.msk.f32.mxu0 %vm4325_vm5, %v4324_v56 }
 0x37f   : > { %v765_v48 = vpop.permute.xlu1 %764 }
 0x380   : > { %4160 = vpush %v765_v48 }
 0x38c   : > { %v672_v58 = vpop.permute.xlu1 %671 }
 0x3b1   : > { %s4161_s10 = spop %4160 }
 0x3b2   : > { %v767_v0 = vstv %s4161_s10  ;;  %s4339_s10 = smov 112  }
 0x43c   : > { %v655_v49 = vpop.f32.mrf.mxu0 }
 0x43d   : > { %v660_v50 = vrot.slane %v655_v49, 7 }
 0x43e   : > { %v3952_v52 = vpop.f32.mrf.mxu0 }
 0x43f   : > { %661 = vrot.lane.b32.xlu1 %v660_v50, %s4323_s7 }
 0x443   : > { %667 = vperm.xlu1 %4227, %v4462_v26  }
 0x447   : > { %4228 = vset.pattern.permute.xlu1 %v4329_v57 }
 0x4b1   : > { %v662_v59 = vpop.permute.xlu1 %661 }
 0x4b2   : > { %v664_v60 = vsub.f32 %v4420_v51, %v662_v59 }
 0x4b4   : > { %v665_v61 = vmul.f32 %v664_v60, %v4470_v31  ;;  %v1161_v60 = vrot.slane %v4423_v53, 4 }
 0x4b6   : > { %v677_v62 = vrot.slane %v665_v61, %v4405_v5  ;;  %v4331_v61 = vmov 4  }
 0x4b8   : > { %v679_v63 = vmul.f32 %v677_v62, %v672_v58 }
 0x4ba   : > { %v4499_v2 = vadd.f32 %v679_v63, %v575_v42 }
 0x4bc   : > { %v770_v6 = vmul.f32 %v767_v0, %v4499_v2 }
 0x4be   : > { %778 = vrot.lane.b32.xlu0 %v770_v6, %s4323_s7  ;;  %v668_v8 = vpop.permute.xlu1 %667 }
 0x4bf   : > { %v678_v11 = vmul.f32 %v677_v62, %v668_v8 }
 0x4c1   : > { %v4504_v12 = vadd.f32 %v678_v11, %v574_v41 }
 0x4c2   : > { %772 = vrot.lane.b32.xlu0 %v771_v10, %s4322_s6 }
 0x4c3   : > { %v769_v13 = vmul.f32 %v767_v0, %v4504_v12 }
 0x4c5   : > { %776 = vrot.lane.b32.xlu1 %v769_v13, %s4323_s7 }
 0x4c9   : > { %959 = vrot.lane.b32.xlu1 %v958_v14, %s4323_s7 }
 0x4cd   : > { %866 = vperm.xlu1 %4228, %v4464_v27  }
 0x4d1   : > { %4230 = vset.pattern.permute.xlu1 %v4330_v29 }
 0x530   : > { %v779_v15 = vpop.permute.xlu0 %778 }
 0x531   : > { %3961 = vmatpush3.msra.mxu0 %v779_v15 }
 0x532   : > { %3962 = vmatprep.subr.mxu0 %v4324_v56 }
 0x534   : > { %v773_v16 = vpop.permute.xlu0 %772 }
 0x537   : > { %v777_v17 = vpop.permute.xlu1 %776 }
 0x538   : > { %3963 = vmatpush3.msra.mxu0 %v777_v17 }
 0x539   : > { %3965 = vmatmul.mubr.msk.f32.vlgmr.msra.gmra.mxu0 %vm307_vm6, %v773_v16  ;;  %3974 = vmatprep.subr.mxu0 %v4324_v56 }
 0x53a   : > { %3978 = vmatprep.mubr.msk.f32.mxu0 %vm4325_vm5, %v4324_v56 }
 0x53b   : > { %v960_v18 = vpop.permute.xlu1 %959 }
 0x53c   : > { %4162 = vpush %v960_v18 }
 0x548   : > { %v867_v35 = vpop.permute.xlu1 %866 }
 0x56d   : > { %s4163_s11 = spop %4162 }
 0x56e   : > { %v962_v37 = vstv %s4163_s11  ;;  %s3790_s11 = sshll.u32 %s5114_s16, 2 }
 0x5f9   : > { %v850_v21 = vpop.f32.mrf.mxu0 }
 0x5fa   : > { %v855_v22 = vrot.slane %v850_v21, 6  ;;  %v1348_v21 = vrot.slane %v4427_v54, 5 }
 0x5fb   : > { %v3966_v24 = vpop.f32.mrf.mxu0 }
 0x5fc   : > { %856 = vrot.lane.b32.xlu0 %v855_v22, %s4323_s7 }
 0x600   : > { %862 = vperm.xlu0 %4229, %v4462_v26  }
 0x604   : > { %967 = vrot.lane.b32.xlu0 %v966_v25, %s4322_s6 }
 0x605   : > { %4231 = vset.pattern.permute.xlu0 %v4330_v29 }
 0x66e   : > { %v857_v30 = vpop.permute.xlu0 %856 }
 0x66f   : > { %v859_v32 = vsub.f32 %v4420_v51, %v857_v30 }
 0x671   : > { %v860_v33 = vmul.f32 %v859_v32, %v4470_v31 }
 0x673   : > { %v872_v34 = vrot.slane %v860_v33, %v4411_v9 }
 0x675   : > { %v874_v36 = vmul.f32 %v872_v34, %v867_v35  ;;  %v1356_v35 = vrot.slane %v4423_v53, 5 }
 0x677   : > { %v4526_v39 = vadd.f32 %v874_v36, %v770_v6  ;;  %v4332_v36 = vmov 5  }
 0x679   : > { %v965_v41 = vmul.f32 %v962_v37, %v4526_v39 }
 0x67b   : > { %v863_v42 = vpop.permute.xlu0 %862  ;;  %973 = vrot.lane.b32.xlu1 %v965_v41, %s4323_s7 }
 0x67c   : > { %v873_v43 = vmul.f32 %v872_v34, %v863_v42 }
 0x67e   : > { %v4530_v44 = vadd.f32 %v873_v43, %v769_v13 }
 0x67f   : > { %v968_v48 = vpop.permute.xlu0 %967 }
 0x680   : > { %v964_v45 = vmul.f32 %v962_v37, %v4530_v44 }
 0x682   : > { %971 = vrot.lane.b32.xlu1 %v964_v45, %s4323_s7 }
 0x686   : > { %1154 = vrot.lane.b32.xlu1 %v1153_v46, %s4323_s7 }
 0x68a   : > { %1061 = vperm.xlu1 %4230, %v4464_v27  }
 0x68e   : > { %4232 = vset.pattern.permute.xlu1 %v4331_v61 }
 0x6ed   : > { %v974_v47 = vpop.permute.xlu1 %973 }
 0x6ee   : > { %3975 = vmatpush3.msra.mxu0 %v974_v47 }
 0x6ef   : > { %3976 = vmatprep.subr.mxu0 %v4324_v56 }
 0x6f4   : > { %v972_v49 = vpop.permute.xlu1 %971 }
 0x6f5   : > { %3977 = vmatpush3.msra.mxu0 %v972_v49 }
 0x6f6   : > { %3979 = vmatmul.mubr.msk.f32.vlgmr.msra.gmra.mxu0 %vm307_vm6, %v968_v48  ;;  %3988 = vmatprep.subr.mxu0 %v4324_v56 }
 0x6f7   : > { %3992 = vmatprep.mubr.msk.f32.mxu0 %vm4325_vm5, %v4324_v56 }
 0x6f8   : > { %v1155_v50 = vpop.permute.xlu1 %1154 }
 0x6f9   : > { %4164 = vpush %v1155_v50 }
 0x705   : > { %v1062_v8 = vpop.permute.xlu1 %1061 }
 0x72a   : > { %s4165_s12 = spop %4164 }
 0x72b   : > { %v1157_v11 = vstv %s4165_s12 }
 0x7b6   : > { %v1045_v52 = vpop.f32.mrf.mxu0 }
 0x7b7   : > { %v1050_v58 = vrot.slane %v1045_v52, 5 }
 0x7b8   : > { %v3980_v59 = vpop.f32.mrf.mxu0 }
 0x7b9   : > { %1051 = vrot.lane.b32.xlu0 %v1050_v58, %s4323_s7 }
 0x7bd   : > { %1057 = vperm.xlu0 %4231, %v4462_v26  }
 0x7c1   : > { %1162 = vrot.lane.b32.xlu0 %v1161_v60, %s4322_s6 }
 0x7c2   : > { %4233 = vset.pattern.permute.xlu0 %v4331_v61 }
 0x82b   : > { %v1052_v62 = vpop.permute.xlu0 %1051 }
 0x82c   : > { %v1054_v63 = vsub.f32 %v4420_v51, %v1052_v62  ;;  %v1543_v62 = vrot.slane %v4427_v54, 6 }
 0x82e   : > { %v1055_v0 = vmul.f32 %v1054_v63, %v4470_v31 }
 0x830   : > { %v1067_v6 = vrot.slane %v1055_v0, %v4396_v3 }
 0x832   : > { %v1069_v10 = vmul.f32 %v1067_v6, %v1062_v8 }
 0x834   : > { %v4551_v13 = vadd.f32 %v1069_v10, %v965_v41  ;;  %v1261_v41 = vsub.s32 4, %v4389_v1 }
 0x836   : > { %v1160_v14 = vmul.f32 %v1157_v11, %v4551_v13 }
 0x838   : > { %v1058_v15 = vpop.permute.xlu0 %1057  ;;  %1168 = vrot.lane.b32.xlu1 %v1160_v14, %s4323_s7 }
 0x839   : > { %v1068_v16 = vmul.f32 %v1067_v6, %v1058_v15  ;;  %v1551_v15 = vrot.slane %v4423_v53, 6 }
 0x83b   : > { %v4555_v17 = vadd.f32 %v1068_v16, %v964_v45  ;;  %v4333_v16 = vmov 6  }
 0x83c   : > { %v1163_v24 = vpop.permute.xlu0 %1162 }
 0x83d   : > { %v1159_v18 = vmul.f32 %v1157_v11, %v4555_v17 }
 0x83f   : > { %1166 = vrot.lane.b32.xlu1 %v1159_v18, %s4323_s7 }
 0x843   : > { %1349 = vrot.lane.b32.xlu1 %v1348_v21, %s4323_s7  ;;  %v1456_v21 = vsub.s32 5, %v4389_v1 }
 0x847   : > { %1256 = vperm.xlu1 %4232, %v4464_v27  }
 0x84b   : > { %4234 = vset.pattern.permute.xlu1 %v4332_v36 }
 0x8aa   : > { %v1169_v22 = vpop.permute.xlu1 %1168 }
 0x8ab   : > { %3989 = vmatpush3.msra.mxu0 %v1169_v22 }
 0x8ac   : > { %3990 = vmatprep.subr.mxu0 %v4324_v56 }
 0x8b1   : > { %v1167_v25 = vpop.permute.xlu1 %1166 }
 0x8b2   : > { %3991 = vmatpush3.msra.mxu0 %v1167_v25 }
 0x8b3   : > { %3993 = vmatmul.mubr.msk.f32.vlgmr.msra.gmra.mxu0 %vm307_vm6, %v1163_v24  ;;  %4002 = vmatprep.subr.mxu0 %v4324_v56 }
 0x8b4   : > { %4006 = vmatprep.mubr.msk.f32.mxu0 %vm4325_vm5, %v4324_v56 }
 0x8b5   : > { %v1350_v30 = vpop.permute.xlu1 %1349 }
 0x8b6   : > { %4166 = vpush %v1350_v30 }
 0x8c2   : > { %v1257_v46 = vpop.permute.xlu1 %1256 }
 0x8e7   : > { %s4167_s13 = spop %4166 }
 0x8e8   : > { %v1352_v48 = vstv %s4167_s13 }
 0x973   : > { %v1240_v32 = vpop.f32.mrf.mxu0 }
 0x974   : > { %v1245_v33 = vrot.slane %v1240_v32, 4 }
 0x975   : > { %v3994_v34 = vpop.f32.mrf.mxu0 }
 0x976   : > { %1246 = vrot.lane.b32.xlu0 %v1245_v33, %s4323_s7 }
 0x97a   : > { %1252 = vperm.xlu0 %4233, %v4462_v26  }
 0x97e   : > { %1357 = vrot.lane.b32.xlu0 %v1356_v35, %s4322_s6 }
 0x97f   : > { %4235 = vset.pattern.permute.xlu0 %v4332_v36 }
 0x9e8   : > { %v1247_v37 = vpop.permute.xlu0 %1246 }
 0x9e9   : > { %v1249_v42 = vsub.f32 %v4420_v51, %v1247_v37 }
 0x9eb   : > { %v1250_v43 = vmul.f32 %v1249_v42, %v4470_v31 }
 0x9ed   : > { %v1262_v45 = vrot.slane %v1250_v43, %v1261_v41 }
 0x9ef   : > { %v1264_v47 = vmul.f32 %v1262_v45, %v1257_v46  ;;  %v1738_v46 = vrot.slane %v4427_v54, 7  ;;  %v1999_v54 = vstv %s3816_s17 }
 0x9f1   : > { %v4578_v49 = vadd.f32 %v1264_v47, %v1160_v14 }
 0x9f3   : > { %v1355_v50 = vmul.f32 %v1352_v48, %v4578_v49 }
 0x9f5   : > { %v1253_v52 = vpop.permute.xlu0 %1252  ;;  %1363 = vrot.lane.b32.xlu1 %v1355_v50, %s4323_s7 }
 0x9f6   : > { %v1263_v58 = vmul.f32 %v1262_v45, %v1253_v52 }
 0x9f8   : > { %v4582_v59 = vadd.f32 %v1263_v58, %v1159_v18  ;;  %v2000_v58 = vadd.f32 %v1999_v54, %v4407_v7 }
 0x9f9   : > { %v1358_v0 = vpop.permute.xlu0 %1357 }
 0x9fa   : > { %v1354_v60 = vmul.f32 %v1352_v48, %v4582_v59  ;;  %vm2002_vm10 = vcmp.ne.f32.partialorder %v2000_v58, %v2000_v58 }
 0x9fc   : > { %1361 = vrot.lane.b32.xlu1 %v1354_v60, %s4323_s7 }
 0xa00   : > { %1544 = vrot.lane.b32.xlu1 %v1543_v62, %s4323_s7 }
 0xa04   : > { %1451 = vperm.xlu1 %4234, %v4464_v27  }
 0xa08   : > { %4236 = vset.pattern.permute.xlu1 %v4333_v16 }
 0xa67   : > { %v1364_v63 = vpop.permute.xlu1 %1363 }
 0xa68   : > { %4003 = vmatpush3.msra.mxu0 %v1364_v63 }
 0xa69   : > { %4004 = vmatprep.subr.mxu0 %v4324_v56 }
 0xa6e   : > { %v1362_v6 = vpop.permute.xlu1 %1361 }
 0xa6f   : > { %4005 = vmatpush3.msra.mxu0 %v1362_v6 }
 0xa70   : > { %4007 = vmatmul.mubr.msk.f32.vlgmr.msra.gmra.mxu0 %vm307_vm6, %v1358_v0  ;;  %4016 = vmatprep.subr.mxu0 %v4324_v56 }
 0xa71   : > { %4020 = vmatprep.mubr.msk.f32.mxu0 %vm4325_vm5, %v4324_v56 }
 0xa72   : > { %v1545_v8 = vpop.permute.xlu1 %1544 }
 0xa73   : > { %4168 = vpush %v1545_v8 }
 0xa7f   : > { %v1452_v30 = vpop.permute.xlu1 %1451 }
 0xaa4   : > { %s4169_s14 = spop %4168 }
 0xaa5   : > { %v1547_v33 = vstv %s4169_s14  ;;  %s209_s14 = scalar_lea.vmem %s5111_s4, %s3790_s11 }
 0xb30   : > { %v1435_v10 = vpop.f32.mrf.mxu0 }
 0xb31   : > { %v1440_v11 = vrot.slane %v1435_v10, 3 }
 0xb32   : > { %v4008_v14 = vpop.f32.mrf.mxu0 }
 0xb33   : > { %1441 = vrot.lane.b32.xlu0 %v1440_v11, %s4323_s7 }
 0xb37   : > { %1447 = vperm.xlu0 %4235, %v4462_v26  }
 0xb3b   : > { %1552 = vrot.lane.b32.xlu0 %v1551_v15, %s4322_s6 }
 0xb3c   : > { %4237 = vset.pattern.permute.xlu0 %v4333_v16 }
 0xba5   : > { %v1442_v18 = vpop.permute.xlu0 %1441 }
 0xba6   : > { %v1444_v22 = vsub.f32 %v4420_v51, %v1442_v18 }
 0xba8   : > { %v1445_v24 = vmul.f32 %v1444_v22, %v4470_v31  ;;  %v2001_v22 = vmax.f32 %v2000_v58, 0.0 }
 0xbaa   : > { %v1457_v25 = vrot.slane %v1445_v24, %v1456_v21 }
 0xbac   : > { %v1459_v32 = vmul.f32 %v1457_v25, %v1452_v30  ;;  %v2019_v30 = vstv %s3815_s18 }
 0xbae   : > { %v4605_v34 = vadd.f32 %v1459_v32, %v1355_v50 }
 0xbb0   : > { %v4608_v35 = vmul.f32 %v1547_v33, %v4605_v34 }
 0xbb2   : > { %v1448_v37 = vpop.permute.xlu0 %1447  ;;  %1558 = vrot.lane.b32.xlu1 %v4608_v35, %s4323_s7 }
 0xbb3   : > { %v1458_v42 = vmul.f32 %v1457_v25, %v1448_v37 }
 0xbb5   : > { %v4612_v43 = vadd.f32 %v1458_v42, %v1354_v60  ;;  %v2004_v60 = vand.u32 2147483647, %v2000_v58 }
 0xbb6   : > { %v1553_v48 = vpop.permute.xlu0 %1552 }
 0xbb7   : > { %v4615_v45 = vmul.f32 %v1547_v33, %v4612_v43  ;;  %v2005_v62 = vsub.f32 0.0, %v2004_v60 }
 0xbb9   : > { %1556 = vrot.lane.b32.xlu1 %v4615_v45, %s4323_s7  ;;  %v2006_v63 = vmul.f32 1.442695, %v2005_v62 }
 0xbbb   : > { %4272 = vpow2.f32 %v2006_v63 }
 0xbbd   : > { %1739 = vrot.lane.b32.xlu1 %v1738_v46, %s4323_s7 }
 0xbc1   : > { %1646 = vperm.xlu1 %4236, %v4464_v27  }
 0xbc8   : > { %v4273_v0 = vpop.eup %4272 }
 0xbc9   : > { %v2008_v6 = vadd.f32 1.0, %v4273_v0  ;;  %v2011_v8 = vmul.f32 -0.5, %v4273_v0  ;;  %v2014_v14 = vand.u32 2147483647, %v4273_v0 }
 0xbcb   : > { %4274 = vlog2.f32 %v2008_v6  ;;  %v2012_v10 = vadd.f32 1.0, %v2011_v8  ;;  %vm2015_vm9 = vcmp.lt.f32.partialorder %v2014_v14, 0.0004427343 }
 0xbcd   : > { %v2013_v18 = vmul.f32 %v4273_v0, %v2012_v10 }
 0xbd8   : > { %v4275_v11 = vpop.eup %4274 }
 0xbd9   : > { %v2010_v15 = vmul.f32 0.6931472, %v4275_v11 }
 0xbdb   : > { %v2016_v24 = vsel %vm2015_vm9, %v2013_v18, %v2010_v15  ;;  %v1990_v18 = vstv %s3813_s22  ;;  %vm3714_vm9 = vcmask 519168  }
 0xbdc   : > { %v2017_v25 = vadd.f32 %v2016_v24, %v2001_v22 }
 0xbde   : > { %v2018_v7 = vsel %vm2002_vm10, %v2000_v58, %v2017_v25  ;;  %v1651_v58 = vsub.s32 6, %v4389_v1 }
 0xbdf   : > { %v2020_v32 = vmul.f32 %v2019_v30, %v2018_v7 }
 0xbe1   : > { %v2021_v33 = vmul.f32 1.442695, %v2020_v32 }
 0xbe3   : > { %4276 = vpow2.f32 %v2021_v33 }
 0xbf0   : > { %v4628_v37 = vpop.eup %4276 }
 0xbf1   : > { %2095 = vrot.lane.b32.xlu1 %v4628_v37, %s4334_s19 }
 0xc24   : > { %v1559_v47 = vpop.permute.xlu1 %1558 }
 0xc25   : > { %4017 = vmatpush3.msra.mxu0 %v1559_v47 }
 0xc26   : > { %4018 = vmatprep.subr.mxu0 %v4324_v56 }
 0xc2b   : > { %v1557_v50 = vpop.permute.xlu1 %1556 }
 0xc2c   : > { %4019 = vmatpush3.msra.mxu0 %v1557_v50 }
 0xc2d   : > { %4021 = vmatmul.mubr.msk.f32.vlgmr.msra.gmra.mxu0 %vm307_vm6, %v1553_v48  ;;  %4030 = vmatprep.subr.mxu0 %v4324_v56  ;;  %v1746_v48 = vrot.slane %v4423_v53, 7 }
 0xc2e   : > { %4034 = vmatprep.mubr.msk.f32.mxu0 %vm4325_vm5, %v4324_v56 }
 0xc2f   : > { %v1740_v52 = vpop.permute.xlu1 %1739 }
 0xc30   : > { %4170 = vpush %v1740_v52 }
 0xc3c   : > { %v1647_v50 = vpop.permute.xlu1 %1646 }
 0xc61   : > { %s4171_s21 = spop %4170 }
 0xc63   : > { %v2096_v52 = vpop.permute.xlu1 %2095 }
 0xc64   : > { %4172 = vpush %v2096_v52 }
 0xc95   : > { %s4173_s23 = spop %4172 }
 0xced   : > { %v1630_v42 = vpop.f32.mrf.mxu0 }
 0xcee   : > { %v1635_v46 = vrot.slane %v1630_v42, 2 }
 0xcef   : > { %v4022_v47 = vpop.f32.mrf.mxu0 }
 0xcf0   : > { %1636 = vrot.lane.b32.xlu0 %v1635_v46, %s4323_s7 }
 0xcf4   : > { %1642 = vperm.xlu0 %4237, %v4462_v26  }
 0xcf8   : > { %2042 = vrot.lane.b32.xlu0 %v4433_v55, %s4335_s20  ;;  %v1742_v55 = vstv %s4171_s21 }
 0xcfc   : > { %1747 = vrot.lane.b32.xlu0 %v1746_v48, %s4322_s6 }
 0xd62   : > { %v1637_v54 = vpop.permute.xlu0 %1636 }
 0xd63   : > { %v1639_v60 = vsub.f32 %v4420_v51, %v1637_v54 }
 0xd65   : > { %v1640_v62 = vmul.f32 %v1639_v60, %v4470_v31 }
 0xd67   : > { %v1652_v63 = vrot.slane %v1640_v62, %v1651_v58 }
 0xd69   : > { %v1654_v0 = vmul.f32 %v1652_v63, %v1647_v50 }
 0xd6b   : > { %v4644_v6 = vadd.f32 %v1654_v0, %v4608_v35  ;;  %v4661_v35 = vmul.f32 %v1990_v18, %v4420_v51  ;;  %v4336_v0 = vmov 67  }
 0xd6c   : > { %4238 = vset.pattern.permute.xlu0 %v4336_v0 }
 0xd6d   : > { %v4647_v8 = vmul.f32 %v1742_v55, %v4644_v6 }
 0xd6f   : > { %v1643_v10 = vpop.permute.xlu0 %1642  ;;  %1753 = vrot.lane.b32.xlu1 %v4647_v8, %s4323_s7 }
 0xd70   : > { %v1653_v11 = vmul.f32 %v1652_v63, %v1643_v10  ;;  %v2287_v63 = vrot.slane %v4628_v37, 1 }
 0xd72   : > { %v4652_v14 = vadd.f32 %v1653_v11, %v4615_v45  ;;  %v2098_v45 = vstv %s4173_s23 }
 0xd73   : > { %v2043_v15 = vpop.permute.xlu0 %2042  ;;  %v2100_v7 = vmul.f32 0.0, %v2098_v45 }
 0xd74   : > { %v2045_v22 = vsel %vm307_vm6, %v2043_v15, 0.0  ;;  %v4656_v24 = vmul.f32 %v1742_v55, %v4652_v14 }
 0xd75   : > { %2046 = vadd.xlane.f32.xlu0 %v2045_v22 }
 0xd76   : > { %1751 = vrot.lane.b32.xlu1 %v4656_v24, %s4323_s7 }
 0xd77   : > { %v1748_v32 = vpop.permute.xlu0 %1747 }
 0xd7a   : > { %2102 = vrot.lane.b32.xlu1 %v4661_v35, %s4335_s20 }
 0xd8b   : > { %2182 = vperm.xlu0 %4238, %v4457_v20  }
 0xd8f   : > { %4239 = vset.pattern.permute.xlu0 %v4327_v23 }
 0xde1   : > { %v1754_v25 = vpop.permute.xlu1 %1753 }
 0xde2   : > { %4031 = vmatpush3.msra.mxu0 %v1754_v25 }
 0xde3   : > { %4032 = vmatprep.subr.mxu0 %v4324_v56 }
 0xde8   : > { %v1752_v30 = vpop.permute.xlu1 %1751 }
 0xde9   : > { %4033 = vmatpush3.msra.mxu0 %v1752_v30 }
 0xdea   : > { %4035 = vmatmul.mubr.msk.f32.vlgmr.msra.gmra.mxu0 %vm307_vm6, %v1748_v32  ;;  %4044 = vmatprep.subr.mxu0 %v4324_v56 }
 0xdeb   : > { %4045 = vmatpush3.msra.mxu0 %v2100_v7  ;;  %4048 = vmatprep.mubr.msk.f32.mxu0 %vm4325_vm5, %v4324_v56 }
 0xdec   : > { %4046 = vmatprep.subr.mxu0 %v4324_v56  ;;  %v2103_v33 = vpop.permute.xlu1 %2102 }
 0xded   : > { %4047 = vmatpush3.msra.mxu0 %v2100_v7 }
 0xdee   : > { %4049 = vmatmul.mubr.msk.f32.vlgmr.msra.gmra.mxu0 %vm307_vm6, %v2103_v33  ;;  %4058 = vmatprep.subr.mxu0 %v4324_v56 }
 0xdef   : > { %4062 = vmatprep.mubr.msk.f32.mxu0 %vm4325_vm5, %v4324_v56 }
 0xdfe   : > { %v2047_v42 = vpop.xlane.xlu0 %2046 }
 0xdff   : > { %4278 = vrsqrt.f32 %v2047_v42  ;;  %vm2050_vm11 = vcmp.eq.f32.partialorder %v2047_v42, inf  ;;  %v2053_v48 = vand.u32 2147483648, %v2047_v42  ;;  %vm2052_vm12 = vcmp.eq.f32.partialorder %v2047_v42, 0.0 }
 0xe06   : > { %v4693_v30 = vpop.permute.xlu0 %2182 }
 0xe0c   : > { %v4279_v46 = vpop.eup %4278 }
 0xe0d   : > { %v2049_v47 = vmul.f32 %v4279_v46, %v2047_v42 }
 0xe0f   : > { %v2051_v50 = vsel %vm2050_vm11, %v2047_v42, %v2049_v47 }
 0xe10   : > { %v2054_v52 = vsel %vm2052_vm12, %v2053_v48, %v2051_v50 }
 0xe11   : > { %v2055_v54 = vadd.f32 1e-06, %v2054_v52 }
 0xe13   : > { %4280 = vrcp.f32 %v2055_v54 }
 0xe20   : > { %v4281_v60 = vpop.eup %4280 }
 0xe21   : > { %v2057_v62 = vmul.f32 %v4281_v60, %v4420_v51  ;;  %v2295_v60 = vrot.slane %v4661_v35, 1 }
 0xe23   : > { %2059 = vrot.lane.b32.xlu1 %v2057_v62, %s4335_s20 }
 0xe27   : > { %2288 = vrot.lane.b32.xlu1 %v2287_v63, %s4334_s19 }
 0xe95   : > { %v2060_v55 = vpop.permute.xlu1 %2059 }
 0xe96   : > { %2062 = vxpose.xlu1.b32.start.end [1/1] (short) (narrow) %v2060_v55, 16 }
 0xe99   : > { %v2289_v10 = vpop.permute.xlu1 %2288 }
 0xe9a   : > { %4174 = vpush %v2289_v10 }
 0xeaa   : > { %v4681_v11 = vpop.f32.mrf.mxu0 }
 0xeac   : > { %v4036_v15 = vpop.f32.mrf.mxu0 }
 0xeae   : > { %v2172_v18 = vpop.f32.mrf.mxu0 }
 0xeb0   : > { %v4050_v22 = vpop.f32.mrf.mxu0 }
 0xeb4   : > { %4241 = vset.pattern.permute.xlu1 %v4328_v28 }
 0xeb8   : > { %2177 = vrot.lane.b32.xlu1 %v2172_v18, %s4322_s6 }
 0xecb   : > { %s4175_s24 = spop %4174 }
 0xecc   : > { %v2291_v48 = vstv %s4175_s24 }
 0xf12   : > { %v4685_v25 = vpop.trf.xlu1 }
 0xf16   : > { %v4687_v45 = vpop.trf.xlu1 }
 0xf17   : > { %2193 = vperm.xlu0 %4239, %v4687_v45  }
 0xf1b   : > { %2188 = vperm.xlu0 %4239, %v4685_v25  }
 0xf1f   : > { %4240 = vset.pattern.permute.xlu0 %v4328_v28 }
 0xf2a   : > { %v2178_v20 = vpop.permute.xlu1 %2177 }
 0xf2b   : > { %v2180_v23 = vsub.f32 %v4420_v51, %v2178_v20 }
 0xf2d   : > { %v2185_v32 = vmul.f32 %v4693_v30, %v2180_v23 }
 0xf2f   : > { %v2199_v33 = vrot.slane %v2185_v32, %v4402_v4  ;;  %v2484_v4 = vrot.slane %v4628_v37, 2 }
 0xf92   : > { %v2194_v42 = vpop.permute.xlu0 %2193 }
 0xf93   : > { %v2201_v46 = vmul.f32 %v2199_v33, %v2194_v42 }
 0xf95   : > { %v4697_v47 = vadd.f32 %v2201_v46, %v2100_v7 }
 0xf96   : > { %v2189_v50 = vpop.permute.xlu0 %2188 }
 0xf97   : > { %v2200_v52 = vmul.f32 %v2199_v33, %v2189_v50  ;;  %v2294_v54 = vmul.f32 %v2291_v48, %v4697_v47 }
 0xf99   : > { %v4700_v28 = vadd.f32 %v2200_v52, %v2100_v7  ;;  %2302 = vrot.lane.b32.xlu1 %v2294_v54, %s4337_s25 }
 0xf9b   : > { %v2293_v62 = vmul.f32 %v2291_v48, %v4700_v28 }
 0xf9d   : > { %2300 = vrot.lane.b32.xlu0 %v2293_v62, %s4337_s25  ;;  %2296 = vrot.lane.b32.xlu1 %v2295_v60, %s4335_s20 }
 0xfa1   : > { %2485 = vrot.lane.b32.xlu0 %v2484_v4, %s4334_s19 }
 0xfa5   : > { %2390 = vperm.xlu0 %4240, %v4687_v45  }
 0xfa9   : > { %4242 = vset.pattern.permute.xlu0 %v4329_v57 }
0x100b   : > { %v2303_v7 = vpop.permute.xlu1 %2302 }
0x100c   : > { %4059 = vmatpush3.msra.mxu0 %v2303_v7  ;;  %v2681_v7 = vrot.slane %v4628_v37, 3 }
0x100d   : > { %4060 = vmatprep.subr.mxu0 %v4324_v56 }
0x100f   : > { %v2301_v63 = vpop.permute.xlu0 %2300  ;;  %v2297_v0 = vpop.permute.xlu1 %2296 }
0x1010   : > { %4061 = vmatpush3.msra.mxu0 %v2301_v63 }
0x1011   : > { %4063 = vmatmul.mubr.msk.f32.vlgmr.msra.gmra.mxu0 %vm307_vm6, %v2297_v0  ;;  %4072 = vmatprep.subr.mxu0 %v4324_v56 }
0x1012   : > { %4076 = vmatprep.mubr.msk.f32.mxu0 %vm4325_vm5, %v4324_v56 }
0x1013   : > { %v2486_v55 = vpop.permute.xlu0 %2485 }
0x1014   : > { %4176 = vpush %v2486_v55 }
0x1020   : > { %v2391_v33 = vpop.permute.xlu0 %2390 }
0x1045   : > { %s4177_s26 = spop %4176 }
0x1046   : > { %v2488_v46 = vstv %s4177_s26 }
0x10d1   : > { %v2374_v10 = vpop.f32.mrf.mxu0 }
0x10d2   : > { %v2379_v15 = vrot.slane %v2374_v10, 7 }
0x10d3   : > { %v4064_v18 = vpop.f32.mrf.mxu0 }
0x10d4   : > { %2380 = vrot.lane.b32.xlu1 %v2379_v15, %s4322_s6 }
0x10d8   : > { %2386 = vperm.xlu1 %4241, %v4685_v25  }
0x10dc   : > { %4243 = vset.pattern.permute.xlu1 %v4329_v57  ;;  %v2492_v57 = vrot.slane %v4661_v35, 2 }
0x1146   : > { %v2381_v22 = vpop.permute.xlu1 %2380 }
0x1147   : > { %v2383_v20 = vsub.f32 %v4420_v51, %v2381_v22 }
0x1149   : > { %v2384_v23 = vmul.f32 %v2383_v20, %v4693_v30 }
0x114b   : > { %v2396_v32 = vrot.slane %v2384_v23, %v4405_v5 }
0x114d   : > { %v2398_v42 = vmul.f32 %v2396_v32, %v2391_v33 }
0x114f   : > { %v4722_v48 = vadd.f32 %v2398_v42, %v2294_v54 }
0x1151   : > { %v2491_v50 = vmul.f32 %v2488_v46, %v4722_v48 }
0x1153   : > { %v2387_v52 = vpop.permute.xlu1 %2386  ;;  %2499 = vrot.lane.b32.xlu1 %v2491_v50, %s4337_s25 }
0x1154   : > { %v2397_v60 = vmul.f32 %v2396_v32, %v2387_v52 }
0x1156   : > { %v4727_v4 = vadd.f32 %v2397_v60, %v2293_v62 }
0x1157   : > { %2493 = vrot.lane.b32.xlu1 %v2492_v57, %s4335_s20 }
0x1158   : > { %v2490_v5 = vmul.f32 %v2488_v46, %v4727_v4 }
0x115a   : > { %2497 = vrot.lane.b32.xlu0 %v2490_v5, %s4337_s25 }
0x115e   : > { %2682 = vrot.lane.b32.xlu0 %v2681_v7, %s4334_s19 }
0x1162   : > { %2587 = vperm.xlu0 %4242, %v4687_v45  }
0x1166   : > { %4244 = vset.pattern.permute.xlu0 %v4330_v29 }
0x11c5   : > { %v2500_v54 = vpop.permute.xlu1 %2499 }
0x11c6   : > { %4073 = vmatpush3.msra.mxu0 %v2500_v54  ;;  %v2878_v54 = vrot.slane %v4628_v37, 4 }
0x11c7   : > { %4074 = vmatprep.subr.mxu0 %v4324_v56 }
0x11c9   : > { %v2494_v62 = vpop.permute.xlu1 %2493 }
0x11cc   : > { %v2498_v63 = vpop.permute.xlu0 %2497 }
0x11cd   : > { %4075 = vmatpush3.msra.mxu0 %v2498_v63 }
0x11ce   : > { %4077 = vmatmul.mubr.msk.f32.vlgmr.msra.gmra.mxu0 %vm307_vm6, %v2494_v62  ;;  %4086 = vmatprep.subr.mxu0 %v4324_v56 }
0x11cf   : > { %4090 = vmatprep.mubr.msk.f32.mxu0 %vm4325_vm5, %v4324_v56 }
0x11d0   : > { %v2683_v0 = vpop.permute.xlu0 %2682 }
0x11d1   : > { %4178 = vpush %v2683_v0 }
0x11dd   : > { %v2588_v32 = vpop.permute.xlu0 %2587 }
0x1202   : > { %s4179_s27 = spop %4178 }
0x1203   : > { %v2685_v42 = vstv %s4179_s27 }
0x128e   : > { %v2571_v55 = vpop.f32.mrf.mxu0 }
0x128f   : > { %v2576_v10 = vrot.slane %v2571_v55, 6 }
0x1290   : > { %v4078_v15 = vpop.f32.mrf.mxu0 }
0x1291   : > { %2577 = vrot.lane.b32.xlu1 %v2576_v10, %s4322_s6 }
0x1295   : > { %2583 = vperm.xlu1 %4243, %v4685_v25  }
0x1299   : > { %4245 = vset.pattern.permute.xlu1 %v4330_v29  ;;  %v2689_v29 = vrot.slane %v4661_v35, 3 }
0x1303   : > { %v2578_v18 = vpop.permute.xlu1 %2577 }
0x1304   : > { %v2580_v22 = vsub.f32 %v4420_v51, %v2578_v18 }
0x1306   : > { %v2581_v20 = vmul.f32 %v2580_v22, %v4693_v30 }
0x1308   : > { %v2593_v23 = vrot.slane %v2581_v20, %v4411_v9 }
0x130a   : > { %v2595_v33 = vmul.f32 %v2593_v23, %v2588_v32 }
0x130c   : > { %v4747_v46 = vadd.f32 %v2595_v33, %v2491_v50 }
0x130e   : > { %v2688_v52 = vmul.f32 %v2685_v42, %v4747_v46 }
0x1310   : > { %v2584_v57 = vpop.permute.xlu1 %2583  ;;  %2696 = vrot.lane.b32.xlu1 %v2688_v52, %s4337_s25 }
0x1311   : > { %v2594_v60 = vmul.f32 %v2593_v23, %v2584_v57 }
0x1313   : > { %v4752_v7 = vadd.f32 %v2594_v60, %v2490_v5 }
0x1314   : > { %2690 = vrot.lane.b32.xlu1 %v2689_v29, %s4335_s20 }
0x1315   : > { %v2687_v9 = vmul.f32 %v2685_v42, %v4752_v7 }
0x1317   : > { %2694 = vrot.lane.b32.xlu0 %v2687_v9, %s4337_s25 }
0x131b   : > { %2879 = vrot.lane.b32.xlu0 %v2878_v54, %s4334_s19 }
0x131f   : > { %2784 = vperm.xlu0 %4244, %v4687_v45  }
0x1323   : > { %4246 = vset.pattern.permute.xlu0 %v4331_v61 }
0x1382   : > { %v2697_v50 = vpop.permute.xlu1 %2696 }
0x1383   : > { %4087 = vmatpush3.msra.mxu0 %v2697_v50  ;;  %v3075_v50 = vrot.slane %v4628_v37, 5 }
0x1384   : > { %4088 = vmatprep.subr.mxu0 %v4324_v56 }
0x1386   : > { %v2691_v5 = vpop.permute.xlu1 %2690 }
0x1389   : > { %v2695_v62 = vpop.permute.xlu0 %2694 }
0x138a   : > { %4089 = vmatpush3.msra.mxu0 %v2695_v62 }
0x138b   : > { %4091 = vmatmul.mubr.msk.f32.vlgmr.msra.gmra.mxu0 %vm307_vm6, %v2691_v5  ;;  %4100 = vmatprep.subr.mxu0 %v4324_v56 }
0x138c   : > { %4104 = vmatprep.mubr.msk.f32.mxu0 %vm4325_vm5, %v4324_v56 }
0x138d   : > { %v2880_v63 = vpop.permute.xlu0 %2879 }
0x138e   : > { %4180 = vpush %v2880_v63 }
0x139a   : > { %v2785_v23 = vpop.permute.xlu0 %2784 }
0x13bf   : > { %s4181_s28 = spop %4180 }
0x13c0   : > { %v2882_v33 = vstv %s4181_s28 }
0x144b   : > { %v2768_v0 = vpop.f32.mrf.mxu0 }
0x144c   : > { %v2773_v55 = vrot.slane %v2768_v0, 5 }
0x144d   : > { %v4092_v10 = vpop.f32.mrf.mxu0 }
0x144e   : > { %2774 = vrot.lane.b32.xlu1 %v2773_v55, %s4322_s6 }
0x1452   : > { %2780 = vperm.xlu1 %4245, %v4685_v25  }
0x1456   : > { %4247 = vset.pattern.permute.xlu1 %v4331_v61  ;;  %v2886_v61 = vrot.slane %v4661_v35, 4 }
0x14c0   : > { %v2775_v15 = vpop.permute.xlu1 %2774 }
0x14c1   : > { %v2777_v18 = vsub.f32 %v4420_v51, %v2775_v15 }
0x14c3   : > { %v2778_v22 = vmul.f32 %v2777_v18, %v4693_v30 }
0x14c5   : > { %v2790_v20 = vrot.slane %v2778_v22, %v4396_v3 }
0x14c7   : > { %v2792_v32 = vmul.f32 %v2790_v20, %v2785_v23 }
0x14c9   : > { %v4772_v42 = vadd.f32 %v2792_v32, %v2688_v52 }
0x14cb   : > { %v2885_v57 = vmul.f32 %v2882_v33, %v4772_v42 }
0x14cd   : > { %v2781_v29 = vpop.permute.xlu1 %2780  ;;  %2893 = vrot.lane.b32.xlu1 %v2885_v57, %s4337_s25 }
0x14ce   : > { %v2791_v60 = vmul.f32 %v2790_v20, %v2781_v29 }
0x14d0   : > { %v4777_v54 = vadd.f32 %v2791_v60, %v2687_v9 }
0x14d1   : > { %2887 = vrot.lane.b32.xlu1 %v2886_v61, %s4335_s20 }
0x14d2   : > { %v2884_v3 = vmul.f32 %v2882_v33, %v4777_v54 }
0x14d4   : > { %2891 = vrot.lane.b32.xlu0 %v2884_v3, %s4337_s25 }
0x14d8   : > { %3076 = vrot.lane.b32.xlu0 %v3075_v50, %s4334_s19 }
0x14dc   : > { %2981 = vperm.xlu0 %4246, %v4687_v45  }
0x14e0   : > { %4248 = vset.pattern.permute.xlu0 %v4332_v36 }
0x153f   : > { %v2894_v52 = vpop.permute.xlu1 %2893 }
0x1540   : > { %4101 = vmatpush3.msra.mxu0 %v2894_v52  ;;  %v3272_v52 = vrot.slane %v4628_v37, 6 }
0x1541   : > { %4102 = vmatprep.subr.mxu0 %v4324_v56 }
0x1543   : > { %v2888_v9 = vpop.permute.xlu1 %2887 }
0x1546   : > { %v2892_v5 = vpop.permute.xlu0 %2891 }
0x1547   : > { %4103 = vmatpush3.msra.mxu0 %v2892_v5 }
0x1548   : > { %4105 = vmatmul.mubr.msk.f32.vlgmr.msra.gmra.mxu0 %vm307_vm6, %v2888_v9  ;;  %4114 = vmatprep.subr.mxu0 %v4324_v56 }
0x1549   : > { %4118 = vmatprep.mubr.msk.f32.mxu0 %vm4325_vm5, %v4324_v56 }
0x154a   : > { %v3077_v62 = vpop.permute.xlu0 %3076 }
0x154b   : > { %4182 = vpush %v3077_v62 }
0x1557   : > { %v2982_v20 = vpop.permute.xlu0 %2981 }
0x157c   : > { %s4183_s29 = spop %4182 }
0x157d   : > { %v3079_v32 = vstv %s4183_s29 }
0x1608   : > { %v2965_v63 = vpop.f32.mrf.mxu0 }
0x1609   : > { %v2970_v0 = vrot.slane %v2965_v63, 4 }
0x160a   : > { %v4106_v55 = vpop.f32.mrf.mxu0 }
0x160b   : > { %2971 = vrot.lane.b32.xlu1 %v2970_v0, %s4322_s6 }
0x160f   : > { %2977 = vperm.xlu1 %4247, %v4685_v25  }
0x1613   : > { %4249 = vset.pattern.permute.xlu1 %v4332_v36  ;;  %v3083_v36 = vrot.slane %v4661_v35, 5 }
0x167d   : > { %v2972_v10 = vpop.permute.xlu1 %2971 }
0x167e   : > { %v2974_v15 = vsub.f32 %v4420_v51, %v2972_v10 }
0x1680   : > { %v2975_v18 = vmul.f32 %v2974_v15, %v4693_v30 }
0x1682   : > { %v2987_v22 = vrot.slane %v2975_v18, %v1261_v41 }
0x1684   : > { %v2989_v23 = vmul.f32 %v2987_v22, %v2982_v20 }
0x1686   : > { %v4798_v33 = vadd.f32 %v2989_v23, %v2885_v57 }
0x1688   : > { %v3082_v29 = vmul.f32 %v3079_v32, %v4798_v33 }
0x168a   : > { %v2978_v61 = vpop.permute.xlu1 %2977  ;;  %3090 = vrot.lane.b32.xlu1 %v3082_v29, %s4337_s25 }
0x168b   : > { %v2988_v60 = vmul.f32 %v2987_v22, %v2978_v61 }
0x168d   : > { %v4803_v50 = vadd.f32 %v2988_v60, %v2884_v3 }
0x168e   : > { %3084 = vrot.lane.b32.xlu1 %v3083_v36, %s4335_s20 }
0x168f   : > { %v3081_v41 = vmul.f32 %v3079_v32, %v4803_v50 }
0x1691   : > { %3088 = vrot.lane.b32.xlu0 %v3081_v41, %s4337_s25 }
0x1695   : > { %3273 = vrot.lane.b32.xlu0 %v3272_v52, %s4334_s19 }
0x1699   : > { %3178 = vperm.xlu0 %4248, %v4687_v45  }
0x169d   : > { %4250 = vset.pattern.permute.xlu0 %v4333_v16 }
0x16fc   : > { %v3091_v57 = vpop.permute.xlu1 %3090 }
0x16fd   : > { %4115 = vmatpush3.msra.mxu0 %v3091_v57  ;;  %v3469_v57 = vrot.slane %v4628_v37, 7 }
0x16fe   : > { %4116 = vmatprep.subr.mxu0 %v4324_v56 }
0x1700   : > { %v3085_v3 = vpop.permute.xlu1 %3084 }
0x1703   : > { %v3089_v9 = vpop.permute.xlu0 %3088 }
0x1704   : > { %4117 = vmatpush3.msra.mxu0 %v3089_v9 }
0x1705   : > { %4119 = vmatmul.mubr.msk.f32.vlgmr.msra.gmra.mxu0 %vm307_vm6, %v3085_v3  ;;  %4128 = vmatprep.subr.mxu0 %v4324_v56 }
0x1706   : > { %4132 = vmatprep.mubr.msk.f32.mxu0 %vm4325_vm5, %v4324_v56 }
0x1707   : > { %v3274_v5 = vpop.permute.xlu0 %3273 }
0x1708   : > { %4184 = vpush %v3274_v5 }
0x1714   : > { %v3179_v22 = vpop.permute.xlu0 %3178 }
0x1739   : > { %s4185_s30 = spop %4184 }
0x173a   : > { %v3276_v23 = vstv %s4185_s30 }
0x17c5   : > { %v3162_v62 = vpop.f32.mrf.mxu0 }
0x17c6   : > { %v3167_v63 = vrot.slane %v3162_v62, 3 }
0x17c7   : > { %v4120_v0 = vpop.f32.mrf.mxu0 }
0x17c8   : > { %3168 = vrot.lane.b32.xlu1 %v3167_v63, %s4322_s6 }
0x17cc   : > { %3174 = vperm.xlu1 %4249, %v4685_v25  }
0x17d0   : > { %4251 = vset.pattern.permute.xlu1 %v4333_v16  ;;  %v3280_v16 = vrot.slane %v4661_v35, 6 }
0x183a   : > { %v3169_v55 = vpop.permute.xlu1 %3168 }
0x183b   : > { %v3171_v10 = vsub.f32 %v4420_v51, %v3169_v55 }
0x183d   : > { %v3172_v15 = vmul.f32 %v3171_v10, %v4693_v30 }
0x183f   : > { %v3184_v18 = vrot.slane %v3172_v15, %v1456_v21 }
0x1841   : > { %v3186_v20 = vmul.f32 %v3184_v18, %v3179_v22 }
0x1843   : > { %v4824_v32 = vadd.f32 %v3186_v20, %v3082_v29 }
0x1845   : > { %v3279_v61 = vmul.f32 %v3276_v23, %v4824_v32 }
0x1847   : > { %v3175_v36 = vpop.permute.xlu1 %3174  ;;  %3287 = vrot.lane.b32.xlu1 %v3279_v61, %s4337_s25 }
0x1848   : > { %v3185_v60 = vmul.f32 %v3184_v18, %v3175_v36 }
0x184a   : > { %v4829_v52 = vadd.f32 %v3185_v60, %v3081_v41 }
0x184b   : > { %3281 = vrot.lane.b32.xlu1 %v3280_v16, %s4335_s20  ;;  %v3477_v16 = vrot.slane %v4661_v35, 7 }
0x184c   : > { %v3278_v21 = vmul.f32 %v3276_v23, %v4829_v52 }
0x184e   : > { %3285 = vrot.lane.b32.xlu0 %v3278_v21, %s4337_s25 }
0x1852   : > { %3470 = vrot.lane.b32.xlu0 %v3469_v57, %s4334_s19 }
0x1856   : > { %3375 = vperm.xlu0 %4250, %v4687_v45  }
0x18b9   : > { %v3288_v29 = vpop.permute.xlu1 %3287 }
0x18ba   : > { %4129 = vmatpush3.msra.mxu0 %v3288_v29 }
0x18bb   : > { %4130 = vmatprep.subr.mxu0 %v4324_v56 }
0x18bd   : > { %v3282_v3 = vpop.permute.xlu1 %3281 }
0x18c0   : > { %v3286_v9 = vpop.permute.xlu0 %3285 }
0x18c1   : > { %4131 = vmatpush3.msra.mxu0 %v3286_v9 }
0x18c2   : > { %4133 = vmatmul.mubr.msk.f32.vlgmr.msra.gmra.mxu0 %vm307_vm6, %v3282_v3  ;;  %4142 = vmatprep.subr.mxu0 %v4324_v56  ;;  %v268_v3 = vstv %s3792_s9 }
0x18c3   : > { %4146 = vmatprep.mubr.msk.f32.mxu0 %vm4325_vm5, %v4324_v56  ;;  %v269_v9 = vmul.f32 %v268_v3, %v4423_v53 }
0x18c4   : > { %v3471_v41 = vpop.permute.xlu0 %3470 }
0x18c5   : > { %4186 = vpush %v3471_v41 }
0x18d1   : > { %v3376_v15 = vpop.permute.xlu0 %3375 }
0x18f6   : > { %s4187_s5 = spop %4186 }
0x18f7   : > { %v3473_v22 = vstv %s4187_s5 }
0x1982   : > { %v3359_v37 = vpop.f32.mrf.mxu0 }
0x1983   : > { %v3364_v5 = vrot.slane %v3359_v37, 2 }
0x1984   : > { %v4134_v62 = vpop.f32.mrf.mxu0 }
0x1985   : > { %3365 = vrot.lane.b32.xlu1 %v3364_v5, %s4322_s6 }
0x1989   : > { %3371 = vperm.xlu1 %4251, %v4685_v25  }
0x19f7   : > { %v3366_v63 = vpop.permute.xlu1 %3365 }
0x19f8   : > { %v3368_v0 = vsub.f32 %v4420_v51, %v3366_v63 }
0x19fa   : > { %v3369_v55 = vmul.f32 %v3368_v0, %v4693_v30 }
0x19fc   : > { %v3381_v10 = vrot.slane %v3369_v55, %v1651_v58  ;;  %v1992_v58 = vstv %s3814_s8 }
0x19fd   : > { %v1993_v29 = vmul.f32 %v1992_v58, %v4661_v35 }
0x19fe   : > { %v3383_v18 = vmul.f32 %v3381_v10, %v3376_v15  ;;  %v1830_v15 = vrot.slane %v4681_v11, 1 }
0x1a00   : > { %v4848_v20 = vadd.f32 %v3383_v18, %v3279_v61 }
0x1a02   : > { %v4851_v23 = vmul.f32 %v3473_v22, %v4848_v20 }
0x1a04   : > { %v3372_v36 = vpop.permute.xlu1 %3371  ;;  %3484 = vrot.lane.b32.xlu1 %v4851_v23, %s4337_s25 }
0x1a05   : > { %v3382_v60 = vmul.f32 %v3381_v10, %v3372_v36 }
0x1a07   : > { %v4856_v57 = vadd.f32 %v3382_v60, %v3278_v21  ;;  %v4338_v21 = vmov 7  }
0x1a08   : > { %3478 = vrot.lane.b32.xlu1 %v3477_v16, %s4335_s20  ;;  %4253 = vset.pattern.permute.xlu0 %v4338_v21 }
0x1a09   : > { %v4860_v61 = vmul.f32 %v3473_v22, %v4856_v57  ;;  %4252 = vset.pattern.permute.xlu1 %v4338_v21 }
0x1a0b   : > { %3482 = vrot.lane.b32.xlu0 %v4860_v61, %s4337_s25 }
0x1a0f   : > { %1995 = vrot.lane.b32.xlu0 %v1993_v29, %s4322_s6 }
0x1a13   : > { %271 = vrot.lane.b32.xlu0 %v269_v9, %s4322_s6 }
0x1a76   : > { %v3485_v41 = vpop.permute.xlu1 %3484 }
0x1a77   : > { %4143 = vmatpush3.msra.mxu0 %v3485_v41 }
0x1a78   : > { %4144 = vmatprep.subr.mxu0 %v4324_v56 }
0x1a7a   : > { %v3479_v37 = vpop.permute.xlu1 %3478 }
0x1a7d   : > { %v3483_v5 = vpop.permute.xlu0 %3482 }
0x1a7e   : > { %4145 = vmatpush3.msra.mxu0 %v3483_v5 }
0x1a7f   : > { %4147 = vmatmul.mubr.msk.f32.vlgmr.msra.gmra.mxu0 %vm307_vm6, %v3479_v37 }
0x1a81   : > { %v1996_v35 = vpop.permute.xlu0 %1995 }
0x1a82   : > { %v4871_v62 = vsub.f32 %v4420_v51, %v1996_v35 }
0x1a84   : > { %v2023_v53 = vmul.f32 %v4871_v62, %v4871_v62 }
0x1a85   : > { %v272_v63 = vpop.permute.xlu0 %271 }
0x1a86   : > { %v4876_v0 = vsub.f32 %v4420_v51, %v272_v63  ;;  %2025 = vrot.lane.b32.xlu1 %v2023_v53, %s4339_s10 }
0x1a88   : > { %v306_v55 = vmul.f32 %v4876_v0, %v4876_v0 }
0x1a8a   : > { %v308_v10 = vsel %vm307_vm6, %v306_v55, 0.0 }
0x1a8b   : > { %309 = vadd.xlane.f32.xlu0 %v308_v10 }
0x1aa1   : > { %1831 = vrot.lane.b32.xlu0 %v1830_v15, %s4323_s7 }
0x1aa5   : > { %3568 = vperm.xlu0 %4253, %v4685_v25  }
0x1aa9   : > { %687 = vrot.lane.b32.xlu0 %v4499_v2, %s4323_s7 }
0x1af8   : > { %v2026_v18 = vpop.permute.xlu1 %2025 }
0x1af9   : > { %v2028_v22 = vsel %vm307_vm6, %v2026_v18, 0.0 }
0x1afa   : > { %2029 = vadd.xlane.f32.xlu1 %v2028_v22 }
0x1b0b   : > { %1841 = vperm.xlu1 %4252, %v4464_v27  }
0x1b0f   : > { %1837 = vperm.xlu1 %4252, %v4462_v26  }
0x1b13   : > { %3572 = vperm.xlu1 %4252, %v4687_v45  }
0x1b17   : > { %491 = vrot.lane.b32.xlu1 %v4476_v40, %s4323_s7  ;;  %v310_v40 = vpop.xlane.xlu0 %309 }
0x1b18   : > { %4282 = vrsqrt.f32 %v310_v40  ;;  %vm313_vm13 = vcmp.eq.f32.partialorder %v310_v40, inf  ;;  %vm315_vm14 = vcmp.eq.f32.partialorder %v310_v40, 0.0 }
0x1b1b   : > { %489 = vrot.lane.b32.xlu1 %v4474_v38, %s4323_s7 }
0x1b1f   : > { %685 = vrot.lane.b32.xlu1 %v4504_v12, %s4323_s7 }
0x1b23   : > { %880 = vrot.lane.b32.xlu1 %v4530_v44, %s4323_s7  ;;  %v316_v44 = vand.u32 2147483648, %v310_v40 }
0x1b25   : > { %v4283_v2 = vpop.eup %4282 }
0x1b26   : > { %v312_v12 = vmul.f32 %v4283_v2, %v310_v40 }
0x1b27   : > { %1075 = vrot.lane.b32.xlu1 %v4555_v17, %s4323_s7 }
0x1b28   : > { %v314_v17 = vsel %vm313_vm13, %v310_v40, %v312_v12 }
0x1b2b   : > { %1270 = vrot.lane.b32.xlu1 %v4582_v59, %s4323_s7  ;;  %v317_v59 = vsel %vm315_vm14, %v316_v44, %v314_v17 }
0x1b2f   : > { %1465 = vrot.lane.b32.xlu1 %v4612_v43, %s4323_s7  ;;  %v318_v43 = vadd.f32 1e-06, %v317_v59 }
0x1b31   : > { %4284 = vrcp.f32 %v318_v43 }
0x1b33   : > { %1660 = vrot.lane.b32.xlu1 %v4652_v14, %s4323_s7 }
0x1b3f   : > { %v3556_v26 = vpop.f32.mrf.mxu0 }
0x1b40   : > { %v3561_v27 = vrot.slane %v3556_v26, 1 }
0x1b41   : > { %v4148_v38 = vpop.f32.mrf.mxu0 }
0x1b42   : > { %3562 = vrot.lane.b32.xlu0 %v3561_v27, %s4322_s6 }
0x1b46   : > { %882 = vrot.lane.b32.xlu0 %v4526_v39, %s4323_s7  ;;  %v1832_v39 = vpop.permute.xlu0 %1831 }
0x1b4a   : > { %1077 = vrot.lane.b32.xlu0 %v4551_v13, %s4323_s7  ;;  %v1834_v13 = vsub.f32 %v4420_v51, %v1832_v39  ;;  %v4931_v21 = vpop.permute.xlu0 %3568 }
0x1b4e   : > { %1272 = vrot.lane.b32.xlu0 %v4578_v49, %s4323_s7  ;;  %v1835_v49 = vmul.f32 %v1834_v13, %v4470_v31  ;;  %v4285_v31 = vpop.eup %4284  ;;  %v688_v53 = vpop.permute.xlu0 %687 }
0x1b4f   : > { %v320_v9 = vmul.f32 0.25, %v4285_v31 }
0x1b51   : > { %v4937_v5 = vmul.f32 %v320_v9, %v4876_v0 }
0x1b52   : > { %1467 = vrot.lane.b32.xlu0 %v4605_v34, %s4323_s7  ;;  %v1846_v34 = vsub.s32 7, %v4389_v1 }
0x1b53   : > { %v682_v63 = vrot.slane %v4937_v5, 1  ;;  %v1072_v27 = vrot.slane %v4937_v5, 3  ;;  %v1462_v12 = vrot.slane %v4937_v5, 5  ;;  %v1657_v39 = vrot.slane %v4937_v5, 6 }
0x1b56   : > { %1662 = vrot.lane.b32.xlu0 %v4644_v6, %s4323_s7  ;;  %v1847_v6 = vrot.slane %v1835_v49, %v1846_v34  ;;  %v1852_v49 = vrot.slane %v4937_v5, 7 }
0x1b83   : > { %v2030_v14 = vpop.xlane.xlu1 %2029 }
0x1b84   : > { %4286 = vrsqrt.f32 %v2030_v14  ;;  %vm2033_vm15 = vcmp.eq.f32.partialorder %v2030_v14, inf  ;;  %vm2035_vm0 = vcmp.eq.f32.partialorder %v2030_v14, 0.0 }
0x1b87   : > { %v1842_v11 = vpop.permute.xlu1 %1841 }
0x1b88   : > { %v1849_v25 = vmul.f32 %v1847_v6, %v1842_v11 }
0x1b8a   : > { %v1851_v45 = vadd.f32 %v1849_v25, %v4647_v8  ;;  %v2036_v8 = vand.u32 2147483648, %v2030_v14 }
0x1b8b   : > { %v1838_v36 = vpop.permute.xlu1 %1837 }
0x1b8c   : > { %v1848_v16 = vmul.f32 %v1847_v6, %v1838_v36  ;;  %1857 = vrot.lane.b32.xlu0 %v1851_v45, %s4323_s7 }
0x1b8e   : > { %v1850_v60 = vadd.f32 %v1848_v16, %v4656_v24 }
0x1b8f   : > { %v4926_v58 = vpop.permute.xlu1 %3572 }
0x1b90   : > { %2211 = vrot.lane.b32.xlu0 %v4697_v47, %s4337_s25  ;;  %1855 = vrot.lane.b32.xlu1 %v1850_v60, %s4323_s7 }
0x1b91   : > { %v4287_v29 = vpop.eup %4286 }
0x1b92   : > { %v2032_v3 = vmul.f32 %v4287_v29, %v2030_v14 }
0x1b93   : > { %v492_v41 = vpop.permute.xlu1 %491 }
0x1b94   : > { %v2034_v37 = vsel %vm2033_vm15, %v2030_v14, %v2032_v3  ;;  %3940 = vmatpush3.msra.mxu1 %v492_v41  ;;  %2209 = vrot.lane.b32.xlu1 %v4700_v28, %s4337_s25 }
0x1b95   : > { %v2037_v24 = vsel %vm2035_vm0, %v2036_v8, %v2034_v37  ;;  %3941 = vmatprep.subr.mxu1 %v4324_v56 }
0x1b96   : > { %v2038_v47 = vadd.f32 1e-06, %v2037_v24 }
0x1b97   : > { %v490_v35 = vpop.permute.xlu1 %489 }
0x1b98   : > { %4288 = vrcp.f32 %v2038_v47  ;;  %3942 = vmatpush3.msra.mxu1 %v490_v35  ;;  %2408 = vrot.lane.b32.xlu1 %v4722_v48, %s4337_s25 }
0x1b99   : > { %3944 = vmatmul.mubr.msk.f32.vlgmr.msra.gmra.mxu1 %vm307_vm6, %v4937_v5  ;;  %3953 = vmatprep.subr.mxu1 %v4324_v56 }
0x1b9a   : > { %3954 = vmatpush3.msra.mxu1 %v688_v53  ;;  %3957 = vmatprep.mubr.msk.f32.mxu1 %vm4325_vm5, %v4324_v56 }
0x1b9b   : > { %v686_v28 = vpop.permute.xlu1 %685  ;;  %3955 = vmatprep.subr.mxu1 %v4324_v56 }
0x1b9c   : > { %3956 = vmatpush3.msra.mxu1 %v686_v28 }
0x1b9d   : > { %3958 = vmatmul.mubr.msk.f32.vlgmr.msra.gmra.mxu1 %vm307_vm6, %v682_v63  ;;  %3967 = vmatprep.subr.mxu1 %v4324_v56 }
0x1b9e   : > { %3971 = vmatprep.mubr.msk.f32.mxu1 %vm4325_vm5, %v4324_v56 }
0x1b9f   : > { %v881_v15 = vpop.permute.xlu1 %880 }
0x1ba3   : > { %v1076_v26 = vpop.permute.xlu1 %1075 }
0x1ba5   : > { %v4289_v48 = vpop.eup %4288 }
0x1ba6   : > { %v2040_v0 = vmul.f32 0.25, %v4289_v48 }
0x1ba8   : > { %v4953_v55 = vmul.f32 %v2040_v0, %v4871_v62 }
0x1baa   : > { %2205 = vrot.lane.b32.xlu0 %v4953_v55, %s4339_s10  ;;  %v2401_v10 = vrot.slane %v4953_v55, 1  ;;  %v2598_v18 = vrot.slane %v4953_v55, 2  ;;  %v2795_v22 = vrot.slane %v4953_v55, 3  ;;  %v2992_v38 = vrot.slane %v4953_v55, 4 }
0x1bab   : > { %v3386_v59 = vrot.slane %v4953_v55, 6 }
0x1bac   : > { %2402 = vrot.lane.b32.xlu1 %v2401_v10, %s4339_s10 }
0x1bae   : > { %2406 = vrot.lane.b32.xlu0 %v4727_v4, %s4337_s25 }
0x1bb0   : > { %2603 = vrot.lane.b32.xlu1 %v4752_v7, %s4337_s25 }
0x1bb2   : > { %2605 = vrot.lane.b32.xlu0 %v4747_v46, %s4337_s25  ;;  %v877_v46 = vrot.slane %v4937_v5, 2 }
0x1bb4   : > { %2802 = vrot.lane.b32.xlu1 %v4772_v42, %s4337_s25  ;;  %v3563_v62 = vpop.permute.xlu0 %3562 }
0x1bb5   : > { %v3565_v7 = vsub.f32 %v4420_v51, %v3563_v62 }
0x1bb6   : > { %2599 = vrot.lane.b32.xlu0 %v2598_v18, %s4339_s10 }
0x1bb7   : > { %v3566_v51 = vmul.f32 %v3565_v7, %v4693_v30 }
0x1bb8   : > { %2796 = vrot.lane.b32.xlu1 %v2795_v22, %s4339_s10  ;;  %v883_v4 = vpop.permute.xlu0 %882 }
0x1bb9   : > { %3968 = vmatpush3.msra.mxu1 %v883_v4  ;;  %v3578_v30 = vrot.slane %v3566_v51, %v1846_v34 }
0x1bba   : > { %2800 = vrot.lane.b32.xlu0 %v4777_v54, %s4337_s25  ;;  %3969 = vmatprep.subr.mxu1 %v4324_v56  ;;  %v1271_v54 = vpop.permute.xlu1 %1270 }
0x1bbb   : > { %3970 = vmatpush3.msra.mxu1 %v881_v15  ;;  %v3580_v1 = vmul.f32 %v3578_v30, %v4926_v58 }
0x1bbc   : > { %2997 = vrot.lane.b32.xlu1 %v4803_v50, %s4337_s25  ;;  %3972 = vmatmul.mubr.msk.f32.vlgmr.msra.gmra.mxu1 %vm307_vm6, %v877_v46  ;;  %v1078_v42 = vpop.permute.xlu0 %1077 }
0x1bbd   : > { %3981 = vmatprep.subr.mxu1 %v4324_v56  ;;  %3985 = vmatprep.mubr.msk.f32.mxu1 %vm4325_vm5, %v4324_v56 }
0x1bbe   : > { %3982 = vmatpush3.msra.mxu1 %v1078_v42  ;;  %2999 = vrot.lane.b32.xlu0 %v4798_v33, %s4337_s25  ;;  %v3189_v33 = vrot.slane %v4953_v55, 5  ;;  %v1466_v2 = vpop.permute.xlu1 %1465 }
0x1bbf   : > { %3983 = vmatprep.subr.mxu1 %v4324_v56 }
0x1bc0   : > { %3984 = vmatpush3.msra.mxu1 %v1076_v26  ;;  %3196 = vrot.lane.b32.xlu1 %v4824_v32, %s4337_s25  ;;  %v1273_v50 = vpop.permute.xlu0 %1272  ;;  %v1267_v32 = vrot.slane %v4937_v5, 4 }
0x1bc1   : > { %3986 = vmatmul.mubr.msk.f32.vlgmr.msra.gmra.mxu1 %vm307_vm6, %v1072_v27  ;;  %3995 = vmatprep.subr.mxu1 %v4324_v56 }
0x1bc2   : > { %3996 = vmatpush3.msra.mxu1 %v1273_v50  ;;  %2993 = vrot.lane.b32.xlu0 %v2992_v38, %s4339_s10  ;;  %v1661_v17 = vpop.permute.xlu1 %1660 }
0x1bc3   : > { %3997 = vmatprep.subr.mxu1 %v4324_v56  ;;  %3999 = vmatprep.mubr.msk.f32.mxu1 %vm4325_vm5, %v4324_v56 }
0x1bc4   : > { %3998 = vmatpush3.msra.mxu1 %v1271_v54  ;;  %3190 = vrot.lane.b32.xlu1 %v3189_v33, %s4339_s10  ;;  %v1468_v40 = vpop.permute.xlu0 %1467 }
0x1bc5   : > { %4000 = vmatmul.mubr.msk.f32.vlgmr.msra.gmra.mxu1 %vm307_vm6, %v1267_v32  ;;  %4009 = vmatprep.subr.mxu1 %v4324_v56 }
0x1bc6   : > { %4010 = vmatpush3.msra.mxu1 %v1468_v40  ;;  %3194 = vrot.lane.b32.xlu0 %v4829_v52, %s4337_s25  ;;  %v3582_v52 = vadd.f32 %v3580_v1, %v4851_v23 }
0x1bc7   : > { %4011 = vmatprep.subr.mxu1 %v4324_v56  ;;  %4013 = vmatprep.mubr.msk.f32.mxu1 %vm4325_vm5, %v4324_v56 }
0x1bc8   : > { %4012 = vmatpush3.msra.mxu1 %v1466_v2  ;;  %3391 = vrot.lane.b32.xlu1 %v4856_v57, %s4337_s25  ;;  %v1663_v44 = vpop.permute.xlu0 %1662  ;;  %v3579_v57 = vmul.f32 %v3578_v30, %v4931_v21 }
0x1bc9   : > { %4014 = vmatmul.mubr.msk.f32.vlgmr.msra.gmra.mxu1 %vm307_vm6, %v1462_v12  ;;  %4023 = vmatprep.subr.mxu1 %v4324_v56 }
0x1bca   : > { %4024 = vmatpush3.msra.mxu1 %v1663_v44  ;;  %3393 = vrot.lane.b32.xlu0 %v4848_v20, %s4337_s25  ;;  %v3583_v20 = vrot.slane %v4953_v55, 7  ;;  %v3581_v23 = vadd.f32 %v3579_v57, %v4860_v61 }
0x1bcb   : > { %4025 = vmatprep.subr.mxu1 %v4324_v56  ;;  %4027 = vmatprep.mubr.msk.f32.mxu1 %vm4325_vm5, %v4324_v56 }
0x1bcc   : > { %4026 = vmatpush3.msra.mxu1 %v1661_v17  ;;  %3590 = vrot.lane.b32.xlu1 %v3582_v52, %s4337_s25 }
0x1bcd   : > { %4028 = vmatmul.mubr.msk.f32.vlgmr.msra.gmra.mxu1 %vm307_vm6, %v1657_v39  ;;  %4037 = vmatprep.subr.mxu1 %v4324_v56 }
0x1bce   : > { %3387 = vrot.lane.b32.xlu0 %v3386_v59, %s4339_s10  ;;  %4041 = vmatprep.mubr.msk.f32.mxu1 %vm4325_vm5, %v4324_v56 }
0x1bd0   : > { %3584 = vrot.lane.b32.xlu1 %v3583_v20, %s4339_s10 }
0x1bd2   : > { %3588 = vrot.lane.b32.xlu0 %v3581_v23, %s4337_s25 }
0x1bd4   : > { %3704 = vrot.lane.b32.xlu1 %v4454_v19, %s4322_s6 }
0x1bfe   : > { %v1858_v13 = vpop.permute.xlu0 %1857 }
0x1bff   : > { %4038 = vmatpush3.msra.mxu1 %v1858_v13 }
0x1c00   : > { %4039 = vmatprep.subr.mxu1 %v4324_v56 }
0x1c02   : > { %v1856_v43 = vpop.permute.xlu1 %1855  ;;  %v2212_v34 = vpop.permute.xlu0 %2211 }
0x1c03   : > { %4040 = vmatpush3.msra.mxu1 %v1856_v43 }
0x1c04   : > { %4042 = vmatmul.mubr.msk.f32.vlgmr.msra.gmra.mxu1 %vm307_vm6, %v1852_v49  ;;  %4051 = vmatprep.subr.mxu1 %v4324_v56 }
0x1c05   : > { %4052 = vmatpush3.msra.mxu1 %v2212_v34  ;;  %4055 = vmatprep.mubr.msk.f32.mxu1 %vm4325_vm5, %v4324_v56 }
0x1c06   : > { %v2210_v61 = vpop.permute.xlu1 %2209  ;;  %4053 = vmatprep.subr.mxu1 %v4324_v56 }
0x1c07   : > { %4054 = vmatpush3.msra.mxu1 %v2210_v61 }
0x1c08   : > { %4065 = vmatprep.subr.mxu1 %v4324_v56 }
0x1c0a   : > { %v2409_v14 = vpop.permute.xlu1 %2408 }
0x1c1c   : > { %v2206_v6 = vpop.permute.xlu0 %2205 }
0x1c1d   : > { %4056 = vmatmul.mubr.msk.f32.vlgmr.msra.gmra.mxu1 %vm307_vm6, %v2206_v6 }
0x1c1e   : > { %4066 = vmatpush3.msra.mxu1 %v2409_v14  ;;  %v2403_v11 = vpop.permute.xlu1 %2402  ;;  %4069 = vmatprep.mubr.msk.f32.mxu1 %vm4325_vm5, %v4324_v56 }
0x1c1f   : > { %4067 = vmatprep.subr.mxu1 %v4324_v56 }
0x1c20   : > { %v2407_v25 = vpop.permute.xlu0 %2406 }
0x1c21   : > { %4068 = vmatpush3.msra.mxu1 %v2407_v25 }
0x1c22   : > { %v2604_v45 = vpop.permute.xlu1 %2603  ;;  %4070 = vmatmul.mubr.msk.f32.vlgmr.msra.gmra.mxu1 %vm307_vm6, %v2403_v11  ;;  %4079 = vmatprep.subr.mxu1 %v4324_v56 }
0x1c23   : > { %4083 = vmatprep.mubr.msk.f32.mxu1 %vm4325_vm5, %v4324_v56 }
0x1c24   : > { %v2606_v36 = vpop.permute.xlu0 %2605 }
0x1c25   : > { %4080 = vmatpush3.msra.mxu1 %v2606_v36 }
0x1c26   : > { %v2803_v16 = vpop.permute.xlu1 %2802  ;;  %4081 = vmatprep.subr.mxu1 %v4324_v56 }
0x1c27   : > { %4082 = vmatpush3.msra.mxu1 %v2604_v45 }
0x1c28   : > { %4093 = vmatprep.subr.mxu1 %v4324_v56  ;;  %v2600_v60 = vpop.permute.xlu0 %2599 }
0x1c29   : > { %4084 = vmatmul.mubr.msk.f32.vlgmr.msra.gmra.mxu1 %vm307_vm6, %v2600_v60 }
0x1c2a   : > { %4094 = vmatpush3.msra.mxu1 %v2803_v16  ;;  %v2797_v58 = vpop.permute.xlu1 %2796  ;;  %4097 = vmatprep.mubr.msk.f32.mxu1 %vm4325_vm5, %v4324_v56 }
0x1c2b   : > { %4095 = vmatprep.subr.mxu1 %v4324_v56 }
0x1c2c   : > { %v2801_v31 = vpop.permute.xlu0 %2800 }
0x1c2d   : > { %4096 = vmatpush3.msra.mxu1 %v2801_v31 }
0x1c2e   : > { %v2998_v29 = vpop.permute.xlu1 %2997  ;;  %4098 = vmatmul.mubr.msk.f32.vlgmr.msra.gmra.mxu1 %vm307_vm6, %v2797_v58  ;;  %4107 = vmatprep.subr.mxu1 %v4324_v56 }
0x1c2f   : > { %4111 = vmatprep.mubr.msk.f32.mxu1 %vm4325_vm5, %v4324_v56 }
0x1c30   : > { %v3000_v3 = vpop.permute.xlu0 %2999 }
0x1c31   : > { %4108 = vmatpush3.msra.mxu1 %v3000_v3 }
0x1c32   : > { %v3197_v9 = vpop.permute.xlu1 %3196  ;;  %4109 = vmatprep.subr.mxu1 %v4324_v56 }
0x1c33   : > { %4110 = vmatpush3.msra.mxu1 %v2998_v29 }
0x1c34   : > { %4121 = vmatprep.subr.mxu1 %v4324_v56  ;;  %v2994_v21 = vpop.permute.xlu0 %2993 }
0x1c35   : > { %4112 = vmatmul.mubr.msk.f32.vlgmr.msra.gmra.mxu1 %vm307_vm6, %v2994_v21 }
0x1c36   : > { %4122 = vmatpush3.msra.mxu1 %v3197_v9  ;;  %v3191_v8 = vpop.permute.xlu1 %3190  ;;  %4125 = vmatprep.mubr.msk.f32.mxu1 %vm4325_vm5, %v4324_v56 }
0x1c37   : > { %4123 = vmatprep.subr.mxu1 %v4324_v56 }
0x1c38   : > { %v3195_v41 = vpop.permute.xlu0 %3194 }
0x1c39   : > { %4124 = vmatpush3.msra.mxu1 %v3195_v41 }
0x1c3a   : > { %v3392_v37 = vpop.permute.xlu1 %3391  ;;  %4126 = vmatmul.mubr.msk.f32.vlgmr.msra.gmra.mxu1 %vm307_vm6, %v3191_v8  ;;  %4135 = vmatprep.subr.mxu1 %v4324_v56 }
0x1c3b   : > { %4139 = vmatprep.mubr.msk.f32.mxu1 %vm4325_vm5, %v4324_v56 }
0x1c3c   : > { %v3394_v24 = vpop.permute.xlu0 %3393 }
0x1c3d   : > { %4136 = vmatpush3.msra.mxu1 %v3394_v24 }
0x1c3e   : > { %4137 = vmatprep.subr.mxu1 %v4324_v56  ;;  %v3591_v47 = vpop.permute.xlu1 %3590 }
0x1c3f   : > { %4138 = vmatpush3.msra.mxu1 %v3392_v37 }
0x1c40   : > { %4149 = vmatprep.subr.mxu1 %v4324_v56  ;;  %v3388_v5 = vpop.permute.xlu0 %3387 }
0x1c41   : > { %4140 = vmatmul.mubr.msk.f32.vlgmr.msra.gmra.mxu1 %vm307_vm6, %v3388_v5 }
0x1c42   : > { %4150 = vmatpush3.msra.mxu1 %v3591_v47  ;;  %4153 = vmatprep.mubr.msk.f32.mxu1 %vm4325_vm5, %v4324_v56  ;;  %v3585_v53 = vpop.permute.xlu1 %3584  ;;  %vm1962_vm5 = vcmask 1044480  }
0x1c43   : > { %4151 = vmatprep.subr.mxu1 %v4324_v56 }
0x1c44   : > { %v3589_v35 = vpop.permute.xlu0 %3588 }
0x1c45   : > { %4152 = vmatpush3.msra.mxu1 %v3589_v35 }
0x1c46   : > { %4154 = vmatmul.mubr.msk.f32.vlgmr.msra.gmra.mxu1 %vm307_vm6, %v3585_v53  ;;  %vm1964_vm6 = vcmask 1045504  }
0x1c59   : > { %v564_v28 = vpop.f32.mrf.mxu1 }
0x1c5b   : > { %v3945_v63 = vpop.f32.mrf.mxu1 }
0x1c5d   : > { %v759_v48 = vpop.f32.mrf.mxu1 }
0x1c5e   : > { %v1934_v0 = vrot.slane %v759_v48, 7 }
0x1c5f   : > { %v3959_v55 = vpop.f32.mrf.mxu1 }
0x1c60   : > { %v1955_v10 = vsel %vm1954_vm1, %v564_v28, %v1934_v0 }
0x1c7c   : > { %v954_v15 = vpop.f32.mrf.mxu1 }
0x1c7d   : > { %v1937_v62 = vrot.slane %v954_v15, 6  ;;  %v3812_v15 = vld [vmem:[%s5109_s2] ss:$0 sm:$0xff] }
0x1c7e   : > { %v3973_v18 = vpop.f32.mrf.mxu1 }
0x1c7f   : > { %v1957_v22 = vsel %vm1956_vm2, %v1955_v10, %v1937_v62  ;;  %v3705_v18 = vpop.permute.xlu1 %3704 }
0x1c81   : > { %v1149_v56 = vpop.f32.mrf.mxu1 }
0x1c82   : > { %v1940_v27 = vrot.slane %v1149_v56, 5 }
0x1c83   : > { %v3987_v4 = vpop.f32.mrf.mxu1 }
0x1c84   : > { %v1959_v33 = vsel %vm1958_vm3, %v1957_v22, %v1940_v27 }
0x1c85   : > { %v1344_v26 = vpop.f32.mrf.mxu1 }
0x1c86   : > { %v1943_v50 = vrot.slane %v1344_v26, 4 }
0x1c87   : > { %v4001_v7 = vpop.f32.mrf.mxu1 }
0x1c88   : > { %v1961_v32 = vsel %vm1960_vm4, %v1959_v33, %v1943_v50 }
0x1c89   : > { %v1539_v46 = vpop.f32.mrf.mxu1 }
0x1c8a   : > { %v1946_v38 = vrot.slane %v1539_v46, 3 }
0x1c8b   : > { %v4015_v42 = vpop.f32.mrf.mxu1 }
0x1c8c   : > { %v1963_v2 = vsel %vm1962_vm5, %v1961_v32, %v1946_v38 }
0x1c8d   : > { %v1734_v51 = vpop.f32.mrf.mxu1 }
0x1c8e   : > { %v1949_v30 = vrot.slane %v1734_v51, 2 }
0x1c8f   : > { %v4029_v54 = vpop.f32.mrf.mxu1 }
0x1c90   : > { %v1965_v12 = vsel %vm1964_vm6, %v1963_v2, %v1949_v30 }
0x1cc4   : > { %v1929_v40 = vpop.f32.mrf.mxu1 }
0x1cc5   : > { %v1952_v1 = vrot.slane %v1929_v40, 1 }
0x1cc6   : > { %v4043_v44 = vpop.f32.mrf.mxu1 }
0x1cc7   : > { %v1967_v52 = vsel %vm1966_vm7, %v1965_v12, %v1952_v1 }
0x1cc8   : > { %v1968_v17 = vmul.f32 %v1967_v52, %v1967_v52 }
0x1cca   : > { %v1970_v39 = vsel %vm1969_vm8, %v1968_v17, 0.0 }
0x1ccb   : > { %1971 = vadd.xlane.f32.xlu1 %v1970_v39 }
0x1cdd   : > { %v2283_v57 = vpop.f32.mrf.mxu1 }
0x1cdf   : > { %v4057_v59 = vpop.f32.mrf.mxu1 }
0x1ce2   : > { %v2480_v20 = vpop.f32.mrf.mxu1 }
0x1ce3   : > { %v3667_v25 = vrot.slane %v2480_v20, 7 }
0x1ce4   : > { %v4071_v23 = vpop.f32.mrf.mxu1 }
0x1ce5   : > { %v3687_v58 = vsel %vm1954_vm1, %v2283_v57, %v3667_v25 }
0x1ce9   : > { %v2677_v13 = vpop.f32.mrf.mxu1 }
0x1cea   : > { %v3670_v45 = vrot.slane %v2677_v13, 6 }
0x1ceb   : > { %v4085_v43 = vpop.f32.mrf.mxu1 }
0x1cec   : > { %v3688_v3 = vsel %vm1956_vm2, %v3687_v58, %v3670_v45 }
0x1cee   : > { %v2874_v49 = vpop.f32.mrf.mxu1 }
0x1cef   : > { %v3673_v36 = vrot.slane %v2874_v49, 5 }
0x1cf0   : > { %v4099_v34 = vpop.f32.mrf.mxu1 }
0x1cf1   : > { %v3689_v21 = vsel %vm1958_vm3, %v3688_v3, %v3673_v36 }
0x1cf5   : > { %v3071_v61 = vpop.f32.mrf.mxu1 }
0x1cf6   : > { %v3676_v60 = vrot.slane %v3071_v61, 4 }
0x1cf7   : > { %v4113_v14 = vpop.f32.mrf.mxu1 }
0x1cf8   : > { %v3690_v8 = vsel %vm1960_vm4, %v3689_v21, %v3676_v60 }
0x1cfa   : > { %v3268_v6 = vpop.f32.mrf.mxu1 }
0x1cfb   : > { %v3679_v31 = vrot.slane %v3268_v6, 3 }
0x1cfc   : > { %v4127_v11 = vpop.f32.mrf.mxu1 }
0x1cfd   : > { %v3691_v37 = vsel %vm1962_vm5, %v3690_v8, %v3679_v31 }
0x1d01   : > { %v3465_v16 = vpop.f32.mrf.mxu1 }
0x1d02   : > { %v3682_v9 = vrot.slane %v3465_v16, 2 }
0x1d03   : > { %v4141_v29 = vpop.f32.mrf.mxu1 }
0x1d04   : > { %v3692_v47 = vsel %vm1964_vm6, %v3691_v37, %v3682_v9 }
0x1d06   : > { %v3662_v41 = vpop.f32.mrf.mxu1 }
0x1d07   : > { %v3685_v24 = vrot.slane %v3662_v41, 1 }
0x1d08   : > { %v4155_v5 = vpop.f32.mrf.mxu1 }
0x1d09   : > { %v3693_v35 = vsel %vm1966_vm7, %v3692_v47, %v3685_v24 }
0x1d0a   : > { %v3694_v53 = vmul.f32 %v3693_v35, %v3693_v35 }
0x1d0c   : > { %v3695_v28 = vsel %vm1969_vm8, %v3694_v53, 0.0 }
0x1d0d   : > { %3696 = vadd.xlane.f32.xlu0 %v3695_v28 }
0x1d54   : > { %v1972_v56 = vpop.xlane.xlu1 %1971 }
0x1d55   : > { %v1974_v4 = vmul.f32 0.03125, %v1972_v56 }
0x1d57   : > { %v1975_v26 = vadd.f32 1e-05, %v1974_v4 }
0x1d96   : > { %v3697_v63 = vpop.xlane.xlu0 %3696 }
0x1d97   : > { %v3698_v48 = vmul.f32 0.03125, %v3697_v63 }
0x1d99   : > { %v3699_v0 = vadd.f32 1e-05, %v3698_v48 }
0x1d9b   : > { %4290 = vrsqrt.f32 %v3699_v0 }
0x1d9c   : > { %4292 = vrsqrt.f32 %v1975_v26 }
0x1da8   : > { %v4291_v55 = vpop.eup %4290 }
0x1da9   : > { %v3701_v10 = vmul.f32 %v4291_v55, %v3693_v35  ;;  %v4293_v7 = vpop.eup %4292 }
0x1daa   : > { %v1977_v46 = vmul.f32 %v4293_v7, %v1967_v52 }
0x1dab   : > { %v3702_v62 = vmul.f32 %v3812_v15, %v3701_v10 }
0x1dac   : > { %v1984_v42 = vmul.f32 %v3812_v15, %v1977_v46 }
0x1dad   : > { %v3707_v22 = vmul.f32 %v3705_v18, %v3702_v62 }
0x1dae   : > { %v1985_v51 = vmul.f32 %v4454_v19, %v1984_v42 }
0x1daf   : > { %3709 = vrot.lane.b32.xlu0 %v3707_v22, %s4337_s25 }
0x1e21   : > { %v3710_v54 = vpop.permute.xlu0 %3709 }
0x1e22   : > { %v3712_v27 = vsel %vm1969_vm8, %v1985_v51, %v3710_v54 }
0x1e23   : > { %v3713_v50 = vpack.c.bf16 %v3712_v27, %v3712_v27 }
0x1e25   : > { %3715 = vst.msk [vmem:[%s209_s14] sm:$0xf] %vm3714_vm9, %v3713_v50 }
0x1e26 PF: > { %s15_s15 = sadd.s32 1, %s4319_s15  }
0x1e27   : > { %p12_p1 = scmp.ge.s32.totalorder %s15_s15, 4  }
0x1e29   :  { %14 = sbr.rel (!%p12_p1) target bundleno = 1 (0x1), region = 71 }
0x1e2e   :  { %3735 = vsyncpa [#allocation3], 1 }
0x1e2f   :  { %3737 = vsyncpa [#allocation3 + $0x1], 1 }

</bundles_post_ra>
